<compile_context>
chip_gen: v7x
topology: tpu7x:2x2x1
jax: 0.10.0
libtpu: 0.0.40
codegen_flags: <defaults>
</compile_context>

<pallas_src>
import functools

import jax
import jax.numpy as jnp
from jax import lax
from jax.experimental import pallas as pl
from jax.experimental.pallas import tpu as pltpu


# ----------------------------- TPU-generation policy -----------------------------

def _tpu_generation_info():
    """(num_tensorcores_per_chip, mxu_row_target, vmem_capacity_bytes).

    Safe defaults are returned if the device kind cannot be determined."""
    kind = ""
    try:
        kind = jax.devices()[0].device_kind.lower()
    except Exception:
        pass
    is_v5e = ("v5 lite" in kind) or ("v5e" in kind) or ("v5litepod" in kind)
    is_v7 = "v7" in kind
    is_v4 = "v4" in kind
    num_tc = 2 if (is_v7 or is_v4) else 1          # v7x: 2 TCs/chip; v4: megacore
    row_target = 128 if is_v5e else 256            # v5e MXU 4x128x128; v6e/v7x 2x256x256
    vmem_cap = (64 << 20) if is_v7 else (128 << 20)
    return num_tc, row_target, vmem_cap


def _pick_batch_tile(B, N, num_tc, row_target):
    """Largest bb with B % bb == 0 and bb*N <= row_target, preferring choices that keep
    the grid (B // bb) divisible by the TensorCore count so 'parallel' can shard."""
    cands = [c for c in range(min(B, max(1, row_target // N)), 0, -1) if B % c == 0]
    for c in cands:
        if (B // c) % num_tc == 0:
            return c
    return cands[0] if cands else 1


def _derive_vmem_limit(in_block_bytes, out_block_bytes, weight_bytes, vmem_cap):
    """vmem_limit_bytes from actual block sizes (double-buffered) + weights, with
    headroom for live intermediates / compiler scratch, clamped to be v7x-safe."""
    need = 2 * (in_block_bytes + out_block_bytes) + 2 * weight_bytes
    limit = 4 * need + (8 << 20)
    cap = min(vmem_cap // 2, 48 << 20)             # <= 32 MiB on v7x (64 MiB/TC)
    return int(min(max(limit, 16 << 20), cap))


def _full_spec(shape):
    """Whole-array block, constant over the 1-D grid (Pallas skips re-DMA)."""
    nd = len(shape)
    return pl.BlockSpec(shape, lambda b, _nd=nd: (0,) * _nd)


# --------------------------------- fused kernel -----------------------------------

def _conv1x3_folded(x, w_ref, W, mxu_dtype):
    """1x3 conv along W (pad=1) on batch-folded rows x:(bb*W, Cin), w_ref:(3, Cin, Cout).

    With feature height 1 the kh=0/2 rows of the original 3x3 kernel only ever see zero
    padding, so the conv is exactly three shifted matmuls.  Edge masks use per-image
    boundaries (row % W) so the roll never leaks across batch images."""
    M = x.shape[0]
    r = lax.broadcasted_iota(jnp.int32, (M, 1), 0) % W
    left = jnp.where(r == 0, 0.0, pltpu.roll(x, shift=1, axis=0))          # row m <- x[m-1]
    right = jnp.where(r == W - 1, 0.0, pltpu.roll(x, shift=M - 1, axis=0))  # row m <- x[m+1]

    def mm(a, k):
        return jnp.dot(a.astype(mxu_dtype), w_ref[k], preferred_element_type=jnp.float32)

    return mm(left, 0) + mm(x, 1) + mm(right, 2)


def _sequence_encoder_kernel(
        x_ref,
        w1_ref, s1_ref, b1_ref, w2_ref, s2_ref, b2_ref,
        ln1w_ref, ln1b_ref, wq_ref, bq_ref, wk_ref, bk_ref, wv_ref, bv_ref,
        wp_ref, bp_ref, ln2w_ref, ln2b_ref, wf1_ref, bf1_ref, wf2_ref, bf2_ref,
        nw_ref, nb_ref,
        w3_ref, s3_ref, b3_ref, w4g_ref, w4z_ref, s4_ref, b4_ref,
        w5_ref, s5_ref, b5_ref,
        o_ref,
        *, depth, num_heads, W, eps_blk, eps_out, mxu_dtype):
    bb, _, Cin = x_ref.shape
    M = bb * W
    guide = x_ref[...].astype(jnp.float32).reshape(M, Cin)   # stays in VMEM for conv4

    def mm(a, w):
        return jnp.dot(a.astype(mxu_dtype), w, preferred_element_type=jnp.float32)

    def swish(v):
        return v * jax.nn.sigmoid(v)

    def ln(v, g, b, eps):
        mu = jnp.mean(v, axis=-1, keepdims=True)
        var = jnp.mean(jnp.square(v - mu), axis=-1, keepdims=True)
        return (v - mu) * lax.rsqrt(var + eps) * g + b

    # ---- front: conv1 (3x3 -> 1x3) + BN + swish, conv2 (1x1) + BN + swish ----
    y = _conv1x3_folded(guide, w1_ref, W, mxu_dtype)
    y = swish(y * s1_ref[...] + b1_ref[...])
    z = mm(y, w2_ref[...])
    z = swish(z * s2_ref[...] + b2_ref[...])                 # (M, C)

    # ---- SVTR blocks (batch folded into M; qk scale pre-folded into wq/bq) ----
    C = z.shape[-1]
    hd = C // num_heads

    def block_step(d, xz):
        # attention mixer:  x = x + proj(MHA(LN1(x)))
        xa = ln(xz, ln1w_ref[d], ln1b_ref[d], eps_blk)
        q = mm(xa, wq_ref[d]) + bq_ref[d]
        k = mm(xa, wk_ref[d]) + bk_ref[d]
        v = mm(xa, wv_ref[d]) + bv_ref[d]
        # Static head loop: hd-wide lane slices + one lane concat + ONE (M,C)@(C,C)
        # projection.  (A 4-D head-batched einsum would require a mid-dim transpose at
        # sub-vreg head sizes that Mosaic may fail to lower; these slices are cheap XLU
        # work that overlaps the MXU.)
        heads = []
        for h in range(num_heads):
            lo, hi = h * hd, (h + 1) * hd
            qh = q[:, lo:hi].reshape(bb, W, hd)
            kh = k[:, lo:hi].reshape(bb, W, hd)
            vh = v[:, lo:hi].reshape(bb, W, hd)
            s = jnp.einsum('bqd,bkd->bqk', qh.astype(mxu_dtype), kh.astype(mxu_dtype),
                           preferred_element_type=jnp.float32)
            s = s - jnp.max(s, axis=-1, keepdims=True)
            e = jnp.exp(s)
            attn = e * pl.reciprocal(jnp.sum(e, axis=-1, keepdims=True), approx=True)
            ctx = jnp.einsum('bqk,bkd->bqd', attn.astype(mxu_dtype), vh.astype(mxu_dtype),
                             preferred_element_type=jnp.float32)
            heads.append(ctx.reshape(M, hd))
        ctx = jnp.concatenate(heads, axis=-1)                # (M, C): heads on lanes
        xz = xz + mm(ctx, wp_ref[d]) + bp_ref[d]             # single projection matmul
        # MLP:  x = x + fc2(swish(fc1(LN2(x))))
        xm = ln(xz, ln2w_ref[d], ln2b_ref[d], eps_blk)
        h1 = swish(mm(xm, wf1_ref[d]) + bf1_ref[d])
        return xz + mm(h1, wf2_ref[d]) + bf2_ref[d]

    if depth <= 4:                    # small stacks: static unroll (best LLO scheduling)
        for d in range(depth):
            z = block_step(d, z)
    else:                             # deep stacks: bound code size / vreg live ranges
        z = lax.fori_loop(0, depth, block_step, z)

    z = ln(z, nw_ref[...], nb_ref[...], eps_out)             # final LayerNorm fused in

    # ---- tail: conv3 (1x1), cat(guide, .) -> conv4 (1x3), conv1x1 ----
    t = mm(z, w3_ref[...])
    t = swish(t * s3_ref[...] + b3_ref[...])                 # (M, Cin)
    # conv4 on torch.cat((h, z), dim=1) == conv1x3(guide; w4[:, :Cin]) + conv1x3(t; w4[:, Cin:])
    u = (_conv1x3_folded(guide, w4g_ref, W, mxu_dtype)
         + _conv1x3_folded(t, w4z_ref, W, mxu_dtype))
    u = swish(u * s4_ref[...] + b4_ref[...])
    out = mm(u, w5_ref[...])
    out = swish(out * s5_ref[...] + b5_ref[...])
    o_ref[...] = out.reshape(bb, W, -1).astype(o_ref.dtype)


# --------------------------------- params & forward --------------------------------

def _bn_fold(bnp, eps=1e-5):
    scale = bnp["gamma"] / jnp.sqrt(bnp["var"] + eps)
    shift = bnp["beta"] - bnp["mean"] * scale
    return scale[None, :], shift[None, :]


def init_params(key, in_channels, dims, depth, hidden_dims, num_heads, mlp_ratio):
    keys = iter(jax.random.split(key, 128))

    def conv3x3_w(cin, cout):
        # kaiming_normal_(mode='fan_out'): std = sqrt(2 / (cout*3*3)).  Only the middle
        # kh row is materialized (kw, cin, cout); with H==1 and pad=1 the kh=0/2 rows
        # only ever multiply zero padding.
        std = (2.0 / (cout * 9)) ** 0.5
        return std * jax.random.normal(next(keys), (3, cin, cout), jnp.float32)

    def conv1x1_w(cin, cout):
        std = (2.0 / cout) ** 0.5
        return std * jax.random.normal(next(keys), (cin, cout), jnp.float32)

    def bn(c):  # BatchNorm2d init: weight=1, bias=0, running_mean=0, running_var=1
        return dict(gamma=jnp.ones((c,), jnp.float32), beta=jnp.zeros((c,), jnp.float32),
                    mean=jnp.zeros((c,), jnp.float32), var=jnp.ones((c,), jnp.float32))

    def linear(cin, cout):  # nn.init.normal_(w, 0, 0.01), zero bias; stored (cin, cout)
        w = 0.01 * jax.random.normal(next(keys), (cin, cout), jnp.float32)
        return w, jnp.zeros((1, cout), jnp.float32)

    def stacked_linear(cin, cout):
        ws, bs = [], []
        for _ in range(depth):
            w, b = linear(cin, cout)
            ws.append(w); bs.append(b)
        return jnp.stack(ws, 0), jnp.stack(bs, 0)

    c8 = in_channels // 8
    C = hidden_dims
    mlp_hidden = int(hidden_dims * mlp_ratio)

    p = {}
    p["conv1_w"] = conv3x3_w(in_channels, c8);          p["conv1_bn"] = bn(c8)
    p["conv2_w"] = conv1x1_w(c8, hidden_dims);          p["conv2_bn"] = bn(hidden_dims)

    blk = {}
    blk["ln1w"] = jnp.ones((depth, 1, C), jnp.float32)
    blk["ln1b"] = jnp.zeros((depth, 1, C), jnp.float32)
    blk["wq"], blk["bq"] = stacked_linear(C, C)          # split of the (C, 3C) qkv Linear
    blk["wk"], blk["bk"] = stacked_linear(C, C)
    blk["wv"], blk["bv"] = stacked_linear(C, C)
    blk["wproj"], blk["bproj"] = stacked_linear(C, C)
    blk["ln2w"] = jnp.ones((depth, 1, C), jnp.float32)
    blk["ln2b"] = jnp.zeros((depth, 1, C), jnp.float32)
    blk["wfc1"], blk["bfc1"] = stacked_linear(C, mlp_hidden)
    blk["wfc2"], blk["bfc2"] = stacked_linear(mlp_hidden, C)
    p["blocks"] = blk

    p["norm_w"] = jnp.ones((1, C), jnp.float32)
    p["norm_b"] = jnp.zeros((1, C), jnp.float32)
    p["conv3_w"] = conv1x1_w(hidden_dims, in_channels); p["conv3_bn"] = bn(in_channels)
    p["conv4_w"] = conv3x3_w(2 * in_channels, c8);      p["conv4_bn"] = bn(c8)
    p["conv1x1_w"] = conv1x1_w(c8, dims);               p["conv1x1_bn"] = bn(dims)
    return p


def sequence_encoder_forward(x_nchw, p, *, num_heads, mxu_dtype=jnp.bfloat16):
    B, Cin, H, W = x_nchw.shape
    assert H == 1, "Im2Seq requires feature height == 1"
    # NCHW -> (B, W, C); with H==1 this equals flatten(2).permute(0, 2, 1).
    x = jnp.transpose(x_nchw, (0, 2, 3, 1)).reshape(B, W, Cin).astype(jnp.float32)

    cast = lambda w: w.astype(mxu_dtype)   # pre-cast matmul weights (halves weight DMA)

    s1, b1 = _bn_fold(p["conv1_bn"]); s2, b2 = _bn_fold(p["conv2_bn"])
    s3, b3 = _bn_fold(p["conv3_bn"]); s4, b4 = _bn_fold(p["conv4_bn"])
    s5, b5 = _bn_fold(p["conv1x1_bn"])

    blk = p["blocks"]
    C = p["conv2_w"].shape[-1]
    depth = blk["wq"].shape[0]
    scale = (C // num_heads) ** (-0.5)
    wq = cast(blk["wq"] * scale)           # fold the qk scale into the q projection
    bq = blk["bq"] * scale
    w4 = p["conv4_w"]
    w4g, w4z = cast(w4[:, :Cin]), cast(w4[:, Cin:])   # split along cat's channel axis

    weights = dict(
        w1=cast(p["conv1_w"]), s1=s1, b1=b1, w2=cast(p["conv2_w"]), s2=s2, b2=b2,
        ln1w=blk["ln1w"], ln1b=blk["ln1b"], wq=wq, bq=bq,
        wk=cast(blk["wk"]), bk=blk["bk"], wv=cast(blk["wv"]), bv=blk["bv"],
        wp=cast(blk["wproj"]), bp=blk["bproj"], ln2w=blk["ln2w"], ln2b=blk["ln2b"],
        wf1=cast(blk["wfc1"]), bf1=blk["bfc1"], wf2=cast(blk["wfc2"]), bf2=blk["bfc2"],
        nw=p["norm_w"], nb=p["norm_b"],
        w3=cast(p["conv3_w"]), s3=s3, b3=b3, w4g=w4g, w4z=w4z, s4=s4, b4=b4,
        w5=cast(p["conv1x1_w"]), s5=s5, b5=b5)
    worder = ["w1", "s1", "b1", "w2", "s2", "b2",
              "ln1w", "ln1b", "wq", "bq", "wk", "bk", "wv", "bv", "wp", "bp",
              "ln2w", "ln2b", "wf1", "bf1", "wf2", "bf2", "nw", "nb",
              "w3", "s3", "b3", "w4g", "w4z", "s4", "b4", "w5", "s5", "b5"]
    weight_args = [weights[k] for k in worder]

    dims = p["conv1x1_w"].shape[-1]
    num_tc, row_target, vmem_cap = _tpu_generation_info()
    bb = _pick_batch_tile(B, W, num_tc, row_target)

    in_block_bytes = bb * W * Cin * 4
    out_block_bytes = bb * W * dims * 4
    weight_bytes = sum(int(a.size) * a.dtype.itemsize for a in weight_args)
    vmem_limit = _derive_vmem_limit(in_block_bytes, out_block_bytes, weight_bytes, vmem_cap)

    kernel = functools.partial(
        _sequence_encoder_kernel, depth=depth, num_heads=num_heads, W=W,
        eps_blk=1e-5, eps_out=1e-6, mxu_dtype=mxu_dtype)

    out = pl.pallas_call(
        kernel,
        out_shape=jax.ShapeDtypeStruct((B, W, dims), jnp.float32),
        grid=(B // bb,),
        in_specs=[pl.BlockSpec((bb, W, Cin), lambda b: (b, 0, 0))]
                 + [_full_spec(a.shape) for a in weight_args],
        out_specs=pl.BlockSpec((bb, W, dims), lambda b: (b, 0, 0)),
        compiler_params=pltpu.CompilerParams(
            dimension_semantics=("parallel",), vmem_limit_bytes=vmem_limit),
    )(x, *weight_args)
    # (B, W, dims) == Im2Seq output (squeeze(dim=2).permute(0, 2, 1)) since H == 1.
    return out


if __name__ == "__main__":
    in_channels, dims, depth, hidden_dims, num_heads, mlp_ratio = 32, 32, 2, 32, 4, 2.0
    B, H, W = 2, 1, 16                                       # H must be 1 for Im2Seq

    key = jax.random.PRNGKey(0)
    kx, kp = jax.random.split(key)
    x = jax.random.normal(kx, (B, in_channels, H, W), jnp.float32)   # NCHW, like PyTorch
    params = init_params(kp, in_channels, dims, depth, hidden_dims, num_heads, mlp_ratio)

    fwd = jax.jit(functools.partial(sequence_encoder_forward, num_heads=num_heads))
    out = jax.block_until_ready(fwd(x, params))
    assert out.shape == (B, W, dims), out.shape
    assert bool(jnp.all(jnp.isfinite(out)))
    print("KERNEL_OK")
</pallas_src>

<mosaic_0001>
module attributes {stable_mosaic.version = 11 : i64} {
  func.func @_sequence_encoder_kernel(%arg0: i32, %arg1: memref<2x16x32xf32, #tpu.memory_space<vmem>>, %arg2: memref<3x32x4xbf16, #tpu.memory_space<vmem>>, %arg3: memref<1x4xf32, #tpu.memory_space<vmem>>, %arg4: memref<1x4xf32, #tpu.memory_space<vmem>>, %arg5: memref<4x32xbf16, #tpu.memory_space<vmem>>, %arg6: memref<1x32xf32, #tpu.memory_space<vmem>>, %arg7: memref<1x32xf32, #tpu.memory_space<vmem>>, %arg8: memref<2x1x32xf32, #tpu.memory_space<vmem>>, %arg9: memref<2x1x32xf32, #tpu.memory_space<vmem>>, %arg10: memref<2x32x32xbf16, #tpu.memory_space<vmem>>, %arg11: memref<2x1x32xf32, #tpu.memory_space<vmem>>, %arg12: memref<2x32x32xbf16, #tpu.memory_space<vmem>>, %arg13: memref<2x1x32xf32, #tpu.memory_space<vmem>>, %arg14: memref<2x32x32xbf16, #tpu.memory_space<vmem>>, %arg15: memref<2x1x32xf32, #tpu.memory_space<vmem>>, %arg16: memref<2x32x32xbf16, #tpu.memory_space<vmem>>, %arg17: memref<2x1x32xf32, #tpu.memory_space<vmem>>, %arg18: memref<2x1x32xf32, #tpu.memory_space<vmem>>, %arg19: memref<2x1x32xf32, #tpu.memory_space<vmem>>, %arg20: memref<2x32x64xbf16, #tpu.memory_space<vmem>>, %arg21: memref<2x1x64xf32, #tpu.memory_space<vmem>>, %arg22: memref<2x64x32xbf16, #tpu.memory_space<vmem>>, %arg23: memref<2x1x32xf32, #tpu.memory_space<vmem>>, %arg24: memref<1x32xf32, #tpu.memory_space<vmem>>, %arg25: memref<1x32xf32, #tpu.memory_space<vmem>>, %arg26: memref<32x32xbf16, #tpu.memory_space<vmem>>, %arg27: memref<1x32xf32, #tpu.memory_space<vmem>>, %arg28: memref<1x32xf32, #tpu.memory_space<vmem>>, %arg29: memref<3x32x4xbf16, #tpu.memory_space<vmem>>, %arg30: memref<3x32x4xbf16, #tpu.memory_space<vmem>>, %arg31: memref<1x4xf32, #tpu.memory_space<vmem>>, %arg32: memref<1x4xf32, #tpu.memory_space<vmem>>, %arg33: memref<4x32xbf16, #tpu.memory_space<vmem>>, %arg34: memref<1x32xf32, #tpu.memory_space<vmem>>, %arg35: memref<1x32xf32, #tpu.memory_space<vmem>>, %arg36: memref<2x16x32xf32, #tpu.memory_space<vmem>>) attributes {dimension_semantics = [#tpu.dimension_semantics<parallel>], iteration_bounds = array<i64: 1>, scalar_prefetch = 0 : i64, scratch_operands = 0 : i64, tpu.core_type = #tpu.core_type<tc>, window_params = [{transform_indices = @transform_0, window_bounds = array<i64: 2, 16, 32>}, {pipeline_mode = #tpu.pipeline_mode<synchronous>, transform_indices = @transform_1, window_bounds = array<i64: 3, 32, 4>}, {pipeline_mode = #tpu.pipeline_mode<synchronous>, transform_indices = @transform_2, window_bounds = array<i64: 1, 4>}, {pipeline_mode = #tpu.pipeline_mode<synchronous>, transform_indices = @transform_3, window_bounds = array<i64: 1, 4>}, {pipeline_mode = #tpu.pipeline_mode<synchronous>, transform_indices = @transform_4, window_bounds = array<i64: 4, 32>}, {pipeline_mode = #tpu.pipeline_mode<synchronous>, transform_indices = @transform_5, window_bounds = array<i64: 1, 32>}, {pipeline_mode = #tpu.pipeline_mode<synchronous>, transform_indices = @transform_6, window_bounds = array<i64: 1, 32>}, {pipeline_mode = #tpu.pipeline_mode<synchronous>, transform_indices = @transform_7, window_bounds = array<i64: 2, 1, 32>}, {pipeline_mode = #tpu.pipeline_mode<synchronous>, transform_indices = @transform_8, window_bounds = array<i64: 2, 1, 32>}, {pipeline_mode = #tpu.pipeline_mode<synchronous>, transform_indices = @transform_9, window_bounds = array<i64: 2, 32, 32>}, {pipeline_mode = #tpu.pipeline_mode<synchronous>, transform_indices = @transform_10, window_bounds = array<i64: 2, 1, 32>}, {pipeline_mode = #tpu.pipeline_mode<synchronous>, transform_indices = @transform_11, window_bounds = array<i64: 2, 32, 32>}, {pipeline_mode = #tpu.pipeline_mode<synchronous>, transform_indices = @transform_12, window_bounds = array<i64: 2, 1, 32>}, {pipeline_mode = #tpu.pipeline_mode<synchronous>, transform_indices = @transform_13, window_bounds = array<i64: 2, 32, 32>}, {pipeline_mode = #tpu.pipeline_mode<synchronous>, transform_indices = @transform_14, window_bounds = array<i64: 2, 1, 32>}, {pipeline_mode = #tpu.pipeline_mode<synchronous>, transform_indices = @transform_15, window_bounds = array<i64: 2, 32, 32>}, {pipeline_mode = #tpu.pipeline_mode<synchronous>, transform_indices = @transform_16, window_bounds = array<i64: 2, 1, 32>}, {pipeline_mode = #tpu.pipeline_mode<synchronous>, transform_indices = @transform_17, window_bounds = array<i64: 2, 1, 32>}, {pipeline_mode = #tpu.pipeline_mode<synchronous>, transform_indices = @transform_18, window_bounds = array<i64: 2, 1, 32>}, {pipeline_mode = #tpu.pipeline_mode<synchronous>, transform_indices = @transform_19, window_bounds = array<i64: 2, 32, 64>}, {pipeline_mode = #tpu.pipeline_mode<synchronous>, transform_indices = @transform_20, window_bounds = array<i64: 2, 1, 64>}, {pipeline_mode = #tpu.pipeline_mode<synchronous>, transform_indices = @transform_21, window_bounds = array<i64: 2, 64, 32>}, {pipeline_mode = #tpu.pipeline_mode<synchronous>, transform_indices = @transform_22, window_bounds = array<i64: 2, 1, 32>}, {pipeline_mode = #tpu.pipeline_mode<synchronous>, transform_indices = @transform_23, window_bounds = array<i64: 1, 32>}, {pipeline_mode = #tpu.pipeline_mode<synchronous>, transform_indices = @transform_24, window_bounds = array<i64: 1, 32>}, {pipeline_mode = #tpu.pipeline_mode<synchronous>, transform_indices = @transform_25, window_bounds = array<i64: 32, 32>}, {pipeline_mode = #tpu.pipeline_mode<synchronous>, transform_indices = @transform_26, window_bounds = array<i64: 1, 32>}, {pipeline_mode = #tpu.pipeline_mode<synchronous>, transform_indices = @transform_27, window_bounds = array<i64: 1, 32>}, {pipeline_mode = #tpu.pipeline_mode<synchronous>, transform_indices = @transform_28, window_bounds = array<i64: 3, 32, 4>}, {pipeline_mode = #tpu.pipeline_mode<synchronous>, transform_indices = @transform_29, window_bounds = array<i64: 3, 32, 4>}, {pipeline_mode = #tpu.pipeline_mode<synchronous>, transform_indices = @transform_30, window_bounds = array<i64: 1, 4>}, {pipeline_mode = #tpu.pipeline_mode<synchronous>, transform_indices = @transform_31, window_bounds = array<i64: 1, 4>}, {pipeline_mode = #tpu.pipeline_mode<synchronous>, transform_indices = @transform_32, window_bounds = array<i64: 4, 32>}, {pipeline_mode = #tpu.pipeline_mode<synchronous>, transform_indices = @transform_33, window_bounds = array<i64: 1, 32>}, {pipeline_mode = #tpu.pipeline_mode<synchronous>, transform_indices = @transform_34, window_bounds = array<i64: 1, 32>}, {transform_indices = @transform_35, window_bounds = array<i64: 2, 16, 32>}]} {
    %c0 = arith.constant 0 : index
    %c0_0 = arith.constant 0 : index
    %c0_1 = arith.constant 0 : index
    %0 = vector.load %arg1[%c0, %c0_0, %c0_1] : memref<2x16x32xf32, #tpu.memory_space<vmem>>, vector<2x16x32xf32>
    %1 = vector.shape_cast %0 : vector<2x16x32xf32> to vector<32x32xf32>
    %2 = tpu.iota {dimensions = array<i32: 0>} : vector<32x1xi32>
    %c16_i32 = arith.constant 16 : i32
    %c0_i32 = arith.constant 0 : i32
    %3 = arith.cmpi eq, %c16_i32, %c0_i32 : i32
    %c1_i32 = arith.constant 1 : i32
    %4 = arith.select %3, %c1_i32, %c16_i32 : i32
    %5 = vector.broadcast %4 : i32 to vector<32x1xi32>
    %6 = arith.remsi %2, %5 : vector<32x1xi32>
    %c0_i32_2 = arith.constant 0 : i32
    %7 = vector.broadcast %c0_i32_2 : i32 to vector<32x1xi32>
    %8 = arith.cmpi ne, %6, %7 : vector<32x1xi32>
    %c0_i32_3 = arith.constant 0 : i32
    %9 = vector.broadcast %c0_i32_3 : i32 to vector<32x1xi32>
    %10 = arith.cmpi slt, %6, %9 : vector<32x1xi32>
    %c0_i32_4 = arith.constant 0 : i32
    %11 = arith.cmpi slt, %4, %c0_i32_4 : i32
    %12 = vector.broadcast %11 : i1 to vector<32x1xi1>
    %13 = vector.broadcast %12 : vector<32x1xi1> to vector<32x1xi1>
    %14 = arith.xori %10, %13 : vector<32x1xi1>
    %15 = arith.andi %14, %8 : vector<32x1xi1>
    %16 = vector.broadcast %4 : i32 to vector<32x1xi32>
    %17 = arith.addi %6, %16 : vector<32x1xi32>
    %18 = arith.select %15, %17, %6 : vector<32x1xi1>, vector<32x1xi32>
    %c0_i32_5 = arith.constant 0 : i32
    %19 = vector.broadcast %c0_i32_5 : i32 to vector<32x1xi32>
    %20 = arith.cmpi eq, %18, %19 : vector<32x1xi32>
    %c1_i32_6 = arith.constant 1 : i32
    %21 = tpu.dynamic_rotate %1 by %c1_i32_6 dim 0 : vector<32x32xf32>, i32 -> vector<32x32xf32>
    %cst = arith.constant 0.000000e+00 : f32
    %22 = vector.shape_cast %20 : vector<32x1xi1> to vector<32x1xi1>
    %23 = vector.broadcast %22 : vector<32x1xi1> to vector<32x32xi1>
    %24 = vector.broadcast %cst : f32 to vector<32x32xf32>
    %25 = arith.select %23, %24, %21 : vector<32x32xi1>, vector<32x32xf32>
    %c15_i32 = arith.constant 15 : i32
    %26 = vector.broadcast %c15_i32 : i32 to vector<32x1xi32>
    %27 = arith.cmpi eq, %18, %26 : vector<32x1xi32>
    %c31_i32 = arith.constant 31 : i32
    %28 = tpu.dynamic_rotate %1 by %c31_i32 dim 0 : vector<32x32xf32>, i32 -> vector<32x32xf32>
    %cst_7 = arith.constant 0.000000e+00 : f32
    %29 = vector.shape_cast %27 : vector<32x1xi1> to vector<32x1xi1>
    %30 = vector.broadcast %29 : vector<32x1xi1> to vector<32x32xi1>
    %31 = vector.broadcast %cst_7 : f32 to vector<32x32xf32>
    %32 = arith.select %30, %31, %28 : vector<32x32xi1>, vector<32x32xf32>
    %33 = arith.truncf %25 : vector<32x32xf32> to vector<32x32xbf16>
    %c0_8 = arith.constant 0 : index
    %c0_9 = arith.constant 0 : index
    %c0_10 = arith.constant 0 : index
    %34 = vector.load %arg2[%c0_8, %c0_9, %c0_10] : memref<3x32x4xbf16, #tpu.memory_space<vmem>>, vector<1x32x4xbf16>
    %35 = vector.shape_cast %34 : vector<1x32x4xbf16> to vector<32x4xbf16>
    %cst_11 = arith.constant dense<0.000000e+00> : vector<32x4xf32>
    %36 = tpu.matmul %33, %35, %cst_11 {dimension_numbers = #tpu.dot_dimension_numbers<[1], [0], [0], [1], [0, 0, 1, 1], [], []>} : vector<32x32xbf16>, vector<32x4xbf16>, vector<32x4xf32> -> vector<32x4xf32>
    %37 = arith.truncf %1 : vector<32x32xf32> to vector<32x32xbf16>
    %c1 = arith.constant 1 : index
    %c0_12 = arith.constant 0 : index
    %c0_13 = arith.constant 0 : index
    %38 = vector.load %arg2[%c1, %c0_12, %c0_13] : memref<3x32x4xbf16, #tpu.memory_space<vmem>>, vector<1x32x4xbf16>
    %39 = vector.shape_cast %38 : vector<1x32x4xbf16> to vector<32x4xbf16>
    %cst_14 = arith.constant dense<0.000000e+00> : vector<32x4xf32>
    %40 = tpu.matmul %37, %39, %cst_14 {dimension_numbers = #tpu.dot_dimension_numbers<[1], [0], [0], [1], [0, 0, 1, 1], [], []>} : vector<32x32xbf16>, vector<32x4xbf16>, vector<32x4xf32> -> vector<32x4xf32>
    %41 = arith.addf %36, %40 : vector<32x4xf32>
    %42 = arith.truncf %32 : vector<32x32xf32> to vector<32x32xbf16>
    %c2 = arith.constant 2 : index
    %c0_15 = arith.constant 0 : index
    %c0_16 = arith.constant 0 : index
    %43 = vector.load %arg2[%c2, %c0_15, %c0_16] : memref<3x32x4xbf16, #tpu.memory_space<vmem>>, vector<1x32x4xbf16>
    %44 = vector.shape_cast %43 : vector<1x32x4xbf16> to vector<32x4xbf16>
    %cst_17 = arith.constant dense<0.000000e+00> : vector<32x4xf32>
    %45 = tpu.matmul %42, %44, %cst_17 {dimension_numbers = #tpu.dot_dimension_numbers<[1], [0], [0], [1], [0, 0, 1, 1], [], []>} : vector<32x32xbf16>, vector<32x4xbf16>, vector<32x4xf32> -> vector<32x4xf32>
    %46 = arith.addf %41, %45 : vector<32x4xf32>
    %c0_18 = arith.constant 0 : index
    %c0_19 = arith.constant 0 : index
    %47 = vector.load %arg3[%c0_18, %c0_19] : memref<1x4xf32, #tpu.memory_space<vmem>>, vector<1x4xf32>
    %48 = vector.broadcast %47 : vector<1x4xf32> to vector<32x4xf32>
    %49 = arith.mulf %46, %48 : vector<32x4xf32>
    %c0_20 = arith.constant 0 : index
    %c0_21 = arith.constant 0 : index
    %50 = vector.load %arg4[%c0_20, %c0_21] : memref<1x4xf32, #tpu.memory_space<vmem>>, vector<1x4xf32>
    %51 = vector.broadcast %50 : vector<1x4xf32> to vector<32x4xf32>
    %52 = arith.addf %49, %51 : vector<32x4xf32>
    %53 = arith.negf %52 : vector<32x4xf32>
    %54 = math.exp %53 : vector<32x4xf32>
    %cst_22 = arith.constant 1.000000e+00 : f32
    %55 = vector.broadcast %cst_22 : f32 to vector<32x4xf32>
    %56 = arith.addf %55, %54 : vector<32x4xf32>
    %57 = arith.divf %55, %56 : vector<32x4xf32>
    %58 = arith.mulf %52, %57 : vector<32x4xf32>
    %c0_23 = arith.constant 0 : index
    %c0_24 = arith.constant 0 : index
    %59 = vector.load %arg5[%c0_23, %c0_24] : memref<4x32xbf16, #tpu.memory_space<vmem>>, vector<4x32xbf16>
    %60 = arith.truncf %58 : vector<32x4xf32> to vector<32x4xbf16>
    %cst_25 = arith.constant dense<0.000000e+00> : vector<32x32xf32>
    %61 = tpu.matmul %60, %59, %cst_25 {dimension_numbers = #tpu.dot_dimension_numbers<[1], [0], [0], [1], [0, 0, 1, 1], [], []>} : vector<32x4xbf16>, vector<4x32xbf16>, vector<32x32xf32> -> vector<32x32xf32>
    %c0_26 = arith.constant 0 : index
    %c0_27 = arith.constant 0 : index
    %62 = vector.load %arg6[%c0_26, %c0_27] : memref<1x32xf32, #tpu.memory_space<vmem>>, vector<1x32xf32>
    %63 = vector.broadcast %62 : vector<1x32xf32> to vector<32x32xf32>
    %64 = arith.mulf %61, %63 : vector<32x32xf32>
    %c0_28 = arith.constant 0 : index
    %c0_29 = arith.constant 0 : index
    %65 = vector.load %arg7[%c0_28, %c0_29] : memref<1x32xf32, #tpu.memory_space<vmem>>, vector<1x32xf32>
    %66 = vector.broadcast %65 : vector<1x32xf32> to vector<32x32xf32>
    %67 = arith.addf %64, %66 : vector<32x32xf32>
    %68 = arith.negf %67 : vector<32x32xf32>
    %69 = math.exp %68 : vector<32x32xf32>
    %cst_30 = arith.constant 1.000000e+00 : f32
    %70 = vector.broadcast %cst_30 : f32 to vector<32x32xf32>
    %71 = arith.addf %70, %69 : vector<32x32xf32>
    %72 = arith.divf %70, %71 : vector<32x32xf32>
    %73 = arith.mulf %67, %72 : vector<32x32xf32>
    %c0_31 = arith.constant 0 : index
    %c0_32 = arith.constant 0 : index
    %c0_33 = arith.constant 0 : index
    %74 = vector.load %arg8[%c0_31, %c0_32, %c0_33] : memref<2x1x32xf32, #tpu.memory_space<vmem>>, vector<1x1x32xf32>
    %75 = vector.shape_cast %74 : vector<1x1x32xf32> to vector<1x32xf32>
    %c0_34 = arith.constant 0 : index
    %c0_35 = arith.constant 0 : index
    %c0_36 = arith.constant 0 : index
    %76 = vector.load %arg9[%c0_34, %c0_35, %c0_36] : memref<2x1x32xf32, #tpu.memory_space<vmem>>, vector<1x1x32xf32>
    %77 = vector.shape_cast %76 : vector<1x1x32xf32> to vector<1x32xf32>
    %cst_37 = arith.constant dense<0.000000e+00> : vector<32xf32>
    %78 = vector.multi_reduction <add>, %73, %cst_37 [1] : vector<32x32xf32> to vector<32xf32>
    %79 = vector.shape_cast %78 : vector<32xf32> to vector<32x1xf32>
    %cst_38 = arith.constant 3.200000e+01 : f32
    %80 = vector.broadcast %cst_38 : f32 to vector<32x1xf32>
    %81 = arith.divf %79, %80 : vector<32x1xf32>
    %82 = vector.broadcast %81 : vector<32x1xf32> to vector<32x32xf32>
    %83 = arith.subf %73, %82 : vector<32x32xf32>
    %84 = arith.mulf %83, %83 : vector<32x32xf32>
    %cst_39 = arith.constant dense<0.000000e+00> : vector<32xf32>
    %85 = vector.multi_reduction <add>, %84, %cst_39 [1] : vector<32x32xf32> to vector<32xf32>
    %86 = vector.shape_cast %85 : vector<32xf32> to vector<32x1xf32>
    %cst_40 = arith.constant 3.200000e+01 : f32
    %87 = vector.broadcast %cst_40 : f32 to vector<32x1xf32>
    %88 = arith.divf %86, %87 : vector<32x1xf32>
    %89 = vector.broadcast %81 : vector<32x1xf32> to vector<32x32xf32>
    %90 = arith.subf %73, %89 : vector<32x32xf32>
    %cst_41 = arith.constant 9.99999974E-6 : f32
    %91 = vector.broadcast %cst_41 : f32 to vector<32x1xf32>
    %92 = arith.addf %88, %91 : vector<32x1xf32>
    %93 = math.rsqrt %92 : vector<32x1xf32>
    %94 = vector.broadcast %93 : vector<32x1xf32> to vector<32x32xf32>
    %95 = arith.mulf %90, %94 : vector<32x32xf32>
    %96 = vector.broadcast %75 : vector<1x32xf32> to vector<32x32xf32>
    %97 = arith.mulf %95, %96 : vector<32x32xf32>
    %98 = vector.broadcast %77 : vector<1x32xf32> to vector<32x32xf32>
    %99 = arith.addf %97, %98 : vector<32x32xf32>
    %c0_42 = arith.constant 0 : index
    %c0_43 = arith.constant 0 : index
    %c0_44 = arith.constant 0 : index
    %100 = vector.load %arg10[%c0_42, %c0_43, %c0_44] : memref<2x32x32xbf16, #tpu.memory_space<vmem>>, vector<1x32x32xbf16>
    %101 = vector.shape_cast %100 : vector<1x32x32xbf16> to vector<32x32xbf16>
    %102 = arith.truncf %99 : vector<32x32xf32> to vector<32x32xbf16>
    %cst_45 = arith.constant dense<0.000000e+00> : vector<32x32xf32>
    %103 = tpu.matmul %102, %101, %cst_45 {dimension_numbers = #tpu.dot_dimension_numbers<[1], [0], [0], [1], [0, 0, 1, 1], [], []>} : vector<32x32xbf16>, vector<32x32xbf16>, vector<32x32xf32> -> vector<32x32xf32>
    %c0_46 = arith.constant 0 : index
    %c0_47 = arith.constant 0 : index
    %c0_48 = arith.constant 0 : index
    %104 = vector.load %arg11[%c0_46, %c0_47, %c0_48] : memref<2x1x32xf32, #tpu.memory_space<vmem>>, vector<1x1x32xf32>
    %105 = vector.shape_cast %104 : vector<1x1x32xf32> to vector<1x32xf32>
    %106 = vector.broadcast %105 : vector<1x32xf32> to vector<32x32xf32>
    %107 = arith.addf %103, %106 : vector<32x32xf32>
    %c0_49 = arith.constant 0 : index
    %c0_50 = arith.constant 0 : index
    %c0_51 = arith.constant 0 : index
    %108 = vector.load %arg12[%c0_49, %c0_50, %c0_51] : memref<2x32x32xbf16, #tpu.memory_space<vmem>>, vector<1x32x32xbf16>
    %109 = vector.shape_cast %108 : vector<1x32x32xbf16> to vector<32x32xbf16>
    %110 = arith.truncf %99 : vector<32x32xf32> to vector<32x32xbf16>
    %cst_52 = arith.constant dense<0.000000e+00> : vector<32x32xf32>
    %111 = tpu.matmul %110, %109, %cst_52 {dimension_numbers = #tpu.dot_dimension_numbers<[1], [0], [0], [1], [0, 0, 1, 1], [], []>} : vector<32x32xbf16>, vector<32x32xbf16>, vector<32x32xf32> -> vector<32x32xf32>
    %c0_53 = arith.constant 0 : index
    %c0_54 = arith.constant 0 : index
    %c0_55 = arith.constant 0 : index
    %112 = vector.load %arg13[%c0_53, %c0_54, %c0_55] : memref<2x1x32xf32, #tpu.memory_space<vmem>>, vector<1x1x32xf32>
    %113 = vector.shape_cast %112 : vector<1x1x32xf32> to vector<1x32xf32>
    %114 = vector.broadcast %113 : vector<1x32xf32> to vector<32x32xf32>
    %115 = arith.addf %111, %114 : vector<32x32xf32>
    %c0_56 = arith.constant 0 : index
    %c0_57 = arith.constant 0 : index
    %c0_58 = arith.constant 0 : index
    %116 = vector.load %arg14[%c0_56, %c0_57, %c0_58] : memref<2x32x32xbf16, #tpu.memory_space<vmem>>, vector<1x32x32xbf16>
    %117 = vector.shape_cast %116 : vector<1x32x32xbf16> to vector<32x32xbf16>
    %118 = arith.truncf %99 : vector<32x32xf32> to vector<32x32xbf16>
    %cst_59 = arith.constant dense<0.000000e+00> : vector<32x32xf32>
    %119 = tpu.matmul %118, %117, %cst_59 {dimension_numbers = #tpu.dot_dimension_numbers<[1], [0], [0], [1], [0, 0, 1, 1], [], []>} : vector<32x32xbf16>, vector<32x32xbf16>, vector<32x32xf32> -> vector<32x32xf32>
    %c0_60 = arith.constant 0 : index
    %c0_61 = arith.constant 0 : index
    %c0_62 = arith.constant 0 : index
    %120 = vector.load %arg15[%c0_60, %c0_61, %c0_62] : memref<2x1x32xf32, #tpu.memory_space<vmem>>, vector<1x1x32xf32>
    %121 = vector.shape_cast %120 : vector<1x1x32xf32> to vector<1x32xf32>
    %122 = vector.broadcast %121 : vector<1x32xf32> to vector<32x32xf32>
    %123 = arith.addf %119, %122 : vector<32x32xf32>
    %124 = vector.extract_strided_slice %107 {offsets = [0, 0], sizes = [32, 8], strides = [1, 1]} : vector<32x32xf32> to vector<32x8xf32>
    %125 = vector.shape_cast %124 : vector<32x8xf32> to vector<2x16x8xf32>
    %126 = vector.extract_strided_slice %115 {offsets = [0, 0], sizes = [32, 8], strides = [1, 1]} : vector<32x32xf32> to vector<32x8xf32>
    %127 = vector.shape_cast %126 : vector<32x8xf32> to vector<2x16x8xf32>
    %128 = vector.extract_strided_slice %123 {offsets = [0, 0], sizes = [32, 8], strides = [1, 1]} : vector<32x32xf32> to vector<32x8xf32>
    %129 = vector.shape_cast %128 : vector<32x8xf32> to vector<2x16x8xf32>
    %130 = arith.truncf %125 : vector<2x16x8xf32> to vector<2x16x8xbf16>
    %131 = arith.truncf %127 : vector<2x16x8xf32> to vector<2x16x8xbf16>
    "tpu.trace_start"() <{level = 10 : i32, message = "bqd,bkd->bqk"}> : () -> ()
    %cst_63 = arith.constant dense<0.000000e+00> : vector<2x16x16xf32>
    %132 = tpu.matmul %130, %131, %cst_63 {dimension_numbers = #tpu.dot_dimension_numbers<[2], [2], [1], [1], [0, 0, 0, 1, 1, 1], [0], [0]>} : vector<2x16x8xbf16>, vector<2x16x8xbf16>, vector<2x16x16xf32> -> vector<2x16x16xf32>
    "tpu.trace_stop"() : () -> ()
    %cst_64 = arith.constant dense<0xFF800000> : vector<2x16xf32>
    %133 = vector.multi_reduction <maximumf>, %132, %cst_64 [2] : vector<2x16x16xf32> to vector<2x16xf32>
    %134 = vector.shape_cast %133 : vector<2x16xf32> to vector<2x16x1xf32>
    %135 = vector.broadcast %134 : vector<2x16x1xf32> to vector<2x16x16xf32>
    %136 = arith.subf %132, %135 : vector<2x16x16xf32>
    %137 = math.exp %136 : vector<2x16x16xf32>
    %cst_65 = arith.constant dense<0.000000e+00> : vector<2x16xf32>
    %138 = vector.multi_reduction <add>, %137, %cst_65 [2] : vector<2x16x16xf32> to vector<2x16xf32>
    %139 = vector.shape_cast %138 : vector<2x16xf32> to vector<2x16x1xf32>
    %140 = tpu.reciprocal %139 {approx = true} : vector<2x16x1xf32> -> vector<2x16x1xf32>
    %141 = vector.broadcast %140 : vector<2x16x1xf32> to vector<2x16x16xf32>
    %142 = arith.mulf %137, %141 : vector<2x16x16xf32>
    %143 = arith.truncf %142 : vector<2x16x16xf32> to vector<2x16x16xbf16>
    %144 = arith.truncf %129 : vector<2x16x8xf32> to vector<2x16x8xbf16>
    "tpu.trace_start"() <{level = 10 : i32, message = "bqk,bkd->bqd"}> : () -> ()
    %cst_66 = arith.constant dense<0.000000e+00> : vector<2x16x8xf32>
    %145 = tpu.matmul %143, %144, %cst_66 {dimension_numbers = #tpu.dot_dimension_numbers<[2], [1], [1], [2], [0, 0, 0, 1, 1, 2], [0], [0]>} : vector<2x16x16xbf16>, vector<2x16x8xbf16>, vector<2x16x8xf32> -> vector<2x16x8xf32>
    "tpu.trace_stop"() : () -> ()
    %146 = vector.shape_cast %145 : vector<2x16x8xf32> to vector<32x8xf32>
    %147 = vector.extract_strided_slice %107 {offsets = [0, 8], sizes = [32, 8], strides = [1, 1]} : vector<32x32xf32> to vector<32x8xf32>
    %148 = vector.shape_cast %147 : vector<32x8xf32> to vector<2x16x8xf32>
    %149 = vector.extract_strided_slice %115 {offsets = [0, 8], sizes = [32, 8], strides = [1, 1]} : vector<32x32xf32> to vector<32x8xf32>
    %150 = vector.shape_cast %149 : vector<32x8xf32> to vector<2x16x8xf32>
    %151 = vector.extract_strided_slice %123 {offsets = [0, 8], sizes = [32, 8], strides = [1, 1]} : vector<32x32xf32> to vector<32x8xf32>
    %152 = vector.shape_cast %151 : vector<32x8xf32> to vector<2x16x8xf32>
    %153 = arith.truncf %148 : vector<2x16x8xf32> to vector<2x16x8xbf16>
    %154 = arith.truncf %150 : vector<2x16x8xf32> to vector<2x16x8xbf16>
    "tpu.trace_start"() <{level = 10 : i32, message = "bqd,bkd->bqk"}> : () -> ()
    %cst_67 = arith.constant dense<0.000000e+00> : vector<2x16x16xf32>
    %155 = tpu.matmul %153, %154, %cst_67 {dimension_numbers = #tpu.dot_dimension_numbers<[2], [2], [1], [1], [0, 0, 0, 1, 1, 1], [0], [0]>} : vector<2x16x8xbf16>, vector<2x16x8xbf16>, vector<2x16x16xf32> -> vector<2x16x16xf32>
    "tpu.trace_stop"() : () -> ()
    %cst_68 = arith.constant dense<0xFF800000> : vector<2x16xf32>
    %156 = vector.multi_reduction <maximumf>, %155, %cst_68 [2] : vector<2x16x16xf32> to vector<2x16xf32>
    %157 = vector.shape_cast %156 : vector<2x16xf32> to vector<2x16x1xf32>
    %158 = vector.broadcast %157 : vector<2x16x1xf32> to vector<2x16x16xf32>
    %159 = arith.subf %155, %158 : vector<2x16x16xf32>
    %160 = math.exp %159 : vector<2x16x16xf32>
    %cst_69 = arith.constant dense<0.000000e+00> : vector<2x16xf32>
    %161 = vector.multi_reduction <add>, %160, %cst_69 [2] : vector<2x16x16xf32> to vector<2x16xf32>
    %162 = vector.shape_cast %161 : vector<2x16xf32> to vector<2x16x1xf32>
    %163 = tpu.reciprocal %162 {approx = true} : vector<2x16x1xf32> -> vector<2x16x1xf32>
    %164 = vector.broadcast %163 : vector<2x16x1xf32> to vector<2x16x16xf32>
    %165 = arith.mulf %160, %164 : vector<2x16x16xf32>
    %166 = arith.truncf %165 : vector<2x16x16xf32> to vector<2x16x16xbf16>
    %167 = arith.truncf %152 : vector<2x16x8xf32> to vector<2x16x8xbf16>
    "tpu.trace_start"() <{level = 10 : i32, message = "bqk,bkd->bqd"}> : () -> ()
    %cst_70 = arith.constant dense<0.000000e+00> : vector<2x16x8xf32>
    %168 = tpu.matmul %166, %167, %cst_70 {dimension_numbers = #tpu.dot_dimension_numbers<[2], [1], [1], [2], [0, 0, 0, 1, 1, 2], [0], [0]>} : vector<2x16x16xbf16>, vector<2x16x8xbf16>, vector<2x16x8xf32> -> vector<2x16x8xf32>
    "tpu.trace_stop"() : () -> ()
    %169 = vector.shape_cast %168 : vector<2x16x8xf32> to vector<32x8xf32>
    %170 = vector.extract_strided_slice %107 {offsets = [0, 16], sizes = [32, 8], strides = [1, 1]} : vector<32x32xf32> to vector<32x8xf32>
    %171 = vector.shape_cast %170 : vector<32x8xf32> to vector<2x16x8xf32>
    %172 = vector.extract_strided_slice %115 {offsets = [0, 16], sizes = [32, 8], strides = [1, 1]} : vector<32x32xf32> to vector<32x8xf32>
    %173 = vector.shape_cast %172 : vector<32x8xf32> to vector<2x16x8xf32>
    %174 = vector.extract_strided_slice %123 {offsets = [0, 16], sizes = [32, 8], strides = [1, 1]} : vector<32x32xf32> to vector<32x8xf32>
    %175 = vector.shape_cast %174 : vector<32x8xf32> to vector<2x16x8xf32>
    %176 = arith.truncf %171 : vector<2x16x8xf32> to vector<2x16x8xbf16>
    %177 = arith.truncf %173 : vector<2x16x8xf32> to vector<2x16x8xbf16>
    "tpu.trace_start"() <{level = 10 : i32, message = "bqd,bkd->bqk"}> : () -> ()
    %cst_71 = arith.constant dense<0.000000e+00> : vector<2x16x16xf32>
    %178 = tpu.matmul %176, %177, %cst_71 {dimension_numbers = #tpu.dot_dimension_numbers<[2], [2], [1], [1], [0, 0, 0, 1, 1, 1], [0], [0]>} : vector<2x16x8xbf16>, vector<2x16x8xbf16>, vector<2x16x16xf32> -> vector<2x16x16xf32>
    "tpu.trace_stop"() : () -> ()
    %cst_72 = arith.constant dense<0xFF800000> : vector<2x16xf32>
    %179 = vector.multi_reduction <maximumf>, %178, %cst_72 [2] : vector<2x16x16xf32> to vector<2x16xf32>
    %180 = vector.shape_cast %179 : vector<2x16xf32> to vector<2x16x1xf32>
    %181 = vector.broadcast %180 : vector<2x16x1xf32> to vector<2x16x16xf32>
    %182 = arith.subf %178, %181 : vector<2x16x16xf32>
    %183 = math.exp %182 : vector<2x16x16xf32>
    %cst_73 = arith.constant dense<0.000000e+00> : vector<2x16xf32>
    %184 = vector.multi_reduction <add>, %183, %cst_73 [2] : vector<2x16x16xf32> to vector<2x16xf32>
    %185 = vector.shape_cast %184 : vector<2x16xf32> to vector<2x16x1xf32>
    %186 = tpu.reciprocal %185 {approx = true} : vector<2x16x1xf32> -> vector<2x16x1xf32>
    %187 = vector.broadcast %186 : vector<2x16x1xf32> to vector<2x16x16xf32>
    %188 = arith.mulf %183, %187 : vector<2x16x16xf32>
    %189 = arith.truncf %188 : vector<2x16x16xf32> to vector<2x16x16xbf16>
    %190 = arith.truncf %175 : vector<2x16x8xf32> to vector<2x16x8xbf16>
    "tpu.trace_start"() <{level = 10 : i32, message = "bqk,bkd->bqd"}> : () -> ()
    %cst_74 = arith.constant dense<0.000000e+00> : vector<2x16x8xf32>
    %191 = tpu.matmul %189, %190, %cst_74 {dimension_numbers = #tpu.dot_dimension_numbers<[2], [1], [1], [2], [0, 0, 0, 1, 1, 2], [0], [0]>} : vector<2x16x16xbf16>, vector<2x16x8xbf16>, vector<2x16x8xf32> -> vector<2x16x8xf32>
    "tpu.trace_stop"() : () -> ()
    %192 = vector.shape_cast %191 : vector<2x16x8xf32> to vector<32x8xf32>
    %193 = vector.extract_strided_slice %107 {offsets = [0, 24], sizes = [32, 8], strides = [1, 1]} : vector<32x32xf32> to vector<32x8xf32>
    %194 = vector.shape_cast %193 : vector<32x8xf32> to vector<2x16x8xf32>
    %195 = vector.extract_strided_slice %115 {offsets = [0, 24], sizes = [32, 8], strides = [1, 1]} : vector<32x32xf32> to vector<32x8xf32>
    %196 = vector.shape_cast %195 : vector<32x8xf32> to vector<2x16x8xf32>
    %197 = vector.extract_strided_slice %123 {offsets = [0, 24], sizes = [32, 8], strides = [1, 1]} : vector<32x32xf32> to vector<32x8xf32>
    %198 = vector.shape_cast %197 : vector<32x8xf32> to vector<2x16x8xf32>
    %199 = arith.truncf %194 : vector<2x16x8xf32> to vector<2x16x8xbf16>
    %200 = arith.truncf %196 : vector<2x16x8xf32> to vector<2x16x8xbf16>
    "tpu.trace_start"() <{level = 10 : i32, message = "bqd,bkd->bqk"}> : () -> ()
    %cst_75 = arith.constant dense<0.000000e+00> : vector<2x16x16xf32>
    %201 = tpu.matmul %199, %200, %cst_75 {dimension_numbers = #tpu.dot_dimension_numbers<[2], [2], [1], [1], [0, 0, 0, 1, 1, 1], [0], [0]>} : vector<2x16x8xbf16>, vector<2x16x8xbf16>, vector<2x16x16xf32> -> vector<2x16x16xf32>
    "tpu.trace_stop"() : () -> ()
    %cst_76 = arith.constant dense<0xFF800000> : vector<2x16xf32>
    %202 = vector.multi_reduction <maximumf>, %201, %cst_76 [2] : vector<2x16x16xf32> to vector<2x16xf32>
    %203 = vector.shape_cast %202 : vector<2x16xf32> to vector<2x16x1xf32>
    %204 = vector.broadcast %203 : vector<2x16x1xf32> to vector<2x16x16xf32>
    %205 = arith.subf %201, %204 : vector<2x16x16xf32>
    %206 = math.exp %205 : vector<2x16x16xf32>
    %cst_77 = arith.constant dense<0.000000e+00> : vector<2x16xf32>
    %207 = vector.multi_reduction <add>, %206, %cst_77 [2] : vector<2x16x16xf32> to vector<2x16xf32>
    %208 = vector.shape_cast %207 : vector<2x16xf32> to vector<2x16x1xf32>
    %209 = tpu.reciprocal %208 {approx = true} : vector<2x16x1xf32> -> vector<2x16x1xf32>
    %210 = vector.broadcast %209 : vector<2x16x1xf32> to vector<2x16x16xf32>
    %211 = arith.mulf %206, %210 : vector<2x16x16xf32>
    %212 = arith.truncf %211 : vector<2x16x16xf32> to vector<2x16x16xbf16>
    %213 = arith.truncf %198 : vector<2x16x8xf32> to vector<2x16x8xbf16>
    "tpu.trace_start"() <{level = 10 : i32, message = "bqk,bkd->bqd"}> : () -> ()
    %cst_78 = arith.constant dense<0.000000e+00> : vector<2x16x8xf32>
    %214 = tpu.matmul %212, %213, %cst_78 {dimension_numbers = #tpu.dot_dimension_numbers<[2], [1], [1], [2], [0, 0, 0, 1, 1, 2], [0], [0]>} : vector<2x16x16xbf16>, vector<2x16x8xbf16>, vector<2x16x8xf32> -> vector<2x16x8xf32>
    "tpu.trace_stop"() : () -> ()
    %215 = vector.shape_cast %214 : vector<2x16x8xf32> to vector<32x8xf32>
    %216 = tpu.concatenate %146, %169, %192, %215 in 1 : vector<32x8xf32>, vector<32x8xf32>, vector<32x8xf32>, vector<32x8xf32> -> vector<32x32xf32>
    %c0_79 = arith.constant 0 : index
    %c0_80 = arith.constant 0 : index
    %c0_81 = arith.constant 0 : index
    %217 = vector.load %arg16[%c0_79, %c0_80, %c0_81] : memref<2x32x32xbf16, #tpu.memory_space<vmem>>, vector<1x32x32xbf16>
    %218 = vector.shape_cast %217 : vector<1x32x32xbf16> to vector<32x32xbf16>
    %219 = arith.truncf %216 : vector<32x32xf32> to vector<32x32xbf16>
    %cst_82 = arith.constant dense<0.000000e+00> : vector<32x32xf32>
    %220 = tpu.matmul %219, %218, %cst_82 {dimension_numbers = #tpu.dot_dimension_numbers<[1], [0], [0], [1], [0, 0, 1, 1], [], []>} : vector<32x32xbf16>, vector<32x32xbf16>, vector<32x32xf32> -> vector<32x32xf32>
    %221 = arith.addf %73, %220 : vector<32x32xf32>
    %c0_83 = arith.constant 0 : index
    %c0_84 = arith.constant 0 : index
    %c0_85 = arith.constant 0 : index
    %222 = vector.load %arg17[%c0_83, %c0_84, %c0_85] : memref<2x1x32xf32, #tpu.memory_space<vmem>>, vector<1x1x32xf32>
    %223 = vector.shape_cast %222 : vector<1x1x32xf32> to vector<1x32xf32>
    %224 = vector.broadcast %223 : vector<1x32xf32> to vector<32x32xf32>
    %225 = arith.addf %221, %224 : vector<32x32xf32>
    %c0_86 = arith.constant 0 : index
    %c0_87 = arith.constant 0 : index
    %c0_88 = arith.constant 0 : index
    %226 = vector.load %arg18[%c0_86, %c0_87, %c0_88] : memref<2x1x32xf32, #tpu.memory_space<vmem>>, vector<1x1x32xf32>
    %227 = vector.shape_cast %226 : vector<1x1x32xf32> to vector<1x32xf32>
    %c0_89 = arith.constant 0 : index
    %c0_90 = arith.constant 0 : index
    %c0_91 = arith.constant 0 : index
    %228 = vector.load %arg19[%c0_89, %c0_90, %c0_91] : memref<2x1x32xf32, #tpu.memory_space<vmem>>, vector<1x1x32xf32>
    %229 = vector.shape_cast %228 : vector<1x1x32xf32> to vector<1x32xf32>
    %cst_92 = arith.constant dense<0.000000e+00> : vector<32xf32>
    %230 = vector.multi_reduction <add>, %225, %cst_92 [1] : vector<32x32xf32> to vector<32xf32>
    %231 = vector.shape_cast %230 : vector<32xf32> to vector<32x1xf32>
    %cst_93 = arith.constant 3.200000e+01 : f32
    %232 = vector.broadcast %cst_93 : f32 to vector<32x1xf32>
    %233 = arith.divf %231, %232 : vector<32x1xf32>
    %234 = vector.broadcast %233 : vector<32x1xf32> to vector<32x32xf32>
    %235 = arith.subf %225, %234 : vector<32x32xf32>
    %236 = arith.mulf %235, %235 : vector<32x32xf32>
    %cst_94 = arith.constant dense<0.000000e+00> : vector<32xf32>
    %237 = vector.multi_reduction <add>, %236, %cst_94 [1] : vector<32x32xf32> to vector<32xf32>
    %238 = vector.shape_cast %237 : vector<32xf32> to vector<32x1xf32>
    %cst_95 = arith.constant 3.200000e+01 : f32
    %239 = vector.broadcast %cst_95 : f32 to vector<32x1xf32>
    %240 = arith.divf %238, %239 : vector<32x1xf32>
    %241 = vector.broadcast %233 : vector<32x1xf32> to vector<32x32xf32>
    %242 = arith.subf %225, %241 : vector<32x32xf32>
    %cst_96 = arith.constant 9.99999974E-6 : f32
    %243 = vector.broadcast %cst_96 : f32 to vector<32x1xf32>
    %244 = arith.addf %240, %243 : vector<32x1xf32>
    %245 = math.rsqrt %244 : vector<32x1xf32>
    %246 = vector.broadcast %245 : vector<32x1xf32> to vector<32x32xf32>
    %247 = arith.mulf %242, %246 : vector<32x32xf32>
    %248 = vector.broadcast %227 : vector<1x32xf32> to vector<32x32xf32>
    %249 = arith.mulf %247, %248 : vector<32x32xf32>
    %250 = vector.broadcast %229 : vector<1x32xf32> to vector<32x32xf32>
    %251 = arith.addf %249, %250 : vector<32x32xf32>
    %c0_97 = arith.constant 0 : index
    %c0_98 = arith.constant 0 : index
    %c0_99 = arith.constant 0 : index
    %252 = vector.load %arg20[%c0_97, %c0_98, %c0_99] : memref<2x32x64xbf16, #tpu.memory_space<vmem>>, vector<1x32x64xbf16>
    %253 = vector.shape_cast %252 : vector<1x32x64xbf16> to vector<32x64xbf16>
    %254 = arith.truncf %251 : vector<32x32xf32> to vector<32x32xbf16>
    %cst_100 = arith.constant dense<0.000000e+00> : vector<32x64xf32>
    %255 = tpu.matmul %254, %253, %cst_100 {dimension_numbers = #tpu.dot_dimension_numbers<[1], [0], [0], [1], [0, 0, 1, 1], [], []>} : vector<32x32xbf16>, vector<32x64xbf16>, vector<32x64xf32> -> vector<32x64xf32>
    %c0_101 = arith.constant 0 : index
    %c0_102 = arith.constant 0 : index
    %c0_103 = arith.constant 0 : index
    %256 = vector.load %arg21[%c0_101, %c0_102, %c0_103] : memref<2x1x64xf32, #tpu.memory_space<vmem>>, vector<1x1x64xf32>
    %257 = vector.shape_cast %256 : vector<1x1x64xf32> to vector<1x64xf32>
    %258 = vector.broadcast %257 : vector<1x64xf32> to vector<32x64xf32>
    %259 = arith.addf %255, %258 : vector<32x64xf32>
    %260 = arith.negf %259 : vector<32x64xf32>
    %261 = math.exp %260 : vector<32x64xf32>
    %cst_104 = arith.constant 1.000000e+00 : f32
    %262 = vector.broadcast %cst_104 : f32 to vector<32x64xf32>
    %263 = arith.addf %262, %261 : vector<32x64xf32>
    %264 = arith.divf %262, %263 : vector<32x64xf32>
    %265 = arith.mulf %259, %264 : vector<32x64xf32>
    %c0_105 = arith.constant 0 : index
    %c0_106 = arith.constant 0 : index
    %c0_107 = arith.constant 0 : index
    %266 = vector.load %arg22[%c0_105, %c0_106, %c0_107] : memref<2x64x32xbf16, #tpu.memory_space<vmem>>, vector<1x64x32xbf16>
    %267 = vector.shape_cast %266 : vector<1x64x32xbf16> to vector<64x32xbf16>
    %268 = arith.truncf %265 : vector<32x64xf32> to vector<32x64xbf16>
    %cst_108 = arith.constant dense<0.000000e+00> : vector<32x32xf32>
    %269 = tpu.matmul %268, %267, %cst_108 {dimension_numbers = #tpu.dot_dimension_numbers<[1], [0], [0], [1], [0, 0, 1, 1], [], []>} : vector<32x64xbf16>, vector<64x32xbf16>, vector<32x32xf32> -> vector<32x32xf32>
    %270 = arith.addf %225, %269 : vector<32x32xf32>
    %c0_109 = arith.constant 0 : index
    %c0_110 = arith.constant 0 : index
    %c0_111 = arith.constant 0 : index
    %271 = vector.load %arg23[%c0_109, %c0_110, %c0_111] : memref<2x1x32xf32, #tpu.memory_space<vmem>>, vector<1x1x32xf32>
    %272 = vector.shape_cast %271 : vector<1x1x32xf32> to vector<1x32xf32>
    %273 = vector.broadcast %272 : vector<1x32xf32> to vector<32x32xf32>
    %274 = arith.addf %270, %273 : vector<32x32xf32>
    %c1_112 = arith.constant 1 : index
    %c0_113 = arith.constant 0 : index
    %c0_114 = arith.constant 0 : index
    %275 = vector.load %arg8[%c1_112, %c0_113, %c0_114] : memref<2x1x32xf32, #tpu.memory_space<vmem>>, vector<1x1x32xf32>
    %276 = vector.shape_cast %275 : vector<1x1x32xf32> to vector<1x32xf32>
    %c1_115 = arith.constant 1 : index
    %c0_116 = arith.constant 0 : index
    %c0_117 = arith.constant 0 : index
    %277 = vector.load %arg9[%c1_115, %c0_116, %c0_117] : memref<2x1x32xf32, #tpu.memory_space<vmem>>, vector<1x1x32xf32>
    %278 = vector.shape_cast %277 : vector<1x1x32xf32> to vector<1x32xf32>
    %cst_118 = arith.constant dense<0.000000e+00> : vector<32xf32>
    %279 = vector.multi_reduction <add>, %274, %cst_118 [1] : vector<32x32xf32> to vector<32xf32>
    %280 = vector.shape_cast %279 : vector<32xf32> to vector<32x1xf32>
    %cst_119 = arith.constant 3.200000e+01 : f32
    %281 = vector.broadcast %cst_119 : f32 to vector<32x1xf32>
    %282 = arith.divf %280, %281 : vector<32x1xf32>
    %283 = vector.broadcast %282 : vector<32x1xf32> to vector<32x32xf32>
    %284 = arith.subf %274, %283 : vector<32x32xf32>
    %285 = arith.mulf %284, %284 : vector<32x32xf32>
    %cst_120 = arith.constant dense<0.000000e+00> : vector<32xf32>
    %286 = vector.multi_reduction <add>, %285, %cst_120 [1] : vector<32x32xf32> to vector<32xf32>
    %287 = vector.shape_cast %286 : vector<32xf32> to vector<32x1xf32>
    %cst_121 = arith.constant 3.200000e+01 : f32
    %288 = vector.broadcast %cst_121 : f32 to vector<32x1xf32>
    %289 = arith.divf %287, %288 : vector<32x1xf32>
    %290 = vector.broadcast %282 : vector<32x1xf32> to vector<32x32xf32>
    %291 = arith.subf %274, %290 : vector<32x32xf32>
    %cst_122 = arith.constant 9.99999974E-6 : f32
    %292 = vector.broadcast %cst_122 : f32 to vector<32x1xf32>
    %293 = arith.addf %289, %292 : vector<32x1xf32>
    %294 = math.rsqrt %293 : vector<32x1xf32>
    %295 = vector.broadcast %294 : vector<32x1xf32> to vector<32x32xf32>
    %296 = arith.mulf %291, %295 : vector<32x32xf32>
    %297 = vector.broadcast %276 : vector<1x32xf32> to vector<32x32xf32>
    %298 = arith.mulf %296, %297 : vector<32x32xf32>
    %299 = vector.broadcast %278 : vector<1x32xf32> to vector<32x32xf32>
    %300 = arith.addf %298, %299 : vector<32x32xf32>
    %c1_123 = arith.constant 1 : index
    %c0_124 = arith.constant 0 : index
    %c0_125 = arith.constant 0 : index
    %301 = vector.load %arg10[%c1_123, %c0_124, %c0_125] : memref<2x32x32xbf16, #tpu.memory_space<vmem>>, vector<1x32x32xbf16>
    %302 = vector.shape_cast %301 : vector<1x32x32xbf16> to vector<32x32xbf16>
    %303 = arith.truncf %300 : vector<32x32xf32> to vector<32x32xbf16>
    %cst_126 = arith.constant dense<0.000000e+00> : vector<32x32xf32>
    %304 = tpu.matmul %303, %302, %cst_126 {dimension_numbers = #tpu.dot_dimension_numbers<[1], [0], [0], [1], [0, 0, 1, 1], [], []>} : vector<32x32xbf16>, vector<32x32xbf16>, vector<32x32xf32> -> vector<32x32xf32>
    %c1_127 = arith.constant 1 : index
    %c0_128 = arith.constant 0 : index
    %c0_129 = arith.constant 0 : index
    %305 = vector.load %arg11[%c1_127, %c0_128, %c0_129] : memref<2x1x32xf32, #tpu.memory_space<vmem>>, vector<1x1x32xf32>
    %306 = vector.shape_cast %305 : vector<1x1x32xf32> to vector<1x32xf32>
    %307 = vector.broadcast %306 : vector<1x32xf32> to vector<32x32xf32>
    %308 = arith.addf %304, %307 : vector<32x32xf32>
    %c1_130 = arith.constant 1 : index
    %c0_131 = arith.constant 0 : index
    %c0_132 = arith.constant 0 : index
    %309 = vector.load %arg12[%c1_130, %c0_131, %c0_132] : memref<2x32x32xbf16, #tpu.memory_space<vmem>>, vector<1x32x32xbf16>
    %310 = vector.shape_cast %309 : vector<1x32x32xbf16> to vector<32x32xbf16>
    %311 = arith.truncf %300 : vector<32x32xf32> to vector<32x32xbf16>
    %cst_133 = arith.constant dense<0.000000e+00> : vector<32x32xf32>
    %312 = tpu.matmul %311, %310, %cst_133 {dimension_numbers = #tpu.dot_dimension_numbers<[1], [0], [0], [1], [0, 0, 1, 1], [], []>} : vector<32x32xbf16>, vector<32x32xbf16>, vector<32x32xf32> -> vector<32x32xf32>
    %c1_134 = arith.constant 1 : index
    %c0_135 = arith.constant 0 : index
    %c0_136 = arith.constant 0 : index
    %313 = vector.load %arg13[%c1_134, %c0_135, %c0_136] : memref<2x1x32xf32, #tpu.memory_space<vmem>>, vector<1x1x32xf32>
    %314 = vector.shape_cast %313 : vector<1x1x32xf32> to vector<1x32xf32>
    %315 = vector.broadcast %314 : vector<1x32xf32> to vector<32x32xf32>
    %316 = arith.addf %312, %315 : vector<32x32xf32>
    %c1_137 = arith.constant 1 : index
    %c0_138 = arith.constant 0 : index
    %c0_139 = arith.constant 0 : index
    %317 = vector.load %arg14[%c1_137, %c0_138, %c0_139] : memref<2x32x32xbf16, #tpu.memory_space<vmem>>, vector<1x32x32xbf16>
    %318 = vector.shape_cast %317 : vector<1x32x32xbf16> to vector<32x32xbf16>
    %319 = arith.truncf %300 : vector<32x32xf32> to vector<32x32xbf16>
    %cst_140 = arith.constant dense<0.000000e+00> : vector<32x32xf32>
    %320 = tpu.matmul %319, %318, %cst_140 {dimension_numbers = #tpu.dot_dimension_numbers<[1], [0], [0], [1], [0, 0, 1, 1], [], []>} : vector<32x32xbf16>, vector<32x32xbf16>, vector<32x32xf32> -> vector<32x32xf32>
    %c1_141 = arith.constant 1 : index
    %c0_142 = arith.constant 0 : index
    %c0_143 = arith.constant 0 : index
    %321 = vector.load %arg15[%c1_141, %c0_142, %c0_143] : memref<2x1x32xf32, #tpu.memory_space<vmem>>, vector<1x1x32xf32>
    %322 = vector.shape_cast %321 : vector<1x1x32xf32> to vector<1x32xf32>
    %323 = vector.broadcast %322 : vector<1x32xf32> to vector<32x32xf32>
    %324 = arith.addf %320, %323 : vector<32x32xf32>
    %325 = vector.extract_strided_slice %308 {offsets = [0, 0], sizes = [32, 8], strides = [1, 1]} : vector<32x32xf32> to vector<32x8xf32>
    %326 = vector.shape_cast %325 : vector<32x8xf32> to vector<2x16x8xf32>
    %327 = vector.extract_strided_slice %316 {offsets = [0, 0], sizes = [32, 8], strides = [1, 1]} : vector<32x32xf32> to vector<32x8xf32>
    %328 = vector.shape_cast %327 : vector<32x8xf32> to vector<2x16x8xf32>
    %329 = vector.extract_strided_slice %324 {offsets = [0, 0], sizes = [32, 8], strides = [1, 1]} : vector<32x32xf32> to vector<32x8xf32>
    %330 = vector.shape_cast %329 : vector<32x8xf32> to vector<2x16x8xf32>
    %331 = arith.truncf %326 : vector<2x16x8xf32> to vector<2x16x8xbf16>
    %332 = arith.truncf %328 : vector<2x16x8xf32> to vector<2x16x8xbf16>
    "tpu.trace_start"() <{level = 10 : i32, message = "bqd,bkd->bqk"}> : () -> ()
    %cst_144 = arith.constant dense<0.000000e+00> : vector<2x16x16xf32>
    %333 = tpu.matmul %331, %332, %cst_144 {dimension_numbers = #tpu.dot_dimension_numbers<[2], [2], [1], [1], [0, 0, 0, 1, 1, 1], [0], [0]>} : vector<2x16x8xbf16>, vector<2x16x8xbf16>, vector<2x16x16xf32> -> vector<2x16x16xf32>
    "tpu.trace_stop"() : () -> ()
    %cst_145 = arith.constant dense<0xFF800000> : vector<2x16xf32>
    %334 = vector.multi_reduction <maximumf>, %333, %cst_145 [2] : vector<2x16x16xf32> to vector<2x16xf32>
    %335 = vector.shape_cast %334 : vector<2x16xf32> to vector<2x16x1xf32>
    %336 = vector.broadcast %335 : vector<2x16x1xf32> to vector<2x16x16xf32>
    %337 = arith.subf %333, %336 : vector<2x16x16xf32>
    %338 = math.exp %337 : vector<2x16x16xf32>
    %cst_146 = arith.constant dense<0.000000e+00> : vector<2x16xf32>
    %339 = vector.multi_reduction <add>, %338, %cst_146 [2] : vector<2x16x16xf32> to vector<2x16xf32>
    %340 = vector.shape_cast %339 : vector<2x16xf32> to vector<2x16x1xf32>
    %341 = tpu.reciprocal %340 {approx = true} : vector<2x16x1xf32> -> vector<2x16x1xf32>
    %342 = vector.broadcast %341 : vector<2x16x1xf32> to vector<2x16x16xf32>
    %343 = arith.mulf %338, %342 : vector<2x16x16xf32>
    %344 = arith.truncf %343 : vector<2x16x16xf32> to vector<2x16x16xbf16>
    %345 = arith.truncf %330 : vector<2x16x8xf32> to vector<2x16x8xbf16>
    "tpu.trace_start"() <{level = 10 : i32, message = "bqk,bkd->bqd"}> : () -> ()
    %cst_147 = arith.constant dense<0.000000e+00> : vector<2x16x8xf32>
    %346 = tpu.matmul %344, %345, %cst_147 {dimension_numbers = #tpu.dot_dimension_numbers<[2], [1], [1], [2], [0, 0, 0, 1, 1, 2], [0], [0]>} : vector<2x16x16xbf16>, vector<2x16x8xbf16>, vector<2x16x8xf32> -> vector<2x16x8xf32>
    "tpu.trace_stop"() : () -> ()
    %347 = vector.shape_cast %346 : vector<2x16x8xf32> to vector<32x8xf32>
    %348 = vector.extract_strided_slice %308 {offsets = [0, 8], sizes = [32, 8], strides = [1, 1]} : vector<32x32xf32> to vector<32x8xf32>
    %349 = vector.shape_cast %348 : vector<32x8xf32> to vector<2x16x8xf32>
    %350 = vector.extract_strided_slice %316 {offsets = [0, 8], sizes = [32, 8], strides = [1, 1]} : vector<32x32xf32> to vector<32x8xf32>
    %351 = vector.shape_cast %350 : vector<32x8xf32> to vector<2x16x8xf32>
    %352 = vector.extract_strided_slice %324 {offsets = [0, 8], sizes = [32, 8], strides = [1, 1]} : vector<32x32xf32> to vector<32x8xf32>
    %353 = vector.shape_cast %352 : vector<32x8xf32> to vector<2x16x8xf32>
    %354 = arith.truncf %349 : vector<2x16x8xf32> to vector<2x16x8xbf16>
    %355 = arith.truncf %351 : vector<2x16x8xf32> to vector<2x16x8xbf16>
    "tpu.trace_start"() <{level = 10 : i32, message = "bqd,bkd->bqk"}> : () -> ()
    %cst_148 = arith.constant dense<0.000000e+00> : vector<2x16x16xf32>
    %356 = tpu.matmul %354, %355, %cst_148 {dimension_numbers = #tpu.dot_dimension_numbers<[2], [2], [1], [1], [0, 0, 0, 1, 1, 1], [0], [0]>} : vector<2x16x8xbf16>, vector<2x16x8xbf16>, vector<2x16x16xf32> -> vector<2x16x16xf32>
    "tpu.trace_stop"() : () -> ()
    %cst_149 = arith.constant dense<0xFF800000> : vector<2x16xf32>
    %357 = vector.multi_reduction <maximumf>, %356, %cst_149 [2] : vector<2x16x16xf32> to vector<2x16xf32>
    %358 = vector.shape_cast %357 : vector<2x16xf32> to vector<2x16x1xf32>
    %359 = vector.broadcast %358 : vector<2x16x1xf32> to vector<2x16x16xf32>
    %360 = arith.subf %356, %359 : vector<2x16x16xf32>
    %361 = math.exp %360 : vector<2x16x16xf32>
    %cst_150 = arith.constant dense<0.000000e+00> : vector<2x16xf32>
    %362 = vector.multi_reduction <add>, %361, %cst_150 [2] : vector<2x16x16xf32> to vector<2x16xf32>
    %363 = vector.shape_cast %362 : vector<2x16xf32> to vector<2x16x1xf32>
    %364 = tpu.reciprocal %363 {approx = true} : vector<2x16x1xf32> -> vector<2x16x1xf32>
    %365 = vector.broadcast %364 : vector<2x16x1xf32> to vector<2x16x16xf32>
    %366 = arith.mulf %361, %365 : vector<2x16x16xf32>
    %367 = arith.truncf %366 : vector<2x16x16xf32> to vector<2x16x16xbf16>
    %368 = arith.truncf %353 : vector<2x16x8xf32> to vector<2x16x8xbf16>
    "tpu.trace_start"() <{level = 10 : i32, message = "bqk,bkd->bqd"}> : () -> ()
    %cst_151 = arith.constant dense<0.000000e+00> : vector<2x16x8xf32>
    %369 = tpu.matmul %367, %368, %cst_151 {dimension_numbers = #tpu.dot_dimension_numbers<[2], [1], [1], [2], [0, 0, 0, 1, 1, 2], [0], [0]>} : vector<2x16x16xbf16>, vector<2x16x8xbf16>, vector<2x16x8xf32> -> vector<2x16x8xf32>
    "tpu.trace_stop"() : () -> ()
    %370 = vector.shape_cast %369 : vector<2x16x8xf32> to vector<32x8xf32>
    %371 = vector.extract_strided_slice %308 {offsets = [0, 16], sizes = [32, 8], strides = [1, 1]} : vector<32x32xf32> to vector<32x8xf32>
    %372 = vector.shape_cast %371 : vector<32x8xf32> to vector<2x16x8xf32>
    %373 = vector.extract_strided_slice %316 {offsets = [0, 16], sizes = [32, 8], strides = [1, 1]} : vector<32x32xf32> to vector<32x8xf32>
    %374 = vector.shape_cast %373 : vector<32x8xf32> to vector<2x16x8xf32>
    %375 = vector.extract_strided_slice %324 {offsets = [0, 16], sizes = [32, 8], strides = [1, 1]} : vector<32x32xf32> to vector<32x8xf32>
    %376 = vector.shape_cast %375 : vector<32x8xf32> to vector<2x16x8xf32>
    %377 = arith.truncf %372 : vector<2x16x8xf32> to vector<2x16x8xbf16>
    %378 = arith.truncf %374 : vector<2x16x8xf32> to vector<2x16x8xbf16>
    "tpu.trace_start"() <{level = 10 : i32, message = "bqd,bkd->bqk"}> : () -> ()
    %cst_152 = arith.constant dense<0.000000e+00> : vector<2x16x16xf32>
    %379 = tpu.matmul %377, %378, %cst_152 {dimension_numbers = #tpu.dot_dimension_numbers<[2], [2], [1], [1], [0, 0, 0, 1, 1, 1], [0], [0]>} : vector<2x16x8xbf16>, vector<2x16x8xbf16>, vector<2x16x16xf32> -> vector<2x16x16xf32>
    "tpu.trace_stop"() : () -> ()
    %cst_153 = arith.constant dense<0xFF800000> : vector<2x16xf32>
    %380 = vector.multi_reduction <maximumf>, %379, %cst_153 [2] : vector<2x16x16xf32> to vector<2x16xf32>
    %381 = vector.shape_cast %380 : vector<2x16xf32> to vector<2x16x1xf32>
    %382 = vector.broadcast %381 : vector<2x16x1xf32> to vector<2x16x16xf32>
    %383 = arith.subf %379, %382 : vector<2x16x16xf32>
    %384 = math.exp %383 : vector<2x16x16xf32>
    %cst_154 = arith.constant dense<0.000000e+00> : vector<2x16xf32>
    %385 = vector.multi_reduction <add>, %384, %cst_154 [2] : vector<2x16x16xf32> to vector<2x16xf32>
    %386 = vector.shape_cast %385 : vector<2x16xf32> to vector<2x16x1xf32>
    %387 = tpu.reciprocal %386 {approx = true} : vector<2x16x1xf32> -> vector<2x16x1xf32>
    %388 = vector.broadcast %387 : vector<2x16x1xf32> to vector<2x16x16xf32>
    %389 = arith.mulf %384, %388 : vector<2x16x16xf32>
    %390 = arith.truncf %389 : vector<2x16x16xf32> to vector<2x16x16xbf16>
    %391 = arith.truncf %376 : vector<2x16x8xf32> to vector<2x16x8xbf16>
    "tpu.trace_start"() <{level = 10 : i32, message = "bqk,bkd->bqd"}> : () -> ()
    %cst_155 = arith.constant dense<0.000000e+00> : vector<2x16x8xf32>
    %392 = tpu.matmul %390, %391, %cst_155 {dimension_numbers = #tpu.dot_dimension_numbers<[2], [1], [1], [2], [0, 0, 0, 1, 1, 2], [0], [0]>} : vector<2x16x16xbf16>, vector<2x16x8xbf16>, vector<2x16x8xf32> -> vector<2x16x8xf32>
    "tpu.trace_stop"() : () -> ()
    %393 = vector.shape_cast %392 : vector<2x16x8xf32> to vector<32x8xf32>
    %394 = vector.extract_strided_slice %308 {offsets = [0, 24], sizes = [32, 8], strides = [1, 1]} : vector<32x32xf32> to vector<32x8xf32>
    %395 = vector.shape_cast %394 : vector<32x8xf32> to vector<2x16x8xf32>
    %396 = vector.extract_strided_slice %316 {offsets = [0, 24], sizes = [32, 8], strides = [1, 1]} : vector<32x32xf32> to vector<32x8xf32>
    %397 = vector.shape_cast %396 : vector<32x8xf32> to vector<2x16x8xf32>
    %398 = vector.extract_strided_slice %324 {offsets = [0, 24], sizes = [32, 8], strides = [1, 1]} : vector<32x32xf32> to vector<32x8xf32>
    %399 = vector.shape_cast %398 : vector<32x8xf32> to vector<2x16x8xf32>
    %400 = arith.truncf %395 : vector<2x16x8xf32> to vector<2x16x8xbf16>
    %401 = arith.truncf %397 : vector<2x16x8xf32> to vector<2x16x8xbf16>
    "tpu.trace_start"() <{level = 10 : i32, message = "bqd,bkd->bqk"}> : () -> ()
    %cst_156 = arith.constant dense<0.000000e+00> : vector<2x16x16xf32>
    %402 = tpu.matmul %400, %401, %cst_156 {dimension_numbers = #tpu.dot_dimension_numbers<[2], [2], [1], [1], [0, 0, 0, 1, 1, 1], [0], [0]>} : vector<2x16x8xbf16>, vector<2x16x8xbf16>, vector<2x16x16xf32> -> vector<2x16x16xf32>
    "tpu.trace_stop"() : () -> ()
    %cst_157 = arith.constant dense<0xFF800000> : vector<2x16xf32>
    %403 = vector.multi_reduction <maximumf>, %402, %cst_157 [2] : vector<2x16x16xf32> to vector<2x16xf32>
    %404 = vector.shape_cast %403 : vector<2x16xf32> to vector<2x16x1xf32>
    %405 = vector.broadcast %404 : vector<2x16x1xf32> to vector<2x16x16xf32>
    %406 = arith.subf %402, %405 : vector<2x16x16xf32>
    %407 = math.exp %406 : vector<2x16x16xf32>
    %cst_158 = arith.constant dense<0.000000e+00> : vector<2x16xf32>
    %408 = vector.multi_reduction <add>, %407, %cst_158 [2] : vector<2x16x16xf32> to vector<2x16xf32>
    %409 = vector.shape_cast %408 : vector<2x16xf32> to vector<2x16x1xf32>
    %410 = tpu.reciprocal %409 {approx = true} : vector<2x16x1xf32> -> vector<2x16x1xf32>
    %411 = vector.broadcast %410 : vector<2x16x1xf32> to vector<2x16x16xf32>
    %412 = arith.mulf %407, %411 : vector<2x16x16xf32>
    %413 = arith.truncf %412 : vector<2x16x16xf32> to vector<2x16x16xbf16>
    %414 = arith.truncf %399 : vector<2x16x8xf32> to vector<2x16x8xbf16>
    "tpu.trace_start"() <{level = 10 : i32, message = "bqk,bkd->bqd"}> : () -> ()
    %cst_159 = arith.constant dense<0.000000e+00> : vector<2x16x8xf32>
    %415 = tpu.matmul %413, %414, %cst_159 {dimension_numbers = #tpu.dot_dimension_numbers<[2], [1], [1], [2], [0, 0, 0, 1, 1, 2], [0], [0]>} : vector<2x16x16xbf16>, vector<2x16x8xbf16>, vector<2x16x8xf32> -> vector<2x16x8xf32>
    "tpu.trace_stop"() : () -> ()
    %416 = vector.shape_cast %415 : vector<2x16x8xf32> to vector<32x8xf32>
    %417 = tpu.concatenate %347, %370, %393, %416 in 1 : vector<32x8xf32>, vector<32x8xf32>, vector<32x8xf32>, vector<32x8xf32> -> vector<32x32xf32>
    %c1_160 = arith.constant 1 : index
    %c0_161 = arith.constant 0 : index
    %c0_162 = arith.constant 0 : index
    %418 = vector.load %arg16[%c1_160, %c0_161, %c0_162] : memref<2x32x32xbf16, #tpu.memory_space<vmem>>, vector<1x32x32xbf16>
    %419 = vector.shape_cast %418 : vector<1x32x32xbf16> to vector<32x32xbf16>
    %420 = arith.truncf %417 : vector<32x32xf32> to vector<32x32xbf16>
    %cst_163 = arith.constant dense<0.000000e+00> : vector<32x32xf32>
    %421 = tpu.matmul %420, %419, %cst_163 {dimension_numbers = #tpu.dot_dimension_numbers<[1], [0], [0], [1], [0, 0, 1, 1], [], []>} : vector<32x32xbf16>, vector<32x32xbf16>, vector<32x32xf32> -> vector<32x32xf32>
    %422 = arith.addf %274, %421 : vector<32x32xf32>
    %c1_164 = arith.constant 1 : index
    %c0_165 = arith.constant 0 : index
    %c0_166 = arith.constant 0 : index
    %423 = vector.load %arg17[%c1_164, %c0_165, %c0_166] : memref<2x1x32xf32, #tpu.memory_space<vmem>>, vector<1x1x32xf32>
    %424 = vector.shape_cast %423 : vector<1x1x32xf32> to vector<1x32xf32>
    %425 = vector.broadcast %424 : vector<1x32xf32> to vector<32x32xf32>
    %426 = arith.addf %422, %425 : vector<32x32xf32>
    %c1_167 = arith.constant 1 : index
    %c0_168 = arith.constant 0 : index
    %c0_169 = arith.constant 0 : index
    %427 = vector.load %arg18[%c1_167, %c0_168, %c0_169] : memref<2x1x32xf32, #tpu.memory_space<vmem>>, vector<1x1x32xf32>
    %428 = vector.shape_cast %427 : vector<1x1x32xf32> to vector<1x32xf32>
    %c1_170 = arith.constant 1 : index
    %c0_171 = arith.constant 0 : index
    %c0_172 = arith.constant 0 : index
    %429 = vector.load %arg19[%c1_170, %c0_171, %c0_172] : memref<2x1x32xf32, #tpu.memory_space<vmem>>, vector<1x1x32xf32>
    %430 = vector.shape_cast %429 : vector<1x1x32xf32> to vector<1x32xf32>
    %cst_173 = arith.constant dense<0.000000e+00> : vector<32xf32>
    %431 = vector.multi_reduction <add>, %426, %cst_173 [1] : vector<32x32xf32> to vector<32xf32>
    %432 = vector.shape_cast %431 : vector<32xf32> to vector<32x1xf32>
    %cst_174 = arith.constant 3.200000e+01 : f32
    %433 = vector.broadcast %cst_174 : f32 to vector<32x1xf32>
    %434 = arith.divf %432, %433 : vector<32x1xf32>
    %435 = vector.broadcast %434 : vector<32x1xf32> to vector<32x32xf32>
    %436 = arith.subf %426, %435 : vector<32x32xf32>
    %437 = arith.mulf %436, %436 : vector<32x32xf32>
    %cst_175 = arith.constant dense<0.000000e+00> : vector<32xf32>
    %438 = vector.multi_reduction <add>, %437, %cst_175 [1] : vector<32x32xf32> to vector<32xf32>
    %439 = vector.shape_cast %438 : vector<32xf32> to vector<32x1xf32>
    %cst_176 = arith.constant 3.200000e+01 : f32
    %440 = vector.broadcast %cst_176 : f32 to vector<32x1xf32>
    %441 = arith.divf %439, %440 : vector<32x1xf32>
    %442 = vector.broadcast %434 : vector<32x1xf32> to vector<32x32xf32>
    %443 = arith.subf %426, %442 : vector<32x32xf32>
    %cst_177 = arith.constant 9.99999974E-6 : f32
    %444 = vector.broadcast %cst_177 : f32 to vector<32x1xf32>
    %445 = arith.addf %441, %444 : vector<32x1xf32>
    %446 = math.rsqrt %445 : vector<32x1xf32>
    %447 = vector.broadcast %446 : vector<32x1xf32> to vector<32x32xf32>
    %448 = arith.mulf %443, %447 : vector<32x32xf32>
    %449 = vector.broadcast %428 : vector<1x32xf32> to vector<32x32xf32>
    %450 = arith.mulf %448, %449 : vector<32x32xf32>
    %451 = vector.broadcast %430 : vector<1x32xf32> to vector<32x32xf32>
    %452 = arith.addf %450, %451 : vector<32x32xf32>
    %c1_178 = arith.constant 1 : index
    %c0_179 = arith.constant 0 : index
    %c0_180 = arith.constant 0 : index
    %453 = vector.load %arg20[%c1_178, %c0_179, %c0_180] : memref<2x32x64xbf16, #tpu.memory_space<vmem>>, vector<1x32x64xbf16>
    %454 = vector.shape_cast %453 : vector<1x32x64xbf16> to vector<32x64xbf16>
    %455 = arith.truncf %452 : vector<32x32xf32> to vector<32x32xbf16>
    %cst_181 = arith.constant dense<0.000000e+00> : vector<32x64xf32>
    %456 = tpu.matmul %455, %454, %cst_181 {dimension_numbers = #tpu.dot_dimension_numbers<[1], [0], [0], [1], [0, 0, 1, 1], [], []>} : vector<32x32xbf16>, vector<32x64xbf16>, vector<32x64xf32> -> vector<32x64xf32>
    %c1_182 = arith.constant 1 : index
    %c0_183 = arith.constant 0 : index
    %c0_184 = arith.constant 0 : index
    %457 = vector.load %arg21[%c1_182, %c0_183, %c0_184] : memref<2x1x64xf32, #tpu.memory_space<vmem>>, vector<1x1x64xf32>
    %458 = vector.shape_cast %457 : vector<1x1x64xf32> to vector<1x64xf32>
    %459 = vector.broadcast %458 : vector<1x64xf32> to vector<32x64xf32>
    %460 = arith.addf %456, %459 : vector<32x64xf32>
    %461 = arith.negf %460 : vector<32x64xf32>
    %462 = math.exp %461 : vector<32x64xf32>
    %cst_185 = arith.constant 1.000000e+00 : f32
    %463 = vector.broadcast %cst_185 : f32 to vector<32x64xf32>
    %464 = arith.addf %463, %462 : vector<32x64xf32>
    %465 = arith.divf %463, %464 : vector<32x64xf32>
    %466 = arith.mulf %460, %465 : vector<32x64xf32>
    %c1_186 = arith.constant 1 : index
    %c0_187 = arith.constant 0 : index
    %c0_188 = arith.constant 0 : index
    %467 = vector.load %arg22[%c1_186, %c0_187, %c0_188] : memref<2x64x32xbf16, #tpu.memory_space<vmem>>, vector<1x64x32xbf16>
    %468 = vector.shape_cast %467 : vector<1x64x32xbf16> to vector<64x32xbf16>
    %469 = arith.truncf %466 : vector<32x64xf32> to vector<32x64xbf16>
    %cst_189 = arith.constant dense<0.000000e+00> : vector<32x32xf32>
    %470 = tpu.matmul %469, %468, %cst_189 {dimension_numbers = #tpu.dot_dimension_numbers<[1], [0], [0], [1], [0, 0, 1, 1], [], []>} : vector<32x64xbf16>, vector<64x32xbf16>, vector<32x32xf32> -> vector<32x32xf32>
    %471 = arith.addf %426, %470 : vector<32x32xf32>
    %c1_190 = arith.constant 1 : index
    %c0_191 = arith.constant 0 : index
    %c0_192 = arith.constant 0 : index
    %472 = vector.load %arg23[%c1_190, %c0_191, %c0_192] : memref<2x1x32xf32, #tpu.memory_space<vmem>>, vector<1x1x32xf32>
    %473 = vector.shape_cast %472 : vector<1x1x32xf32> to vector<1x32xf32>
    %474 = vector.broadcast %473 : vector<1x32xf32> to vector<32x32xf32>
    %475 = arith.addf %471, %474 : vector<32x32xf32>
    %c0_193 = arith.constant 0 : index
    %c0_194 = arith.constant 0 : index
    %476 = vector.load %arg24[%c0_193, %c0_194] : memref<1x32xf32, #tpu.memory_space<vmem>>, vector<1x32xf32>
    %c0_195 = arith.constant 0 : index
    %c0_196 = arith.constant 0 : index
    %477 = vector.load %arg25[%c0_195, %c0_196] : memref<1x32xf32, #tpu.memory_space<vmem>>, vector<1x32xf32>
    %cst_197 = arith.constant dense<0.000000e+00> : vector<32xf32>
    %478 = vector.multi_reduction <add>, %475, %cst_197 [1] : vector<32x32xf32> to vector<32xf32>
    %479 = vector.shape_cast %478 : vector<32xf32> to vector<32x1xf32>
    %cst_198 = arith.constant 3.200000e+01 : f32
    %480 = vector.broadcast %cst_198 : f32 to vector<32x1xf32>
    %481 = arith.divf %479, %480 : vector<32x1xf32>
    %482 = vector.broadcast %481 : vector<32x1xf32> to vector<32x32xf32>
    %483 = arith.subf %475, %482 : vector<32x32xf32>
    %484 = arith.mulf %483, %483 : vector<32x32xf32>
    %cst_199 = arith.constant dense<0.000000e+00> : vector<32xf32>
    %485 = vector.multi_reduction <add>, %484, %cst_199 [1] : vector<32x32xf32> to vector<32xf32>
    %486 = vector.shape_cast %485 : vector<32xf32> to vector<32x1xf32>
    %cst_200 = arith.constant 3.200000e+01 : f32
    %487 = vector.broadcast %cst_200 : f32 to vector<32x1xf32>
    %488 = arith.divf %486, %487 : vector<32x1xf32>
    %489 = vector.broadcast %481 : vector<32x1xf32> to vector<32x32xf32>
    %490 = arith.subf %475, %489 : vector<32x32xf32>
    %cst_201 = arith.constant 9.99999997E-7 : f32
    %491 = vector.broadcast %cst_201 : f32 to vector<32x1xf32>
    %492 = arith.addf %488, %491 : vector<32x1xf32>
    %493 = math.rsqrt %492 : vector<32x1xf32>
    %494 = vector.broadcast %493 : vector<32x1xf32> to vector<32x32xf32>
    %495 = arith.mulf %490, %494 : vector<32x32xf32>
    %496 = vector.broadcast %476 : vector<1x32xf32> to vector<32x32xf32>
    %497 = arith.mulf %495, %496 : vector<32x32xf32>
    %498 = vector.broadcast %477 : vector<1x32xf32> to vector<32x32xf32>
    %499 = arith.addf %497, %498 : vector<32x32xf32>
    %c0_202 = arith.constant 0 : index
    %c0_203 = arith.constant 0 : index
    %500 = vector.load %arg26[%c0_202, %c0_203] : memref<32x32xbf16, #tpu.memory_space<vmem>>, vector<32x32xbf16>
    %501 = arith.truncf %499 : vector<32x32xf32> to vector<32x32xbf16>
    %cst_204 = arith.constant dense<0.000000e+00> : vector<32x32xf32>
    %502 = tpu.matmul %501, %500, %cst_204 {dimension_numbers = #tpu.dot_dimension_numbers<[1], [0], [0], [1], [0, 0, 1, 1], [], []>} : vector<32x32xbf16>, vector<32x32xbf16>, vector<32x32xf32> -> vector<32x32xf32>
    %c0_205 = arith.constant 0 : index
    %c0_206 = arith.constant 0 : index
    %503 = vector.load %arg27[%c0_205, %c0_206] : memref<1x32xf32, #tpu.memory_space<vmem>>, vector<1x32xf32>
    %504 = vector.broadcast %503 : vector<1x32xf32> to vector<32x32xf32>
    %505 = arith.mulf %502, %504 : vector<32x32xf32>
    %c0_207 = arith.constant 0 : index
    %c0_208 = arith.constant 0 : index
    %506 = vector.load %arg28[%c0_207, %c0_208] : memref<1x32xf32, #tpu.memory_space<vmem>>, vector<1x32xf32>
    %507 = vector.broadcast %506 : vector<1x32xf32> to vector<32x32xf32>
    %508 = arith.addf %505, %507 : vector<32x32xf32>
    %509 = arith.negf %508 : vector<32x32xf32>
    %510 = math.exp %509 : vector<32x32xf32>
    %cst_209 = arith.constant 1.000000e+00 : f32
    %511 = vector.broadcast %cst_209 : f32 to vector<32x32xf32>
    %512 = arith.addf %511, %510 : vector<32x32xf32>
    %513 = arith.divf %511, %512 : vector<32x32xf32>
    %514 = arith.mulf %508, %513 : vector<32x32xf32>
    %515 = tpu.iota {dimensions = array<i32: 0>} : vector<32x1xi32>
    %c16_i32_210 = arith.constant 16 : i32
    %c0_i32_211 = arith.constant 0 : i32
    %516 = arith.cmpi eq, %c16_i32_210, %c0_i32_211 : i32
    %c1_i32_212 = arith.constant 1 : i32
    %517 = arith.select %516, %c1_i32_212, %c16_i32_210 : i32
    %518 = vector.broadcast %517 : i32 to vector<32x1xi32>
    %519 = arith.remsi %515, %518 : vector<32x1xi32>
    %c0_i32_213 = arith.constant 0 : i32
    %520 = vector.broadcast %c0_i32_213 : i32 to vector<32x1xi32>
    %521 = arith.cmpi ne, %519, %520 : vector<32x1xi32>
    %c0_i32_214 = arith.constant 0 : i32
    %522 = vector.broadcast %c0_i32_214 : i32 to vector<32x1xi32>
    %523 = arith.cmpi slt, %519, %522 : vector<32x1xi32>
    %c0_i32_215 = arith.constant 0 : i32
    %524 = arith.cmpi slt, %517, %c0_i32_215 : i32
    %525 = vector.broadcast %524 : i1 to vector<32x1xi1>
    %526 = vector.broadcast %525 : vector<32x1xi1> to vector<32x1xi1>
    %527 = arith.xori %523, %526 : vector<32x1xi1>
    %528 = arith.andi %527, %521 : vector<32x1xi1>
    %529 = vector.broadcast %517 : i32 to vector<32x1xi32>
    %530 = arith.addi %519, %529 : vector<32x1xi32>
    %531 = arith.select %528, %530, %519 : vector<32x1xi1>, vector<32x1xi32>
    %c0_i32_216 = arith.constant 0 : i32
    %532 = vector.broadcast %c0_i32_216 : i32 to vector<32x1xi32>
    %533 = arith.cmpi eq, %531, %532 : vector<32x1xi32>
    %c1_i32_217 = arith.constant 1 : i32
    %534 = tpu.dynamic_rotate %1 by %c1_i32_217 dim 0 : vector<32x32xf32>, i32 -> vector<32x32xf32>
    %cst_218 = arith.constant 0.000000e+00 : f32
    %535 = vector.shape_cast %533 : vector<32x1xi1> to vector<32x1xi1>
    %536 = vector.broadcast %535 : vector<32x1xi1> to vector<32x32xi1>
    %537 = vector.broadcast %cst_218 : f32 to vector<32x32xf32>
    %538 = arith.select %536, %537, %534 : vector<32x32xi1>, vector<32x32xf32>
    %c15_i32_219 = arith.constant 15 : i32
    %539 = vector.broadcast %c15_i32_219 : i32 to vector<32x1xi32>
    %540 = arith.cmpi eq, %531, %539 : vector<32x1xi32>
    %c31_i32_220 = arith.constant 31 : i32
    %541 = tpu.dynamic_rotate %1 by %c31_i32_220 dim 0 : vector<32x32xf32>, i32 -> vector<32x32xf32>
    %cst_221 = arith.constant 0.000000e+00 : f32
    %542 = vector.shape_cast %540 : vector<32x1xi1> to vector<32x1xi1>
    %543 = vector.broadcast %542 : vector<32x1xi1> to vector<32x32xi1>
    %544 = vector.broadcast %cst_221 : f32 to vector<32x32xf32>
    %545 = arith.select %543, %544, %541 : vector<32x32xi1>, vector<32x32xf32>
    %546 = arith.truncf %538 : vector<32x32xf32> to vector<32x32xbf16>
    %c0_222 = arith.constant 0 : index
    %c0_223 = arith.constant 0 : index
    %c0_224 = arith.constant 0 : index
    %547 = vector.load %arg29[%c0_222, %c0_223, %c0_224] : memref<3x32x4xbf16, #tpu.memory_space<vmem>>, vector<1x32x4xbf16>
    %548 = vector.shape_cast %547 : vector<1x32x4xbf16> to vector<32x4xbf16>
    %cst_225 = arith.constant dense<0.000000e+00> : vector<32x4xf32>
    %549 = tpu.matmul %546, %548, %cst_225 {dimension_numbers = #tpu.dot_dimension_numbers<[1], [0], [0], [1], [0, 0, 1, 1], [], []>} : vector<32x32xbf16>, vector<32x4xbf16>, vector<32x4xf32> -> vector<32x4xf32>
    %550 = arith.truncf %1 : vector<32x32xf32> to vector<32x32xbf16>
    %c1_226 = arith.constant 1 : index
    %c0_227 = arith.constant 0 : index
    %c0_228 = arith.constant 0 : index
    %551 = vector.load %arg29[%c1_226, %c0_227, %c0_228] : memref<3x32x4xbf16, #tpu.memory_space<vmem>>, vector<1x32x4xbf16>
    %552 = vector.shape_cast %551 : vector<1x32x4xbf16> to vector<32x4xbf16>
    %cst_229 = arith.constant dense<0.000000e+00> : vector<32x4xf32>
    %553 = tpu.matmul %550, %552, %cst_229 {dimension_numbers = #tpu.dot_dimension_numbers<[1], [0], [0], [1], [0, 0, 1, 1], [], []>} : vector<32x32xbf16>, vector<32x4xbf16>, vector<32x4xf32> -> vector<32x4xf32>
    %554 = arith.addf %549, %553 : vector<32x4xf32>
    %555 = arith.truncf %545 : vector<32x32xf32> to vector<32x32xbf16>
    %c2_230 = arith.constant 2 : index
    %c0_231 = arith.constant 0 : index
    %c0_232 = arith.constant 0 : index
    %556 = vector.load %arg29[%c2_230, %c0_231, %c0_232] : memref<3x32x4xbf16, #tpu.memory_space<vmem>>, vector<1x32x4xbf16>
    %557 = vector.shape_cast %556 : vector<1x32x4xbf16> to vector<32x4xbf16>
    %cst_233 = arith.constant dense<0.000000e+00> : vector<32x4xf32>
    %558 = tpu.matmul %555, %557, %cst_233 {dimension_numbers = #tpu.dot_dimension_numbers<[1], [0], [0], [1], [0, 0, 1, 1], [], []>} : vector<32x32xbf16>, vector<32x4xbf16>, vector<32x4xf32> -> vector<32x4xf32>
    %559 = arith.addf %554, %558 : vector<32x4xf32>
    %560 = tpu.iota {dimensions = array<i32: 0>} : vector<32x1xi32>
    %c16_i32_234 = arith.constant 16 : i32
    %c0_i32_235 = arith.constant 0 : i32
    %561 = arith.cmpi eq, %c16_i32_234, %c0_i32_235 : i32
    %c1_i32_236 = arith.constant 1 : i32
    %562 = arith.select %561, %c1_i32_236, %c16_i32_234 : i32
    %563 = vector.broadcast %562 : i32 to vector<32x1xi32>
    %564 = arith.remsi %560, %563 : vector<32x1xi32>
    %c0_i32_237 = arith.constant 0 : i32
    %565 = vector.broadcast %c0_i32_237 : i32 to vector<32x1xi32>
    %566 = arith.cmpi ne, %564, %565 : vector<32x1xi32>
    %c0_i32_238 = arith.constant 0 : i32
    %567 = vector.broadcast %c0_i32_238 : i32 to vector<32x1xi32>
    %568 = arith.cmpi slt, %564, %567 : vector<32x1xi32>
    %c0_i32_239 = arith.constant 0 : i32
    %569 = arith.cmpi slt, %562, %c0_i32_239 : i32
    %570 = vector.broadcast %569 : i1 to vector<32x1xi1>
    %571 = vector.broadcast %570 : vector<32x1xi1> to vector<32x1xi1>
    %572 = arith.xori %568, %571 : vector<32x1xi1>
    %573 = arith.andi %572, %566 : vector<32x1xi1>
    %574 = vector.broadcast %562 : i32 to vector<32x1xi32>
    %575 = arith.addi %564, %574 : vector<32x1xi32>
    %576 = arith.select %573, %575, %564 : vector<32x1xi1>, vector<32x1xi32>
    %c0_i32_240 = arith.constant 0 : i32
    %577 = vector.broadcast %c0_i32_240 : i32 to vector<32x1xi32>
    %578 = arith.cmpi eq, %576, %577 : vector<32x1xi32>
    %c1_i32_241 = arith.constant 1 : i32
    %579 = tpu.dynamic_rotate %514 by %c1_i32_241 dim 0 : vector<32x32xf32>, i32 -> vector<32x32xf32>
    %cst_242 = arith.constant 0.000000e+00 : f32
    %580 = vector.shape_cast %578 : vector<32x1xi1> to vector<32x1xi1>
    %581 = vector.broadcast %580 : vector<32x1xi1> to vector<32x32xi1>
    %582 = vector.broadcast %cst_242 : f32 to vector<32x32xf32>
    %583 = arith.select %581, %582, %579 : vector<32x32xi1>, vector<32x32xf32>
    %c15_i32_243 = arith.constant 15 : i32
    %584 = vector.broadcast %c15_i32_243 : i32 to vector<32x1xi32>
    %585 = arith.cmpi eq, %576, %584 : vector<32x1xi32>
    %c31_i32_244 = arith.constant 31 : i32
    %586 = tpu.dynamic_rotate %514 by %c31_i32_244 dim 0 : vector<32x32xf32>, i32 -> vector<32x32xf32>
    %cst_245 = arith.constant 0.000000e+00 : f32
    %587 = vector.shape_cast %585 : vector<32x1xi1> to vector<32x1xi1>
    %588 = vector.broadcast %587 : vector<32x1xi1> to vector<32x32xi1>
    %589 = vector.broadcast %cst_245 : f32 to vector<32x32xf32>
    %590 = arith.select %588, %589, %586 : vector<32x32xi1>, vector<32x32xf32>
    %591 = arith.truncf %583 : vector<32x32xf32> to vector<32x32xbf16>
    %c0_246 = arith.constant 0 : index
    %c0_247 = arith.constant 0 : index
    %c0_248 = arith.constant 0 : index
    %592 = vector.load %arg30[%c0_246, %c0_247, %c0_248] : memref<3x32x4xbf16, #tpu.memory_space<vmem>>, vector<1x32x4xbf16>
    %593 = vector.shape_cast %592 : vector<1x32x4xbf16> to vector<32x4xbf16>
    %cst_249 = arith.constant dense<0.000000e+00> : vector<32x4xf32>
    %594 = tpu.matmul %591, %593, %cst_249 {dimension_numbers = #tpu.dot_dimension_numbers<[1], [0], [0], [1], [0, 0, 1, 1], [], []>} : vector<32x32xbf16>, vector<32x4xbf16>, vector<32x4xf32> -> vector<32x4xf32>
    %595 = arith.truncf %514 : vector<32x32xf32> to vector<32x32xbf16>
    %c1_250 = arith.constant 1 : index
    %c0_251 = arith.constant 0 : index
    %c0_252 = arith.constant 0 : index
    %596 = vector.load %arg30[%c1_250, %c0_251, %c0_252] : memref<3x32x4xbf16, #tpu.memory_space<vmem>>, vector<1x32x4xbf16>
    %597 = vector.shape_cast %596 : vector<1x32x4xbf16> to vector<32x4xbf16>
    %cst_253 = arith.constant dense<0.000000e+00> : vector<32x4xf32>
    %598 = tpu.matmul %595, %597, %cst_253 {dimension_numbers = #tpu.dot_dimension_numbers<[1], [0], [0], [1], [0, 0, 1, 1], [], []>} : vector<32x32xbf16>, vector<32x4xbf16>, vector<32x4xf32> -> vector<32x4xf32>
    %599 = arith.addf %594, %598 : vector<32x4xf32>
    %600 = arith.truncf %590 : vector<32x32xf32> to vector<32x32xbf16>
    %c2_254 = arith.constant 2 : index
    %c0_255 = arith.constant 0 : index
    %c0_256 = arith.constant 0 : index
    %601 = vector.load %arg30[%c2_254, %c0_255, %c0_256] : memref<3x32x4xbf16, #tpu.memory_space<vmem>>, vector<1x32x4xbf16>
    %602 = vector.shape_cast %601 : vector<1x32x4xbf16> to vector<32x4xbf16>
    %cst_257 = arith.constant dense<0.000000e+00> : vector<32x4xf32>
    %603 = tpu.matmul %600, %602, %cst_257 {dimension_numbers = #tpu.dot_dimension_numbers<[1], [0], [0], [1], [0, 0, 1, 1], [], []>} : vector<32x32xbf16>, vector<32x4xbf16>, vector<32x4xf32> -> vector<32x4xf32>
    %604 = arith.addf %599, %603 : vector<32x4xf32>
    %605 = arith.addf %559, %604 : vector<32x4xf32>
    %c0_258 = arith.constant 0 : index
    %c0_259 = arith.constant 0 : index
    %606 = vector.load %arg31[%c0_258, %c0_259] : memref<1x4xf32, #tpu.memory_space<vmem>>, vector<1x4xf32>
    %607 = vector.broadcast %606 : vector<1x4xf32> to vector<32x4xf32>
    %608 = arith.mulf %605, %607 : vector<32x4xf32>
    %c0_260 = arith.constant 0 : index
    %c0_261 = arith.constant 0 : index
    %609 = vector.load %arg32[%c0_260, %c0_261] : memref<1x4xf32, #tpu.memory_space<vmem>>, vector<1x4xf32>
    %610 = vector.broadcast %609 : vector<1x4xf32> to vector<32x4xf32>
    %611 = arith.addf %608, %610 : vector<32x4xf32>
    %612 = arith.negf %611 : vector<32x4xf32>
    %613 = math.exp %612 : vector<32x4xf32>
    %cst_262 = arith.constant 1.000000e+00 : f32
    %614 = vector.broadcast %cst_262 : f32 to vector<32x4xf32>
    %615 = arith.addf %614, %613 : vector<32x4xf32>
    %616 = arith.divf %614, %615 : vector<32x4xf32>
    %617 = arith.mulf %611, %616 : vector<32x4xf32>
    %c0_263 = arith.constant 0 : index
    %c0_264 = arith.constant 0 : index
    %618 = vector.load %arg33[%c0_263, %c0_264] : memref<4x32xbf16, #tpu.memory_space<vmem>>, vector<4x32xbf16>
    %619 = arith.truncf %617 : vector<32x4xf32> to vector<32x4xbf16>
    %cst_265 = arith.constant dense<0.000000e+00> : vector<32x32xf32>
    %620 = tpu.matmul %619, %618, %cst_265 {dimension_numbers = #tpu.dot_dimension_numbers<[1], [0], [0], [1], [0, 0, 1, 1], [], []>} : vector<32x4xbf16>, vector<4x32xbf16>, vector<32x32xf32> -> vector<32x32xf32>
    %c0_266 = arith.constant 0 : index
    %c0_267 = arith.constant 0 : index
    %621 = vector.load %arg34[%c0_266, %c0_267] : memref<1x32xf32, #tpu.memory_space<vmem>>, vector<1x32xf32>
    %622 = vector.broadcast %621 : vector<1x32xf32> to vector<32x32xf32>
    %623 = arith.mulf %620, %622 : vector<32x32xf32>
    %c0_268 = arith.constant 0 : index
    %c0_269 = arith.constant 0 : index
    %624 = vector.load %arg35[%c0_268, %c0_269] : memref<1x32xf32, #tpu.memory_space<vmem>>, vector<1x32xf32>
    %625 = vector.broadcast %624 : vector<1x32xf32> to vector<32x32xf32>
    %626 = arith.addf %623, %625 : vector<32x32xf32>
    %627 = arith.negf %626 : vector<32x32xf32>
    %628 = math.exp %627 : vector<32x32xf32>
    %cst_270 = arith.constant 1.000000e+00 : f32
    %629 = vector.broadcast %cst_270 : f32 to vector<32x32xf32>
    %630 = arith.addf %629, %628 : vector<32x32xf32>
    %631 = arith.divf %629, %630 : vector<32x32xf32>
    %632 = arith.mulf %626, %631 : vector<32x32xf32>
    %633 = vector.shape_cast %632 : vector<32x32xf32> to vector<2x16x32xf32>
    %c0_271 = arith.constant 0 : index
    %c0_272 = arith.constant 0 : index
    %c0_273 = arith.constant 0 : index
    %634 = vector.load %arg36[%c0_271, %c0_272, %c0_273] : memref<2x16x32xf32, #tpu.memory_space<vmem>>, vector<2x16x32xf32>
    tpu.vector_store %arg36[%c0_271, %c0_272, %c0_273], %633 {strides = array<i32>} : memref<2x16x32xf32, #tpu.memory_space<vmem>>, vector<2x16x32xf32>,
    return
  }
  func.func @transform_0(%arg0: i32) -> (i32, i32, i32) {
    %c0_i32 = arith.constant 0 : i32
    %c0_i32_0 = arith.constant 0 : i32
    %c0_i32_1 = arith.constant 0 : i32
    return %arg0, %c0_i32, %c0_i32_0 : i32, i32, i32
  }
  func.func @transform_1(%arg0: i32) -> (i32, i32, i32) {
    %c0_i32 = arith.constant 0 : i32
    %c0_i32_0 = arith.constant 0 : i32
    %c0_i32_1 = arith.constant 0 : i32
    %c0_i32_2 = arith.constant 0 : i32
    return %c0_i32, %c0_i32_0, %c0_i32_1 : i32, i32, i32
  }
  func.func @transform_2(%arg0: i32) -> (i32, i32) {
    %c0_i32 = arith.constant 0 : i32
    %c0_i32_0 = arith.constant 0 : i32
    %c0_i32_1 = arith.constant 0 : i32
    return %c0_i32, %c0_i32_0 : i32, i32
  }
  func.func @transform_3(%arg0: i32) -> (i32, i32) {
    %c0_i32 = arith.constant 0 : i32
    %c0_i32_0 = arith.constant 0 : i32
    %c0_i32_1 = arith.constant 0 : i32
    return %c0_i32, %c0_i32_0 : i32, i32
  }
  func.func @transform_4(%arg0: i32) -> (i32, i32) {
    %c0_i32 = arith.constant 0 : i32
    %c0_i32_0 = arith.constant 0 : i32
    %c0_i32_1 = arith.constant 0 : i32
    return %c0_i32, %c0_i32_0 : i32, i32
  }
  func.func @transform_5(%arg0: i32) -> (i32, i32) {
    %c0_i32 = arith.constant 0 : i32
    %c0_i32_0 = arith.constant 0 : i32
    %c0_i32_1 = arith.constant 0 : i32
    return %c0_i32, %c0_i32_0 : i32, i32
  }
  func.func @transform_6(%arg0: i32) -> (i32, i32) {
    %c0_i32 = arith.constant 0 : i32
    %c0_i32_0 = arith.constant 0 : i32
    %c0_i32_1 = arith.constant 0 : i32
    return %c0_i32, %c0_i32_0 : i32, i32
  }
  func.func @transform_7(%arg0: i32) -> (i32, i32, i32) {
    %c0_i32 = arith.constant 0 : i32
    %c0_i32_0 = arith.constant 0 : i32
    %c0_i32_1 = arith.constant 0 : i32
    %c0_i32_2 = arith.constant 0 : i32
    return %c0_i32, %c0_i32_0, %c0_i32_1 : i32, i32, i32
  }
  func.func @transform_8(%arg0: i32) -> (i32, i32, i32) {
    %c0_i32 = arith.constant 0 : i32
    %c0_i32_0 = arith.constant 0 : i32
    %c0_i32_1 = arith.constant 0 : i32
    %c0_i32_2 = arith.constant 0 : i32
    return %c0_i32, %c0_i32_0, %c0_i32_1 : i32, i32, i32
  }
  func.func @transform_9(%arg0: i32) -> (i32, i32, i32) {
    %c0_i32 = arith.constant 0 : i32
    %c0_i32_0 = arith.constant 0 : i32
    %c0_i32_1 = arith.constant 0 : i32
    %c0_i32_2 = arith.constant 0 : i32
    return %c0_i32, %c0_i32_0, %c0_i32_1 : i32, i32, i32
  }
  func.func @transform_10(%arg0: i32) -> (i32, i32, i32) {
    %c0_i32 = arith.constant 0 : i32
    %c0_i32_0 = arith.constant 0 : i32
    %c0_i32_1 = arith.constant 0 : i32
    %c0_i32_2 = arith.constant 0 : i32
    return %c0_i32, %c0_i32_0, %c0_i32_1 : i32, i32, i32
  }
  func.func @transform_11(%arg0: i32) -> (i32, i32, i32) {
    %c0_i32 = arith.constant 0 : i32
    %c0_i32_0 = arith.constant 0 : i32
    %c0_i32_1 = arith.constant 0 : i32
    %c0_i32_2 = arith.constant 0 : i32
    return %c0_i32, %c0_i32_0, %c0_i32_1 : i32, i32, i32
  }
  func.func @transform_12(%arg0: i32) -> (i32, i32, i32) {
    %c0_i32 = arith.constant 0 : i32
    %c0_i32_0 = arith.constant 0 : i32
    %c0_i32_1 = arith.constant 0 : i32
    %c0_i32_2 = arith.constant 0 : i32
    return %c0_i32, %c0_i32_0, %c0_i32_1 : i32, i32, i32
  }
  func.func @transform_13(%arg0: i32) -> (i32, i32, i32) {
    %c0_i32 = arith.constant 0 : i32
    %c0_i32_0 = arith.constant 0 : i32
    %c0_i32_1 = arith.constant 0 : i32
    %c0_i32_2 = arith.constant 0 : i32
    return %c0_i32, %c0_i32_0, %c0_i32_1 : i32, i32, i32
  }
  func.func @transform_14(%arg0: i32) -> (i32, i32, i32) {
    %c0_i32 = arith.constant 0 : i32
    %c0_i32_0 = arith.constant 0 : i32
    %c0_i32_1 = arith.constant 0 : i32
    %c0_i32_2 = arith.constant 0 : i32
    return %c0_i32, %c0_i32_0, %c0_i32_1 : i32, i32, i32
  }
  func.func @transform_15(%arg0: i32) -> (i32, i32, i32) {
    %c0_i32 = arith.constant 0 : i32
    %c0_i32_0 = arith.constant 0 : i32
    %c0_i32_1 = arith.constant 0 : i32
    %c0_i32_2 = arith.constant 0 : i32
    return %c0_i32, %c0_i32_0, %c0_i32_1 : i32, i32, i32
  }
  func.func @transform_16(%arg0: i32) -> (i32, i32, i32) {
    %c0_i32 = arith.constant 0 : i32
    %c0_i32_0 = arith.constant 0 : i32
    %c0_i32_1 = arith.constant 0 : i32
    %c0_i32_2 = arith.constant 0 : i32
    return %c0_i32, %c0_i32_0, %c0_i32_1 : i32, i32, i32
  }
  func.func @transform_17(%arg0: i32) -> (i32, i32, i32) {
    %c0_i32 = arith.constant 0 : i32
    %c0_i32_0 = arith.constant 0 : i32
    %c0_i32_1 = arith.constant 0 : i32
    %c0_i32_2 = arith.constant 0 : i32
    return %c0_i32, %c0_i32_0, %c0_i32_1 : i32, i32, i32
  }
  func.func @transform_18(%arg0: i32) -> (i32, i32, i32) {
    %c0_i32 = arith.constant 0 : i32
    %c0_i32_0 = arith.constant 0 : i32
    %c0_i32_1 = arith.constant 0 : i32
    %c0_i32_2 = arith.constant 0 : i32
    return %c0_i32, %c0_i32_0, %c0_i32_1 : i32, i32, i32
  }
  func.func @transform_19(%arg0: i32) -> (i32, i32, i32) {
    %c0_i32 = arith.constant 0 : i32
    %c0_i32_0 = arith.constant 0 : i32
    %c0_i32_1 = arith.constant 0 : i32
    %c0_i32_2 = arith.constant 0 : i32
    return %c0_i32, %c0_i32_0, %c0_i32_1 : i32, i32, i32
  }
  func.func @transform_20(%arg0: i32) -> (i32, i32, i32) {
    %c0_i32 = arith.constant 0 : i32
    %c0_i32_0 = arith.constant 0 : i32
    %c0_i32_1 = arith.constant 0 : i32
    %c0_i32_2 = arith.constant 0 : i32
    return %c0_i32, %c0_i32_0, %c0_i32_1 : i32, i32, i32
  }
  func.func @transform_21(%arg0: i32) -> (i32, i32, i32) {
    %c0_i32 = arith.constant 0 : i32
    %c0_i32_0 = arith.constant 0 : i32
    %c0_i32_1 = arith.constant 0 : i32
    %c0_i32_2 = arith.constant 0 : i32
    return %c0_i32, %c0_i32_0, %c0_i32_1 : i32, i32, i32
  }
  func.func @transform_22(%arg0: i32) -> (i32, i32, i32) {
    %c0_i32 = arith.constant 0 : i32
    %c0_i32_0 = arith.constant 0 : i32
    %c0_i32_1 = arith.constant 0 : i32
    %c0_i32_2 = arith.constant 0 : i32
    return %c0_i32, %c0_i32_0, %c0_i32_1 : i32, i32, i32
  }
  func.func @transform_23(%arg0: i32) -> (i32, i32) {
    %c0_i32 = arith.constant 0 : i32
    %c0_i32_0 = arith.constant 0 : i32
    %c0_i32_1 = arith.constant 0 : i32
    return %c0_i32, %c0_i32_0 : i32, i32
  }
  func.func @transform_24(%arg0: i32) -> (i32, i32) {
    %c0_i32 = arith.constant 0 : i32
    %c0_i32_0 = arith.constant 0 : i32
    %c0_i32_1 = arith.constant 0 : i32
    return %c0_i32, %c0_i32_0 : i32, i32
  }
  func.func @transform_25(%arg0: i32) -> (i32, i32) {
    %c0_i32 = arith.constant 0 : i32
    %c0_i32_0 = arith.constant 0 : i32
    %c0_i32_1 = arith.constant 0 : i32
    return %c0_i32, %c0_i32_0 : i32, i32
  }
  func.func @transform_26(%arg0: i32) -> (i32, i32) {
    %c0_i32 = arith.constant 0 : i32
    %c0_i32_0 = arith.constant 0 : i32
    %c0_i32_1 = arith.constant 0 : i32
    return %c0_i32, %c0_i32_0 : i32, i32
  }
  func.func @transform_27(%arg0: i32) -> (i32, i32) {
    %c0_i32 = arith.constant 0 : i32
    %c0_i32_0 = arith.constant 0 : i32
    %c0_i32_1 = arith.constant 0 : i32
    return %c0_i32, %c0_i32_0 : i32, i32
  }
  func.func @transform_28(%arg0: i32) -> (i32, i32, i32) {
    %c0_i32 = arith.constant 0 : i32
    %c0_i32_0 = arith.constant 0 : i32
    %c0_i32_1 = arith.constant 0 : i32
    %c0_i32_2 = arith.constant 0 : i32
    return %c0_i32, %c0_i32_0, %c0_i32_1 : i32, i32, i32
  }
  func.func @transform_29(%arg0: i32) -> (i32, i32, i32) {
    %c0_i32 = arith.constant 0 : i32
    %c0_i32_0 = arith.constant 0 : i32
    %c0_i32_1 = arith.constant 0 : i32
    %c0_i32_2 = arith.constant 0 : i32
    return %c0_i32, %c0_i32_0, %c0_i32_1 : i32, i32, i32
  }
  func.func @transform_30(%arg0: i32) -> (i32, i32) {
    %c0_i32 = arith.constant 0 : i32
    %c0_i32_0 = arith.constant 0 : i32
    %c0_i32_1 = arith.constant 0 : i32
    return %c0_i32, %c0_i32_0 : i32, i32
  }
  func.func @transform_31(%arg0: i32) -> (i32, i32) {
    %c0_i32 = arith.constant 0 : i32
    %c0_i32_0 = arith.constant 0 : i32
    %c0_i32_1 = arith.constant 0 : i32
    return %c0_i32, %c0_i32_0 : i32, i32
  }
  func.func @transform_32(%arg0: i32) -> (i32, i32) {
    %c0_i32 = arith.constant 0 : i32
    %c0_i32_0 = arith.constant 0 : i32
    %c0_i32_1 = arith.constant 0 : i32
    return %c0_i32, %c0_i32_0 : i32, i32
  }
  func.func @transform_33(%arg0: i32) -> (i32, i32) {
    %c0_i32 = arith.constant 0 : i32
    %c0_i32_0 = arith.constant 0 : i32
    %c0_i32_1 = arith.constant 0 : i32
    return %c0_i32, %c0_i32_0 : i32, i32
  }
  func.func @transform_34(%arg0: i32) -> (i32, i32) {
    %c0_i32 = arith.constant 0 : i32
    %c0_i32_0 = arith.constant 0 : i32
    %c0_i32_1 = arith.constant 0 : i32
    return %c0_i32, %c0_i32_0 : i32, i32
  }
  func.func @transform_35(%arg0: i32) -> (i32, i32, i32) {
    %c0_i32 = arith.constant 0 : i32
    %c0_i32_0 = arith.constant 0 : i32
    %c0_i32_1 = arith.constant 0 : i32
    return %arg0, %c0_i32, %c0_i32_0 : i32, i32, i32
  }
}

</mosaic_0001>

<bundles_post_ra>
// kernel: sequence_encoder_forward.1
= control target key start
LH: loop header
LB: loop body
LE: loop exit
PB: predicated region body
PF: predicated region fallthrough
CT: control target
= control target key end

     0   :  { %s6215_s6 = smov 1   ;;  %s6216_s10 = smov 2   ;;  %s7224_s0 = inlined_call_operand.smem [shape: u32[36], index: -1, kind: input, shape index: {}] }
   0x1   :  { %s6268_s5 = sld [smem:[%s7224_s0]]   ;;  %s6217_s14 = smov 3  }
   0x2   :  { %s6273_s9 = sld [smem:[%s7224_s0 + %s6215_s6]]   ;;  %s6218_s18 = smov 4  }
   0x3   :  { %s6278_s13 = sld [smem:[%s7224_s0 + %s6216_s10]]   ;;  %s6219_s22 = smov 5  }
   0x4   :  { %s6283_s17 = sld [smem:[%s7224_s0 + %s6217_s14]]   ;;  %s6220_s26 = smov 6  }
   0x5   :  { %s6288_s21 = sld [smem:[%s7224_s0 + %s6218_s18]]   ;;  %s6221_s30 = smov 7  }
   0x6   :  { %s6293_s25 = sld [smem:[%s7224_s0 + %s6219_s22]]   ;;  %s6222_s4 = smov 8  }
   0x7   :  { %s6298_s29 = sld [smem:[%s7224_s0 + %s6220_s26]]   ;;  %s6223_s10 = smov 9  }
   0x8   :  { %s6303_s3 = sld [smem:[%s7224_s0 + %s6221_s30]]   ;;  %s6224_s15 = smov 10  }
   0x9   :  { %s6308_s8 = sld [smem:[%s7224_s0 + %s6222_s4]]   ;;  %s6225_s20 = smov 11  }
   0xa   :  { %s6313_s14 = sld [smem:[%s7224_s0 + %s6223_s10]]   ;;  %s6226_s26 = smov 12  }
   0xb   :  { %s6318_s19 = sld [smem:[%s7224_s0 + %s6224_s15]]   ;;  %s6227_s1 = smov 13  }
   0xc   :  { %s6323_s24 = sld [smem:[%s7224_s0 + %s6225_s20]]   ;;  %s6228_s7 = smov 14  }
   0xd   :  { %s6328_s30 = sld [smem:[%s7224_s0 + %s6226_s26]]   ;;  %s6229_s15 = smov 15  }
   0xe   :  { %s6333_s6 = sld [smem:[%s7224_s0 + %s6227_s1]]   ;;  %s6230_s22 = smov 16  }
   0xf   :  { %s6338_s12 = sld [smem:[%s7224_s0 + %s6228_s7]]   ;;  %s6231_s28 = smov 17  }
  0x10   :  { %s6343_s20 = sld [smem:[%s7224_s0 + %s6229_s15]]   ;;  %s6232_s7 = smov 18  }
  0x11   :  { %s6348_s27 = sld [smem:[%s7224_s0 + %s6230_s22]]   ;;  %s6233_s15 = smov 19  }
  0x12   :  { %s6353_s4 = sld [smem:[%s7224_s0 + %s6231_s28]]   ;;  %s6234_s22 = smov 20  }
  0x13   :  { %s6235_s28 = smov 21  }
  0x15   :  { %7237 = sst [smem:[#allocation5_spill]] %s6338_s12 }
  0x16   :  { %7238 = sst [smem:[#allocation6_spill]] %s6343_s20 }
  0x17   :  { %7239 = sst [smem:[#allocation7_spill]] %s6348_s27 }
  0x18   :  { %7240 = sst [smem:[#allocation8_spill]] %s6353_s4 }
  0x19   :  { %s6358_s12 = sld [smem:[%s7224_s0 + %s6232_s7]]   ;;  %s6236_s7 = smov 22  }
  0x1a   :  { %s6363_s20 = sld [smem:[%s7224_s0 + %s6233_s15]]   ;;  %s6237_s15 = smov 23  }
  0x1b   :  { %s6368_s27 = sld [smem:[%s7224_s0 + %s6234_s22]]   ;;  %s6238_s22 = smov 24  }
  0x1c   :  { %s6373_s4 = sld [smem:[%s7224_s0 + %s6235_s28]]   ;;  %s6239_s28 = smov 25  }
  0x1f   :  { %7241 = sst [smem:[#allocation9_spill]] %s6358_s12 }
  0x20   :  { %7242 = sst [smem:[#allocation10_spill]] %s6363_s20 }
  0x21   :  { %7243 = sst [smem:[#allocation11_spill]] %s6368_s27 }
  0x22   :  { %7244 = sst [smem:[#allocation12_spill]] %s6373_s4 }
  0x23   :  { %s6378_s12 = sld [smem:[%s7224_s0 + %s6236_s7]]   ;;  %s6240_s7 = smov 26  }
  0x24   :  { %s6383_s20 = sld [smem:[%s7224_s0 + %s6237_s15]]   ;;  %s6241_s15 = smov 27  }
  0x25   :  { %s6388_s27 = sld [smem:[%s7224_s0 + %s6238_s22]]   ;;  %s6242_s22 = smov 28  }
  0x26   :  { %s6393_s4 = sld [smem:[%s7224_s0 + %s6239_s28]]   ;;  %s6243_s28 = smov 29  }
  0x29   :  { %7245 = sst [smem:[#allocation13_spill]] %s6378_s12 }
  0x2a   :  { %7246 = sst [smem:[#allocation14_spill]] %s6383_s20 }
  0x2b   :  { %7247 = sst [smem:[#allocation15_spill]] %s6388_s27 }
  0x2c   :  { %7248 = sst [smem:[#allocation16_spill]] %s6393_s4 }
  0x2d   :  { %s6398_s12 = sld [smem:[%s7224_s0 + %s6240_s7]]   ;;  %s6244_s7 = smov 30  }
  0x2e   :  { %s6403_s20 = sld [smem:[%s7224_s0 + %s6241_s15]]   ;;  %s6245_s15 = smov 31  }
  0x2f   :  { %s6408_s27 = sld [smem:[%s7224_s0 + %s6242_s22]]   ;;  %s6246_s22 = smov 32  }
  0x30   :  { %s6413_s4 = sld [smem:[%s7224_s0 + %s6243_s28]]   ;;  %s6247_s28 = smov 33  }
  0x33   :  { %7249 = sst [smem:[#allocation17_spill]] %s6398_s12 }
  0x34   :  { %7250 = sst [smem:[#allocation18_spill]] %s6403_s20 }
  0x35   :  { %7251 = sst [smem:[#allocation19_spill]] %s6408_s27 }
  0x36   :  { %7252 = sst [smem:[#allocation20_spill]] %s6413_s4 }
  0x37   :  { %s6418_s12 = sld [smem:[%s7224_s0 + %s6244_s7]]   ;;  %s6248_s7 = smov 34  }
  0x38   :  { %s6423_s20 = sld [smem:[%s7224_s0 + %s6245_s15]]   ;;  %s6249_s15 = smov 35  }
  0x39   :  { %s6428_s27 = sld [smem:[%s7224_s0 + %s6246_s22]]  }
  0x3a   :  { %s6433_s4 = sld [smem:[%s7224_s0 + %s6247_s28]]  }
  0x3d   :  { %7253 = sst [smem:[#allocation21_spill]] %s6418_s12 }
  0x3e   :  { %7254 = sst [smem:[#allocation22_spill]] %s6423_s20 }
  0x3f   :  { %s6438_s12 = sld [smem:[%s7224_s0 + %s6248_s7]]  }
  0x40   :  { %s6443_s20 = sld [smem:[%s7224_s0 + %s6249_s15]]  }
  0x41   :  { %v5863_v0 = vld [vmem:[%s6273_s9 + $0x10] sm:$0xff]   ;;  %v152_v1 = vlaneseq  ;;  %v5864_v2 = vld [vmem:[%s6273_s9 + $0x18] sm:$0xff]   ;;  %v148_v3 = vld [vmem:[%s6268_s5] sm:$0xff]  ;;  %vm280_vm0 = vcmask 261120  }
  0x42   :  { %5340 = vmatprep.subr.bf16.mxu0 %v5863_v0  ;;  %v149_v4 = vld [vmem:[%s6268_s5 + $0x8] sm:$0xff]  ;;  %v209_v6 = vrot.slane %v148_v3, 7  ;;  %v234_v8 = vrot.slane %v148_v3, 1  ;;  %v150_v9 = vld [vmem:[%s6268_s5 + $0x10] sm:$0xff]  ;;  %v151_v10 = vld [vmem:[%s6268_s5 + $0x18] sm:$0xff] }
  0x43   :  { %v6449_v5 = vshrl.u32 %v152_v1, 7  ;;  %5341 = vmatpush3.bf16.msra.mxu0 %v5863_v0  ;;  %v210_v7 = vrot.slane %v149_v4, 7  ;;  %v235_v11 = vrot.slane %v149_v4, 1  ;;  %v6453_v12 = vpack.c.bf16 %v149_v4, %v148_v3  ;;  %v5865_v15 = vld [vmem:[%s6273_s9] sm:$0xff]   ;;  %v5866_v24 = vld [vmem:[%s6273_s9 + $0x8] sm:$0xff]  }
  0x44   :  { %5342 = vmatprep.subr.bf16.mxu0 %v5864_v2  ;;  %v211_v13 = vrot.slane %v150_v9, 7  ;;  %v212_v14 = vrot.slane %v151_v10, 7  ;;  %v236_v16 = vrot.slane %v150_v9, 1  ;;  %v6459_v18 = vpack.c.bf16 %v151_v10, %v150_v9  ;;  %v5867_v36 = vld [vmem:[%s6273_s9 + $0x20] sm:$0xff]   ;;  %v5868_v45 = vld [vmem:[%s6273_s9 + $0x28] sm:$0xff]  }
  0x45   :  { %v161_v17 = vand.u32 15, %v6449_v5  ;;  %5344 = vmatprep.mubr.msk.bf16.mxu0 %vm280_vm0, %v6453_v12  ;;  %vm213_vm1 = vcmp.lt.s32.totalorder %v6449_v5, 1  ;;  %v155_v19 = vadd.s32 16, %v6449_v5  ;;  %v237_v20 = vrot.slane %v151_v10, 1 }
  0x46   :  { %v216_v22 = vsel %vm213_vm1, %v209_v6, %v210_v7  ;;  %v217_v23 = vsel %vm213_vm1, %v212_v14, %v209_v6  ;;  %v154_v27 = vadd.s32 8, %v6449_v5  ;;  %vm238_vm3 = vcmp.lt.s32.totalorder %v6449_v5, 7 }
  0x47   :  { %5343 = vmatpush3.bf16.msra.mxu0 %v5864_v2  ;;  %vm6463_vm2 = vcmp.eq.s32.totalorder %v161_v17, 0  ;;  %v175_v26 = vand.u32 15, %v155_v19  ;;  %v156_v29 = vadd.s32 24, %v6449_v5  ;;  %v215_v31 = vsel %vm213_vm1, %v210_v7, %v211_v13 }
  0x48   :  { %5348 = vmatprep.subr.bf16.mxu0 %v5865_v15  ;;  %v226_v25 = vsel %vm6463_vm2, 0.0, %v217_v23  ;;  %v168_v32 = vand.u32 15, %v154_v27  ;;  %v240_v33 = vsel %vm238_vm3, %v235_v11, %v236_v16  ;;  %v242_v35 = vsel %vm238_vm3, %v237_v20, %v234_v8 }
  0x49   :  { %v6475_v28 = vpack.c.bf16 %v216_v22, %v226_v25  ;;  %vm6481_vm4 = vcmp.eq.s32.totalorder %v175_v26, 0  ;;  %v182_v34 = vand.u32 15, %v156_v29  ;;  %v214_v42 = vsel %vm213_vm1, %v211_v13, %v212_v14 }
  0x4a   :  { %5345 = vmatmul.mubr.msk.bf16.vlgmr.msra.gmra.mrb[0].mxu0 %vm280_vm0, %v6459_v18  ;;  %vm6494_vm5 = vcmp.eq.s32.totalorder %v168_v32, 15  ;;  %v228_v38 = vsel %vm6481_vm4, 0.0, %v215_v31  ;;  %v241_v43 = vsel %vm238_vm3, %v234_v8, %v235_v11  ;;  %v239_v47 = vsel %vm238_vm3, %v236_v16, %v237_v20 }
  0x4b   :  { %5349 = vmatpush3.bf16.msra.mxu0 %v5865_v15  ;;  %5352 = vmatprep.mubr.msk.bf16.mxu0 %vm280_vm0, %v6475_v28  ;;  %vm6500_vm6 = vcmp.eq.s32.totalorder %v182_v34, 15  ;;  %v252_v40 = vsel %vm6494_vm5, 0.0, %v240_v33  ;;  %v6512_v44 = vpack.c.bf16 %v214_v42, %v228_v38 }
  0x4c   :  { %5350 = vmatprep.subr.bf16.mxu0 %v5866_v24  ;;  %v254_v41 = vsel %vm6500_vm6, 0.0, %v242_v35  ;;  %v6515_v46 = vpack.c.bf16 %v252_v40, %v241_v43 }
  0x4d   :  { %v6523_v48 = vpack.c.bf16 %v254_v41, %v239_v47 }
  0x4f   :  { %5351 = vmatpush3.bf16.msra.mxu0 %v5866_v24 }
  0x50   :  { %5356 = vmatprep.subr.bf16.mxu0 %v5867_v36 }
  0x56   :  { %5353 = vmatmul.mubr.msk.bf16.vlgmr.msra.gmra.mrb[0].mxu0 %vm280_vm0, %v6512_v44 }
  0x57   :  { %5357 = vmatpush3.bf16.msra.mxu0 %v5867_v36  ;;  %5360 = vmatprep.mubr.msk.bf16.mxu0 %vm280_vm0, %v6515_v46 }
  0x58   :  { %5358 = vmatprep.subr.bf16.mxu0 %v5868_v45 }
  0x5b   :  { %5359 = vmatpush3.bf16.msra.mxu0 %v5868_v45 }
  0x62   :  { %5361 = vmatmul.mubr.msk.bf16.vlgmr.msra.gmra.mrb[0].mxu0 %vm280_vm0, %v6523_v48 }
  0x63   :  { %76 = vsyncpa [#allocation3], 0  ;;  %v531_v49 = vld [vmem:[%s6288_s21] sm:$0x3]  ;;  %vm541_vm7 = vcmask 1041408   ;;  %vm534_vm8 = vcmask 31744  }
  0x64   :  { %5756 = vmatprep.subr.msk.bf16.mxu1 %vm541_vm7, %v531_v49  ;;  %v543_v50 = vsel %vm541_vm7, %v531_v49, 0  ;;  %v4948_v51 = vld [vmem:[%s6278_s13] ss:$0 sm:$0xff]  ;;  %vm6251_vm9 = vmmov 0   ;;  %s7263_s0 = sld [smem:[#allocation5_spill]]  ;;  %vm947_vm10 = vcmask 64512  }
  0x65   :  { %5365 = vmatpush3.bf16.msra.mxu1 %v543_v50  ;;  %v4949_v53 = vld [vmem:[%s6283_s17] ss:$0 sm:$0xff]  ;;  %vm1042_vm11 = vcmask 130048   ;;  %s6252_s5 = smov 120   ;;  %s6253_s9 = smov 112   ;;  %vm1967_vm12 = vcmask 195584  }
  0x66   :  { %v4956_v27 = vld [vmem:[%s6293_s25] ss:$0 sm:$0xff]  ;;  %s6254_s13 = smov 104   ;;  %s6255_s17 = smov 8   ;;  %vm2276_vm13 = vcmask 523264  }
  0x67   :  { %v4957_v31 = vld [vmem:[%s6298_s29] ss:$0 sm:$0xff]  ;;  %s6256_s21 = smov 16   ;;  %s7264_s25 = sld [smem:[#allocation6_spill]] }
  0x68   :  { %s6257_s29 = smov 24   ;;  %s7265_s22 = sld [smem:[#allocation7_spill]]  ;;  %v4762_v37 = vld [vmem:[%s6428_s27] sm:$0x3] }
  0x69   :  { %s7266_s23 = sld [smem:[#allocation10_spill]]  ;;  %s7267_s26 = sld [smem:[#allocation8_spill]]  ;;  %v4772_v39 = vsel %vm541_vm7, %v4762_v37, 0 }
  0x6a   :  { %s7268_s28 = sld [smem:[#allocation9_spill]]  ;;  %s7269_s1 = sld [smem:[#allocation12_spill]] }
  0x6b   :  { %s7270_s2 = sld [smem:[#allocation11_spill]]  ;;  %s7271_s7 = sld [smem:[#allocation13_spill]] }
  0x6c   :  { %s7279_s10 = sld [smem:[#allocation21_spill]]  ;;  %s7280_s11 = sld [smem:[#allocation22_spill]] }
 0x135   :  { %v5362_v52 = vpop.f32.mrb[0].mxu0 }
 0x136   :  { %v490_v54 = vmul.f32 %v5362_v52, %v4948_v51  ;;  %v462_v55 = vpop.f32.mrb[1].mxu0 }
 0x137   :  { %v488_v56 = vmul.f32 %v4948_v51, %v462_v55  ;;  %v5363_v57 = vpop.f32.mrb[2].mxu0 }
 0x138   :  { %v501_v58 = vadd.f32 %v4949_v53, %v490_v54  ;;  %v491_v59 = vmul.f32 %v5363_v57, %v4948_v51  ;;  %v465_v60 = vpop.f32.mrb[3].mxu0 }
 0x139   :  { %v499_v61 = vadd.f32 %v4949_v53, %v488_v56  ;;  %v489_v62 = vmul.f32 %v4948_v51, %v465_v60 }
 0x13a   :  { %v4952_v63 = vmul.f32 -1.442695, %v501_v58  ;;  %v502_v0 = vadd.f32 %v4949_v53, %v491_v59 }
 0x13b   :  { %v4950_v1 = vmul.f32 -1.442695, %v499_v61  ;;  %v500_v2 = vadd.f32 %v4949_v53, %v489_v62 }
 0x13c   :  { %5911 = vpow2.f32 %v4952_v63  ;;  %v4953_v3 = vmul.f32 -1.442695, %v502_v0 }
 0x13d   :  { %5913 = vpow2.f32 %v4950_v1  ;;  %v4951_v4 = vmul.f32 -1.442695, %v500_v2 }
 0x13e   :  { %5915 = vpow2.f32 %v4953_v3 }
 0x13f   :  { %5917 = vpow2.f32 %v4951_v4 }
 0x146   :  { %v5912_v6 = vpop.eup %5911 }
 0x147   :  { %v5914_v7 = vpop.eup %5913  ;;  %v517_v8 = vadd.f32 1.0, %v5912_v6 }
 0x148   :  { %v5916_v9 = vpop.eup %5915  ;;  %v515_v10 = vadd.f32 1.0, %v5914_v7 }
 0x149   :  { %v5918_v11 = vpop.eup %5917  ;;  %5919 = vrcp.f32 %v517_v8  ;;  %v518_v13 = vadd.f32 1.0, %v5916_v9 }
 0x14a   :  { %5921 = vrcp.f32 %v515_v10  ;;  %v516_v14 = vadd.f32 1.0, %v5918_v11 }
 0x14b   :  { %5923 = vrcp.f32 %v518_v13 }
 0x14c   :  { %5925 = vrcp.f32 %v516_v14 }
 0x153   :  { %v5920_v15 = vpop.eup %5919 }
 0x154   :  { %v5922_v16 = vpop.eup %5921  ;;  %v529_v20 = vmul.f32 %v5920_v15, %v501_v58 }
 0x155   :  { %v5924_v17 = vpop.eup %5923  ;;  %v527_v23 = vmul.f32 %v5922_v16, %v499_v61 }
 0x156   :  { %v5926_v19 = vpop.eup %5925  ;;  %v530_v22 = vmul.f32 %v5924_v17, %v502_v0 }
 0x157   :  { %v528_v24 = vmul.f32 %v5926_v19, %v500_v2 }
 0x158   :  { %v533_v25 = vpack.c.bf16 %v530_v22, %v529_v20 }
 0x159   :  { %v532_v26 = vpack.c.bf16 %v528_v24, %v527_v23 }
 0x15b   :  { %5366 = vmatprep.mubr.msk.bf16.mxu1 %vm534_vm8, %v532_v26 }
 0x15c   :  { %5367 = vmatmul.mubr.msk.bf16.vlgmr.msra.gmra.mrb[0].mxu1 %vm534_vm8, %v533_v25 }
 0x22f   :  { %v5368_v29 = vpop.f32.mrb[0].mxu1 }
 0x230   :  { %v603_v32 = vmul.f32 %v5368_v29, %v4956_v27  ;;  %v579_v33 = vpop.f32.mrb[1].mxu1 }
 0x231   :  { %v601_v34 = vmul.f32 %v4956_v27, %v579_v33  ;;  %v5369_v35 = vpop.f32.mrb[2].mxu1 }
 0x232   :  { %v614_v36 = vadd.f32 %v4957_v31, %v603_v32  ;;  %v604_v38 = vmul.f32 %v5369_v35, %v4956_v27  ;;  %v582_v40 = vpop.f32.mrb[3].mxu1  ;;  %v5870_v35 = vld [vmem:[%s6313_s14 + $0x8] sm:$0xff]  }
 0x233   :  { %v612_v41 = vadd.f32 %v4957_v31, %v601_v34  ;;  %v602_v42 = vmul.f32 %v4956_v27, %v582_v40  ;;  %v5869_v34 = vld [vmem:[%s6313_s14] sm:$0xff]  }
 0x234   :  { %v4960_v43 = vmul.f32 -1.442695, %v614_v36  ;;  %v615_v45 = vadd.f32 %v4957_v31, %v604_v38  ;;  %5370 = vmatprep.subr.bf16.mxu1 %v5869_v34 }
 0x235   :  { %v4958_v47 = vmul.f32 -1.442695, %v612_v41  ;;  %v613_v49 = vadd.f32 %v4957_v31, %v602_v42  ;;  %5371 = vmatpush3.bf16.msra.mxu1 %v5869_v34 }
 0x236   :  { %5927 = vpow2.f32 %v4960_v43  ;;  %v4961_v50 = vmul.f32 -1.442695, %v615_v45  ;;  %5372 = vmatprep.subr.bf16.mxu1 %v5870_v35 }
 0x237   :  { %5929 = vpow2.f32 %v4958_v47  ;;  %v4959_v51 = vmul.f32 -1.442695, %v613_v49 }
 0x238   :  { %5931 = vpow2.f32 %v4961_v50 }
 0x239   :  { %5933 = vpow2.f32 %v4959_v51  ;;  %5373 = vmatpush3.bf16.msra.mxu1 %v5870_v35 }
 0x240   :  { %v5928_v52 = vpop.eup %5927 }
 0x241   :  { %v5930_v53 = vpop.eup %5929  ;;  %v630_v54 = vadd.f32 1.0, %v5928_v52 }
 0x242   :  { %v5932_v55 = vpop.eup %5931  ;;  %v628_v56 = vadd.f32 1.0, %v5930_v53 }
 0x243   :  { %v5934_v57 = vpop.eup %5933  ;;  %5935 = vrcp.f32 %v630_v54  ;;  %v631_v58 = vadd.f32 1.0, %v5932_v55 }
 0x244   :  { %5937 = vrcp.f32 %v628_v56  ;;  %v629_v59 = vadd.f32 1.0, %v5934_v57  ;;  %v4962_v56 = vld [vmem:[%s6303_s3] ss:$0 sm:$0xff] }
 0x245   :  { %5939 = vrcp.f32 %v631_v58 }
 0x246   :  { %5941 = vrcp.f32 %v629_v59 }
 0x24d   :  { %v5936_v60 = vpop.eup %5935 }
 0x24e   :  { %v5938_v61 = vpop.eup %5937  ;;  %v6536_v62 = vmul.f32 %v5936_v60, %v614_v36  ;;  %v5871_v36 = vld [vmem:[%s6323_s24] sm:$0xff]  }
 0x24f   :  { %v5940_v63 = vpop.eup %5939  ;;  %v6538_v0 = vmul.f32 %v5938_v61, %v612_v41  ;;  %5378 = vmatprep.subr.bf16.mxu1 %v5871_v36 }
 0x250   :  { %v5942_v1 = vpop.eup %5941  ;;  %v6540_v2 = vmul.f32 %v5940_v63, %v615_v45  ;;  %v652_v3 = vsel %vm280_vm0, %v6536_v62, 0.0  ;;  %v4963_v63 = vld [vmem:[%s6308_s8] ss:$0 sm:$0xff] }
 0x251   :  { %v6544_v4 = vmul.f32 %v5942_v1, %v613_v49  ;;  %653 = vadd.xlane.f32.xlu1 %v652_v3  ;;  %v646_v6 = vsel %vm280_vm0, %v6538_v0, 0.0 }
 0x252   :  { %647 = vadd.xlane.f32.xlu0 %v646_v6  ;;  %v655_v7 = vsel %vm280_vm0, %v6540_v2, 0.0 }
 0x253   :  { %v649_v8 = vsel %vm280_vm0, %v6544_v4, 0.0 }
 0x255   :  { %656 = vadd.xlane.f32.xlu1 %v655_v7 }
 0x256   :  { %650 = vadd.xlane.f32.xlu0 %v649_v8 }
 0x2de   :  { %v654_v9 = vpop.xlane.xlu1 %653 }
 0x2df   :  { %v661_v10 = vmul.f32 0.03125, %v654_v9  ;;  %v648_v11 = vpop.xlane.xlu0 %647 }
 0x2e0   :  { %v659_v13 = vmul.f32 0.03125, %v648_v11 }
 0x2e1   :  { %v665_v14 = vsub.f32 %v6536_v62, %v661_v10 }
 0x2e2   :  { %v663_v15 = vsub.f32 %v6538_v0, %v659_v13  ;;  %v657_v16 = vpop.xlane.xlu1 %656 }
 0x2e3   :  { %v662_v17 = vmul.f32 0.03125, %v657_v16  ;;  %v651_v19 = vpop.xlane.xlu0 %650  ;;  %v669_v26 = vmul.f32 %v665_v14, %v665_v14 }
 0x2e4   :  { %v660_v20 = vmul.f32 0.03125, %v651_v19  ;;  %v667_v22 = vmul.f32 %v663_v15, %v663_v15  ;;  %v5874_v19 = vld [vmem:[%s6333_s6 + $0x8] sm:$0xff]  }
 0x2e5   :  { %v666_v23 = vsub.f32 %v6540_v2, %v662_v17  ;;  %v677_v29 = vsel %vm280_vm0, %v669_v26, 0.0  ;;  %v5872_v17 = vld [vmem:[%s6323_s24 + $0x8] sm:$0xff]  }
 0x2e6   :  { %v664_v24 = vsub.f32 %v6544_v4, %v660_v20  ;;  %v671_v25 = vsel %vm280_vm0, %v667_v22, 0.0  ;;  %v6250_v20 = vmov 0.0  }
 0x2e7   :  { %672 = vadd.xlane.f32.xlu0 %v671_v25  ;;  %v670_v32 = vmul.f32 %v666_v23, %v666_v23  ;;  %5394 = vmatprep.subr.bf16.mxu0 %v6250_v20 }
 0x2e8   :  { %v668_v27 = vmul.f32 %v664_v24, %v664_v24  ;;  %5396 = vmatprep.mubr.msk.bf16.mxu0 %vm6251_vm9, %v6250_v20 }
 0x2e9   :  { %v680_v33 = vsel %vm280_vm0, %v670_v32, 0.0 }
 0x2ea   :  { %v674_v31 = vsel %vm280_vm0, %v668_v27, 0.0 }
 0x2eb   :  { %678 = vadd.xlane.f32.xlu0 %v677_v29  ;;  %675 = vadd.xlane.f32.xlu1 %v674_v31 }
 0x2ef   :  { %681 = vadd.xlane.f32.xlu1 %v680_v33 }
 0x374   :  { %v673_v38 = vpop.xlane.xlu0 %672 }
 0x375   :  { %v683_v40 = vmul.f32 0.03125, %v673_v38 }
 0x377   :  { %v687_v41 = vadd.f32 1e-05, %v683_v40 }
 0x378   :  { %v676_v42 = vpop.xlane.xlu1 %675  ;;  %v679_v43 = vpop.xlane.xlu0 %678 }
 0x379   :  { %5943 = vrsqrt.f32 %v687_v41  ;;  %v684_v45 = vmul.f32 0.03125, %v676_v42  ;;  %v685_v47 = vmul.f32 0.03125, %v679_v43 }
 0x37b   :  { %v688_v49 = vadd.f32 1e-05, %v684_v45  ;;  %v689_v50 = vadd.f32 1e-05, %v685_v47 }
 0x37c   :  { %v682_v51 = vpop.xlane.xlu1 %681 }
 0x37d   :  { %5945 = vrsqrt.f32 %v688_v49  ;;  %v686_v52 = vmul.f32 0.03125, %v682_v51 }
 0x37e   :  { %5947 = vrsqrt.f32 %v689_v50 }
 0x37f   :  { %v690_v53 = vadd.f32 1e-05, %v686_v52 }
 0x381   :  { %5949 = vrsqrt.f32 %v690_v53  ;;  %v4974_v53 = vld [vmem:[%s7263_s0] ss:$0 sm:$0xff] }
 0x383   :  { %v5944_v54 = vpop.eup %5943 }
 0x384   :  { %v695_v55 = vmul.f32 %v5944_v54, %v663_v15 }
 0x386   :  { %v705_v60 = vmul.f32 %v4962_v56, %v695_v55 }
 0x387   :  { %v5946_v57 = vpop.eup %5945 }
 0x388   :  { %v5948_v58 = vpop.eup %5947  ;;  %v696_v59 = vmul.f32 %v5946_v57, %v664_v24  ;;  %v715_v7 = vadd.f32 %v4963_v63, %v705_v60 }
 0x389   :  { %v697_v61 = vmul.f32 %v5948_v58, %v665_v14  ;;  %v5873_v14 = vld [vmem:[%s6333_s6] sm:$0xff]  }
 0x38a   :  { %v706_v1 = vmul.f32 %v4962_v56, %v696_v59 }
 0x38b   :  { %v5950_v3 = vpop.eup %5949  ;;  %v707_v9 = vmul.f32 %v4962_v56, %v697_v61 }
 0x38c   :  { %v698_v6 = vmul.f32 %v5950_v3, %v666_v23  ;;  %v716_v8 = vadd.f32 %v4963_v63, %v706_v1  ;;  %v4964_v23 = vld [vmem:[%s6318_s19] ss:$0 sm:$0xff] }
 0x38d   :  { %v717_v13 = vadd.f32 %v4963_v63, %v707_v9 }
 0x38e   :  { %v723_v10 = vpack.c.bf16 %v716_v8, %v715_v7  ;;  %v708_v11 = vmul.f32 %v4962_v56, %v698_v6 }
 0x390   :  { %5374 = vmatprep.mubr.msk.bf16.mxu1 %vm280_vm0, %v723_v10  ;;  %v718_v15 = vadd.f32 %v4963_v63, %v708_v11 }
 0x392   :  { %v724_v16 = vpack.c.bf16 %v718_v15, %v717_v13 }
 0x394   :  { %5375 = vmatmul.mubr.msk.bf16.vlgmr.msra.gmra.mrb[4].mxu1 %vm280_vm0, %v724_v16 }
 0x395   :  { %5379 = vmatpush3.bf16.msra.mxu1 %v5871_v36  ;;  %5382 = vmatprep.mubr.msk.bf16.mxu1 %vm280_vm0, %v723_v10  ;;  %v4969_v36 = vld [vmem:[%s6328_s30] ss:$0 sm:$0xff] }
 0x396   :  { %5380 = vmatprep.subr.bf16.mxu1 %v5872_v17 }
 0x399   :  { %5381 = vmatpush3.bf16.msra.mxu1 %v5872_v17 }
 0x39a   :  { %5386 = vmatprep.subr.bf16.mxu1 %v5873_v14 }
 0x39c   :  { %5383 = vmatmul.mubr.msk.bf16.vlgmr.msra.gmra.mrb[8].mxu1 %vm280_vm0, %v724_v16 }
 0x39d   :  { %5387 = vmatpush3.bf16.msra.mxu1 %v5873_v14  ;;  %5390 = vmatprep.mubr.msk.bf16.mxu1 %vm280_vm0, %v723_v10 }
 0x39e   :  { %5388 = vmatprep.subr.bf16.mxu1 %v5874_v19 }
 0x3a1   :  { %5389 = vmatpush3.bf16.msra.mxu1 %v5874_v19 }
 0x3a2   :  { %5400 = vmatprep.subr.bf16.mxu1 %v6250_v20 }
 0x3a4   :  { %5391 = vmatmul.mubr.msk.bf16.vlgmr.msra.gmra.mrb[12].mxu1 %vm280_vm0, %v724_v16 }
 0x3a5   :  { %5402 = vmatprep.mubr.msk.bf16.mxu1 %vm6251_vm9, %v6250_v20 }
 0x467   :  { %v5376_v22 = vpop.f32.mrb[4].mxu1 }
 0x468   :  { %v784_v24 = vpop.f32.mrb[5].mxu1  ;;  %v793_v26 = vadd.f32 %v5376_v22, %v4964_v23 }
 0x469   :  { %v5377_v25 = vpop.f32.mrb[6].mxu1  ;;  %v785_v31 = vadd.f32 %v4964_v23, %v784_v24 }
 0x46a   :  { %v796_v27 = vadd.f32 %v5377_v25, %v4964_v23  ;;  %v787_v29 = vpop.f32.mrb[7].mxu1 }
 0x46b   :  { %v788_v32 = vadd.f32 %v4964_v23, %v787_v29 }
 0x46c   :  { %v6581_v33 = vpack.c.bf16 %v796_v27, %v793_v26 }
 0x46d   :  { %v6583_v34 = vpack.c.bf16 %v788_v32, %v785_v31 }
 0x46f   :  { %v5384_v35 = vpop.f32.mrb[8].mxu1 }
 0x470   :  { %v856_v38 = vpop.f32.mrb[9].mxu1  ;;  %v865_v41 = vadd.f32 %v5384_v35, %v4969_v36 }
 0x471   :  { %v5385_v40 = vpop.f32.mrb[10].mxu1  ;;  %v857_v45 = vadd.f32 %v4969_v36, %v856_v38 }
 0x472   :  { %v868_v42 = vadd.f32 %v5385_v40, %v4969_v36  ;;  %v859_v43 = vpop.f32.mrb[11].mxu1 }
 0x473   :  { %v860_v47 = vadd.f32 %v4969_v36, %v859_v43 }
 0x474   :  { %v6586_v49 = vpack.c.bf16 %v868_v42, %v865_v41 }
 0x475   :  { %v6588_v50 = vpack.c.bf16 %v860_v47, %v857_v45 }
 0x476   :  { %v999_v51 = vsel %vm947_vm10, %v6586_v49, 0 }
 0x477   :  { %v5392_v52 = vpop.f32.mrb[12].mxu1  ;;  %5401 = vmatpush3.bf16.xpose.msra.mxu1 %v999_v51  ;;  %v952_v54 = vsel %vm947_vm10, %v6588_v50, 0 }
 0x478   :  { %v928_v55 = vpop.f32.mrb[13].mxu1  ;;  %5395 = vmatpush3.bf16.xpose.msra.mxu0 %v952_v54  ;;  %5412 = vmatprep.subr.bf16.mxu1 %v6250_v20  ;;  %v937_v57 = vadd.f32 %v5392_v52, %v4974_v53 }
 0x479   :  { %v5393_v56 = vpop.f32.mrb[14].mxu1  ;;  %5406 = vmatprep.subr.bf16.mxu0 %v6250_v20  ;;  %v929_v60 = vadd.f32 %v4974_v53, %v928_v55 }
 0x47a   :  { %v940_v58 = vadd.f32 %v5393_v56, %v4974_v53  ;;  %v931_v59 = vpop.f32.mrb[15].mxu1 }
 0x47b   :  { %v932_v61 = vadd.f32 %v4974_v53, %v931_v59 }
 0x47c   :  { %v6597_v63 = vpack.c.bf16 %v940_v58, %v937_v57 }
 0x47d   :  { %v6599_v1 = vpack.c.bf16 %v932_v61, %v929_v60 }
 0x47e   :  { %5403 = vmatmul.mubr.msk.bf16.vlgmr.msra.gmra.mrb[16].mxu1 %vm947_vm10, %v6581_v33 }
 0x47f   :  { %5397 = vmatmul.mubr.msk.bf16.vlgmr.msra.gmra.mrb[4].mxu0 %vm947_vm10, %v6583_v34  ;;  %5413 = vmatpush3.bf16.msra.mxu1 %v6597_v63 }
 0x480   :  { %5407 = vmatpush3.bf16.msra.mxu0 %v6599_v1  ;;  %5414 = vmatprep.mubr.msk.bf16.mxu1 %vm6251_vm9, %v6250_v20 }
 0x481   :  { %5424 = vmatprep.subr.bf16.mxu1 %v6250_v20  ;;  %5408 = vmatprep.mubr.msk.bf16.mxu0 %vm6251_vm9, %v6250_v20 }
 0x482   :  { %5418 = vmatprep.subr.bf16.mxu0 %v6250_v20 }
 0x551   :  { %v1035_v3 = vpop.f32.mrb[16].mxu1 }
 0x552   :  { %v988_v6 = vpop.f32.mrb[4].mxu0  ;;  %v5404_v7 = vpop.f32.mrb[17].mxu1  ;;  %v1049_v17 = vsel %vm1042_vm11, %v1035_v3, -inf }
 0x553   :  { %v5398_v8 = vpop.f32.mrb[5].mxu0  ;;  %v1038_v9 = vpop.f32.mrb[18].mxu1  ;;  %v1043_v10 = vsel %vm1042_vm11, %v988_v6, -inf }
 0x554   :  { %v5405_v11 = vpop.f32.mrb[19].mxu1  ;;  %1044 = vmax.xlane.f32.xlu0 %v1043_v10  ;;  %v991_v13 = vpop.f32.mrb[6].mxu0  ;;  %v1052_v14 = vsel %vm1042_vm11, %v1038_v9, -inf }
 0x555   :  { %v5399_v15 = vpop.f32.mrb[7].mxu0  ;;  %v1046_v16 = vsel %vm1042_vm11, %v991_v13, -inf }
 0x556   :  { %1047 = vmax.xlane.f32.xlu1 %v1046_v16 }
 0x558   :  { %1050 = vmax.xlane.f32.xlu0 %v1049_v17 }
 0x55a   :  { %1053 = vmax.xlane.f32.xlu1 %v1052_v14 }
 0x56b   :  { %1236 = vrot.lane.b32.xlu1 %v6586_v49, %s6252_s5 }
 0x5e1   :  { %v1045_v19 = vpop.xlane.xlu0 %1044 }
 0x5e2   :  { %v1055_v22 = vsub.f32 %v988_v6, %v1045_v19 }
 0x5e3   :  { %v1048_v23 = vpop.xlane.xlu1 %1047 }
 0x5e4   :  { %v1056_v25 = vsub.f32 %v991_v13, %v1048_v23  ;;  %v1059_v27 = vmul.f32 1.442695, %v1055_v22 }
 0x5e5   :  { %v1051_v24 = vpop.xlane.xlu0 %1050 }
 0x5e6   :  { %v1057_v26 = vsub.f32 %v1035_v3, %v1051_v24  ;;  %v1061_v35 = vmul.f32 1.442695, %v1056_v25 }
 0x5e7   :  { %v1054_v29 = vpop.xlane.xlu1 %1053 }
 0x5e8   :  { %v1063_v31 = vmul.f32 1.442695, %v1057_v26  ;;  %v1058_v32 = vsub.f32 %v1038_v9, %v1054_v29 }
 0x5ea   :  { %5951 = vpow2.f32 %v1063_v31  ;;  %v1065_v36 = vmul.f32 1.442695, %v1058_v32 }
 0x5eb   :  { %5953 = vpow2.f32 %v1059_v27  ;;  %v1237_v52 = vpop.permute.xlu1 %1236 }
 0x5ec   :  { %5955 = vpow2.f32 %v1065_v36  ;;  %v1242_v7 = vsel %vm947_vm10, %v1237_v52, 0 }
 0x5ed   :  { %5957 = vpow2.f32 %v1061_v35 }
 0x5f4   :  { %v5952_v38 = vpop.eup %5951 }
 0x5f5   :  { %v5954_v40 = vpop.eup %5953  ;;  %v1073_v41 = vsel %vm1042_vm11, %v5952_v38, 0.0 }
 0x5f6   :  { %v5956_v42 = vpop.eup %5955  ;;  %1074 = vadd.xlane.f32.xlu0 %v1073_v41  ;;  %v1067_v47 = vsel %vm1042_vm11, %v5954_v40, 0.0 }
 0x5f7   :  { %v1076_v43 = vsel %vm1042_vm11, %v5956_v42, 0.0  ;;  %v5958_v45 = vpop.eup %5957 }
 0x5f8   :  { %1077 = vadd.xlane.f32.xlu1 %v1076_v43  ;;  %v1070_v51 = vsel %vm1042_vm11, %v5958_v45, 0.0 }
 0x5fa   :  { %1068 = vadd.xlane.f32.xlu0 %v1067_v47 }
 0x5fc   :  { %1071 = vadd.xlane.f32.xlu1 %v1070_v51 }
 0x60d   :  { %1180 = vrot.lane.b32.xlu1 %v6583_v34, %s6252_s5 }
 0x610   :  { %1183 = vrot.lane.b32.xlu0 %v6588_v50, %s6252_s5 }
 0x611   :  { %1233 = vrot.lane.b32.xlu1 %v6581_v33, %s6252_s5 }
 0x683   :  { %v1075_v53 = vpop.xlane.xlu0 %1074 }
 0x684   :  { %5959 = vrcp.f32 %v1075_v53 }
 0x685   :  { %v1078_v54 = vpop.xlane.xlu1 %1077 }
 0x686   :  { %5961 = vrcp.f32 %v1078_v54 }
 0x687   :  { %v1069_v55 = vpop.xlane.xlu0 %1068 }
 0x688   :  { %5963 = vrcp.f32 %v1069_v55 }
 0x689   :  { %v1072_v56 = vpop.xlane.xlu1 %1071 }
 0x68a   :  { %5965 = vrcp.f32 %v1072_v56 }
 0x68b   :  { %v1184_v10 = vpop.permute.xlu0 %1183 }
 0x68c   :  { %v1189_v15 = vsel %vm947_vm10, %v1184_v10, 0 }
 0x68d   :  { %v1181_v11 = vpop.permute.xlu1 %1180 }
 0x68e   :  { %v5960_v57 = vpop.eup %5959 }
 0x68f   :  { %v1085_v59 = vmul.f32 %v5960_v57, %v5952_v38 }
 0x690   :  { %v5962_v58 = vpop.eup %5961 }
 0x691   :  { %v1086_v60 = vmul.f32 %v5962_v58, %v5956_v42  ;;  %v1234_v16 = vpop.permute.xlu1 %1233 }
 0x692   :  { %v5964_v61 = vpop.eup %5963 }
 0x693   :  { %v1088_v3 = vpack.c.bf16 %v1086_v60, %v1085_v59  ;;  %v1083_v8 = vmul.f32 %v5964_v61, %v5954_v40 }
 0x694   :  { %v5966_v6 = vpop.eup %5965 }
 0x695   :  { %v1084_v9 = vmul.f32 %v5966_v6, %v5958_v45  ;;  %5415 = vmatmul.mubr.msk.bf16.vlgmr.msra.gmra.mrb[20].mxu1 %vm1042_vm11, %v1088_v3 }
 0x696   :  { %5425 = vmatpush3.bf16.xpose.msra.mxu1 %v1242_v7  ;;  %5426 = vmatprep.mubr.msk.bf16.mxu1 %vm6251_vm9, %v6250_v20 }
 0x697   :  { %v1087_v13 = vpack.c.bf16 %v1084_v9, %v1083_v8  ;;  %5436 = vmatprep.subr.bf16.mxu1 %v6250_v20 }
 0x699   :  { %5409 = vmatmul.mubr.msk.bf16.vlgmr.msra.gmra.mrb[8].mxu0 %vm1042_vm11, %v1087_v13 }
 0x69a   :  { %5419 = vmatpush3.bf16.xpose.msra.mxu0 %v1189_v15  ;;  %5420 = vmatprep.mubr.msk.bf16.mxu0 %vm6251_vm9, %v6250_v20 }
 0x69b   :  { %5430 = vmatprep.subr.bf16.mxu0 %v6250_v20 }
 0x69d   :  { %5427 = vmatmul.mubr.msk.bf16.vlgmr.msra.gmra.mrb[24].mxu1 %vm947_vm10, %v1234_v16 }
 0x69e   :  { %5438 = vmatprep.mubr.msk.bf16.mxu1 %vm6251_vm9, %v6250_v20 }
 0x6a1   :  { %5421 = vmatmul.mubr.msk.bf16.vlgmr.msra.gmra.mrb[12].mxu0 %vm947_vm10, %v1181_v11 }
 0x6a2   :  { %5432 = vmatprep.mubr.msk.bf16.mxu0 %vm6251_vm9, %v6250_v20 }
 0x768   :  { %v6645_v17 = vpop.f32.mrb[20].mxu1 }
 0x769   :  { %v5416_v14 = vpop.f32.mrb[21].mxu1 }
 0x76a   :  { %v6647_v19 = vpop.f32.mrb[22].mxu1 }
 0x76b   :  { %v5417_v22 = vpop.f32.mrb[23].mxu1 }
 0x76c   :  { %v6649_v23 = vpop.f32.mrb[8].mxu0 }
 0x76d   :  { %v5410_v24 = vpop.f32.mrb[9].mxu0 }
 0x76e   :  { %v6651_v25 = vpop.f32.mrb[10].mxu0 }
 0x76f   :  { %v5411_v26 = vpop.f32.mrb[11].mxu0 }
 0x770   :  { %v1278_v27 = vpop.f32.mrb[24].mxu1 }
 0x771   :  { %v5428_v29 = vpop.f32.mrb[25].mxu1  ;;  %v1291_v43 = vsel %vm1042_vm11, %v1278_v27, -inf }
 0x772   :  { %v1281_v31 = vpop.f32.mrb[26].mxu1 }
 0x773   :  { %v5429_v32 = vpop.f32.mrb[27].mxu1  ;;  %v1294_v45 = vsel %vm1042_vm11, %v1281_v31, -inf }
 0x774   :  { %v1225_v35 = vpop.f32.mrb[12].mxu0 }
 0x775   :  { %v5422_v36 = vpop.f32.mrb[13].mxu0  ;;  %v1285_v38 = vsel %vm1042_vm11, %v1225_v35, -inf }
 0x776   :  { %1286 = vmax.xlane.f32.xlu0 %v1285_v38  ;;  %v1228_v40 = vpop.f32.mrb[14].mxu0 }
 0x777   :  { %v5423_v41 = vpop.f32.mrb[15].mxu0  ;;  %v1288_v42 = vsel %vm1042_vm11, %v1228_v40, -inf }
 0x778   :  { %1289 = vmax.xlane.f32.xlu1 %v1288_v42 }
 0x77a   :  { %1292 = vmax.xlane.f32.xlu0 %v1291_v43 }
 0x77e   :  { %1295 = vmax.xlane.f32.xlu0 %v1294_v45 }
 0x789   :  { %1380 = vrot.lane.b32.xlu1 %v6597_v63, %s6252_s5 }
 0x78d   :  { %1429 = vrot.lane.b32.xlu1 %v6588_v50, %s6253_s9 }
 0x803   :  { %v1287_v47 = vpop.xlane.xlu0 %1286 }
 0x804   :  { %v1297_v52 = vsub.f32 %v1225_v35, %v1287_v47 }
 0x805   :  { %v1290_v51 = vpop.xlane.xlu1 %1289 }
 0x806   :  { %v1301_v56 = vmul.f32 1.442695, %v1297_v52  ;;  %v1298_v57 = vsub.f32 %v1228_v40, %v1290_v51 }
 0x807   :  { %v1293_v53 = vpop.xlane.xlu0 %1292 }
 0x808   :  { %v1299_v54 = vsub.f32 %v1278_v27, %v1293_v53  ;;  %v1303_v61 = vmul.f32 1.442695, %v1298_v57 }
 0x809   :  { %v1381_v55 = vpop.permute.xlu1 %1380 }
 0x80a   :  { %v1305_v58 = vmul.f32 1.442695, %v1299_v54  ;;  %5437 = vmatpush3.bf16.msra.mxu1 %v1381_v55 }
 0x80b   :  { %v1296_v59 = vpop.xlane.xlu0 %1295  ;;  %5448 = vmatprep.subr.bf16.mxu1 %v6250_v20 }
 0x80c   :  { %5967 = vpow2.f32 %v1305_v58  ;;  %v1300_v60 = vsub.f32 %v1281_v31, %v1296_v59 }
 0x80d   :  { %5969 = vpow2.f32 %v1301_v56  ;;  %v1430_v16 = vpop.permute.xlu1 %1429 }
 0x80e   :  { %v1307_v3 = vmul.f32 1.442695, %v1300_v60  ;;  %v1435_v51 = vsel %vm947_vm10, %v1430_v16, 0 }
 0x810   :  { %5971 = vpow2.f32 %v1307_v3 }
 0x811   :  { %5973 = vpow2.f32 %v1303_v61 }
 0x816   :  { %v5968_v6 = vpop.eup %5967 }
 0x817   :  { %v1315_v7 = vsel %vm1042_vm11, %v5968_v6, 0.0  ;;  %v5970_v8 = vpop.eup %5969 }
 0x818   :  { %1316 = vadd.xlane.f32.xlu0 %v1315_v7  ;;  %v1309_v10 = vsel %vm1042_vm11, %v5970_v8, 0.0 }
 0x81a   :  { %v5972_v9 = vpop.eup %5971 }
 0x81b   :  { %v1318_v11 = vsel %vm1042_vm11, %v5972_v9, 0.0  ;;  %v5974_v13 = vpop.eup %5973 }
 0x81c   :  { %1310 = vadd.xlane.f32.xlu0 %v1309_v10  ;;  %1319 = vadd.xlane.f32.xlu1 %v1318_v11  ;;  %v1312_v15 = vsel %vm1042_vm11, %v5974_v13, 0.0 }
 0x820   :  { %1313 = vadd.xlane.f32.xlu1 %v1312_v15 }
 0x831   :  { %1480 = vrot.lane.b32.xlu1 %v6586_v49, %s6253_s9 }
 0x832   :  { %1332 = vrot.lane.b32.xlu0 %v6599_v1, %s6252_s5 }
 0x835   :  { %1478 = vrot.lane.b32.xlu1 %v6581_v33, %s6253_s9 }
 0x836   :  { %1427 = vrot.lane.b32.xlu0 %v6583_v34, %s6253_s9 }
 0x8a5   :  { %v1317_v14 = vpop.xlane.xlu0 %1316 }
 0x8a6   :  { %5975 = vrcp.f32 %v1317_v14 }
 0x8a9   :  { %v1311_v22 = vpop.xlane.xlu0 %1310  ;;  %v1320_v24 = vpop.xlane.xlu1 %1319 }
 0x8aa   :  { %5977 = vrcp.f32 %v1320_v24 }
 0x8ab   :  { %5979 = vrcp.f32 %v1311_v22 }
 0x8ad   :  { %v1333_v26 = vpop.permute.xlu0 %1332  ;;  %v1314_v27 = vpop.xlane.xlu1 %1313 }
 0x8ae   :  { %5981 = vrcp.f32 %v1314_v27  ;;  %5431 = vmatpush3.bf16.msra.mxu0 %v1333_v26 }
 0x8af   :  { %5442 = vmatprep.subr.bf16.mxu0 %v6250_v20 }
 0x8b0   :  { %v5976_v29 = vpop.eup %5975 }
 0x8b1   :  { %v1327_v35 = vmul.f32 %v5976_v29, %v5968_v6  ;;  %v1481_v38 = vpop.permute.xlu1 %1480  ;;  %v1428_v53 = vpop.permute.xlu0 %1427 }
 0x8b2   :  { %v1486_v45 = vsel %vm947_vm10, %v1481_v38, 0 }
 0x8b4   :  { %v5978_v31 = vpop.eup %5977 }
 0x8b5   :  { %v5980_v32 = vpop.eup %5979  ;;  %v1328_v36 = vmul.f32 %v5978_v31, %v5972_v9  ;;  %v1479_v52 = vpop.permute.xlu1 %1478 }
 0x8b6   :  { %v1325_v42 = vmul.f32 %v5980_v32, %v5970_v8 }
 0x8b7   :  { %v1330_v41 = vpack.c.bf16 %v1328_v36, %v1327_v35 }
 0x8b8   :  { %v5982_v40 = vpop.eup %5981 }
 0x8b9   :  { %v1326_v43 = vmul.f32 %v5982_v40, %v5974_v13  ;;  %5439 = vmatmul.mubr.msk.bf16.vlgmr.msra.gmra.mrb[28].mxu1 %vm1042_vm11, %v1330_v41 }
 0x8ba   :  { %5449 = vmatpush3.bf16.xpose.msra.mxu1 %v1486_v45  ;;  %5450 = vmatprep.mubr.msk.bf16.mxu1 %vm6251_vm9, %v6250_v20 }
 0x8bb   :  { %v1329_v47 = vpack.c.bf16 %v1326_v43, %v1325_v42  ;;  %5460 = vmatprep.subr.bf16.mxu1 %v6250_v20 }
 0x8bd   :  { %5433 = vmatmul.mubr.msk.bf16.vlgmr.msra.gmra.mrb[16].mxu0 %vm1042_vm11, %v1329_v47 }
 0x8be   :  { %5443 = vmatpush3.bf16.xpose.msra.mxu0 %v1435_v51  ;;  %5444 = vmatprep.mubr.msk.bf16.mxu0 %vm6251_vm9, %v6250_v20 }
 0x8bf   :  { %5454 = vmatprep.subr.bf16.mxu0 %v6250_v20 }
 0x8c1   :  { %5451 = vmatmul.mubr.msk.bf16.vlgmr.msra.gmra.mrb[32].mxu1 %vm947_vm10, %v1479_v52 }
 0x8c2   :  { %5462 = vmatprep.mubr.msk.bf16.mxu1 %vm6251_vm9, %v6250_v20 }
 0x8c5   :  { %5445 = vmatmul.mubr.msk.bf16.vlgmr.msra.gmra.mrb[20].mxu0 %vm947_vm10, %v1428_v53 }
 0x8c6   :  { %5456 = vmatprep.mubr.msk.bf16.mxu0 %vm6251_vm9, %v6250_v20 }
 0x98c   :  { %v6691_v54 = vpop.f32.mrb[28].mxu1 }
 0x98d   :  { %v5440_v55 = vpop.f32.mrb[29].mxu1 }
 0x98e   :  { %v6693_v56 = vpop.f32.mrb[30].mxu1 }
 0x98f   :  { %v5808_v57 = vpack.i.bf16 %v6693_v56, %v6691_v54  ;;  %v5441_v58 = vpop.f32.mrb[31].mxu1 }
 0x990   :  { %v6697_v59 = vpop.f32.mrb[16].mxu0 }
 0x991   :  { %v5434_v60 = vpop.f32.mrb[17].mxu0 }
 0x992   :  { %v6699_v61 = vpop.f32.mrb[18].mxu0 }
 0x993   :  { %v5803_v3 = vpack.i.bf16 %v6699_v61, %v6697_v59  ;;  %v5435_v6 = vpop.f32.mrb[19].mxu0 }
 0x994   :  { %v1522_v7 = vpop.f32.mrb[32].mxu1 }
 0x995   :  { %v5452_v8 = vpop.f32.mrb[33].mxu1  ;;  %v1535_v24 = vsel %vm1042_vm11, %v1522_v7, -inf }
 0x996   :  { %v1525_v9 = vpop.f32.mrb[34].mxu1 }
 0x997   :  { %v5453_v10 = vpop.f32.mrb[35].mxu1  ;;  %v1538_v26 = vsel %vm1042_vm11, %v1525_v9, -inf }
 0x998   :  { %v1471_v11 = vpop.f32.mrb[20].mxu0 }
 0x999   :  { %v5446_v13 = vpop.f32.mrb[21].mxu0  ;;  %v1529_v15 = vsel %vm1042_vm11, %v1471_v11, -inf }
 0x99a   :  { %1530 = vmax.xlane.f32.xlu0 %v1529_v15  ;;  %v1474_v16 = vpop.f32.mrb[22].mxu0 }
 0x99b   :  { %v5447_v14 = vpop.f32.mrb[23].mxu0  ;;  %v1532_v22 = vsel %vm1042_vm11, %v1474_v16, -inf }
 0x99c   :  { %1533 = vmax.xlane.f32.xlu1 %v1532_v22 }
 0x99e   :  { %1536 = vmax.xlane.f32.xlu0 %v1535_v24 }
 0x9a2   :  { %1539 = vmax.xlane.f32.xlu0 %v1538_v26 }
 0x9ad   :  { %1622 = vrot.lane.b32.xlu1 %v6597_v63, %s6253_s9 }
 0x9b1   :  { %1671 = vrot.lane.b32.xlu1 %v6588_v50, %s6254_s13 }
 0xa27   :  { %v1531_v27 = vpop.xlane.xlu0 %1530 }
 0xa28   :  { %v1541_v31 = vsub.f32 %v1471_v11, %v1531_v27 }
 0xa29   :  { %v1534_v29 = vpop.xlane.xlu1 %1533 }
 0xa2a   :  { %v1545_v38 = vmul.f32 1.442695, %v1541_v31  ;;  %v1542_v40 = vsub.f32 %v1474_v16, %v1534_v29 }
 0xa2b   :  { %v1537_v32 = vpop.xlane.xlu0 %1536 }
 0xa2c   :  { %v1543_v35 = vsub.f32 %v1522_v7, %v1537_v32  ;;  %v1547_v45 = vmul.f32 1.442695, %v1542_v40 }
 0xa2d   :  { %v1623_v36 = vpop.permute.xlu1 %1622 }
 0xa2e   :  { %v1549_v41 = vmul.f32 1.442695, %v1543_v35  ;;  %5461 = vmatpush3.bf16.msra.mxu1 %v1623_v36 }
 0xa2f   :  { %v1540_v42 = vpop.xlane.xlu0 %1539  ;;  %5472 = vmatprep.subr.bf16.mxu1 %v6250_v20 }
 0xa30   :  { %5983 = vpow2.f32 %v1549_v41  ;;  %v1544_v43 = vsub.f32 %v1525_v9, %v1540_v42 }
 0xa31   :  { %5985 = vpow2.f32 %v1545_v38  ;;  %v1672_v7 = vpop.permute.xlu1 %1671 }
 0xa32   :  { %v1551_v47 = vmul.f32 1.442695, %v1544_v43  ;;  %v1677_v32 = vsel %vm947_vm10, %v1672_v7, 0 }
 0xa34   :  { %5987 = vpow2.f32 %v1551_v47 }
 0xa35   :  { %5989 = vpow2.f32 %v1547_v45 }
 0xa3a   :  { %v5984_v50 = vpop.eup %5983 }
 0xa3b   :  { %v1559_v51 = vsel %vm1042_vm11, %v5984_v50, 0.0  ;;  %v5986_v52 = vpop.eup %5985 }
 0xa3c   :  { %1560 = vadd.xlane.f32.xlu0 %v1559_v51  ;;  %v1553_v55 = vsel %vm1042_vm11, %v5986_v52, 0.0 }
 0xa3e   :  { %v5988_v53 = vpop.eup %5987 }
 0xa3f   :  { %v1562_v58 = vsel %vm1042_vm11, %v5988_v53, 0.0  ;;  %v5990_v60 = vpop.eup %5989 }
 0xa40   :  { %1554 = vadd.xlane.f32.xlu0 %v1553_v55  ;;  %1563 = vadd.xlane.f32.xlu1 %v1562_v58  ;;  %v1556_v6 = vsel %vm1042_vm11, %v5990_v60, 0.0 }
 0xa44   :  { %1557 = vadd.xlane.f32.xlu1 %v1556_v6 }
 0xa55   :  { %1722 = vrot.lane.b32.xlu1 %v6586_v49, %s6254_s13 }
 0xa56   :  { %1575 = vrot.lane.b32.xlu0 %v6599_v1, %s6253_s9 }
 0xa59   :  { %1720 = vrot.lane.b32.xlu1 %v6581_v33, %s6254_s13 }
 0xa5a   :  { %1669 = vrot.lane.b32.xlu0 %v6583_v34, %s6254_s13 }
 0xac9   :  { %v1561_v8 = vpop.xlane.xlu0 %1560 }
 0xaca   :  { %5991 = vrcp.f32 %v1561_v8 }
 0xacd   :  { %v1555_v9 = vpop.xlane.xlu0 %1554  ;;  %v1564_v10 = vpop.xlane.xlu1 %1563 }
 0xace   :  { %5993 = vrcp.f32 %v1564_v10 }
 0xacf   :  { %5995 = vrcp.f32 %v1555_v9 }
 0xad1   :  { %v1576_v11 = vpop.permute.xlu0 %1575  ;;  %v1558_v13 = vpop.xlane.xlu1 %1557 }
 0xad2   :  { %5997 = vrcp.f32 %v1558_v13  ;;  %5455 = vmatpush3.bf16.msra.mxu0 %v1576_v11 }
 0xad3   :  { %5466 = vmatprep.subr.bf16.mxu0 %v6250_v20 }
 0xad4   :  { %v5992_v49 = vpop.eup %5991 }
 0xad5   :  { %v1571_v33 = vmul.f32 %v5992_v49, %v5984_v50  ;;  %v1723_v22 = vpop.permute.xlu1 %1722  ;;  %v1670_v36 = vpop.permute.xlu0 %1669 }
 0xad6   :  { %v1728_v29 = vsel %vm947_vm10, %v1723_v22, 0 }
 0xad8   :  { %v5994_v15 = vpop.eup %5993 }
 0xad9   :  { %v5996_v16 = vpop.eup %5995  ;;  %v1572_v14 = vmul.f32 %v5994_v15, %v5988_v53  ;;  %v1721_v35 = vpop.permute.xlu1 %1720 }
 0xada   :  { %v1569_v26 = vmul.f32 %v5996_v16, %v5986_v52 }
 0xadb   :  { %v1574_v24 = vpack.c.bf16 %v1572_v14, %v1571_v33 }
 0xadc   :  { %v5998_v34 = vpop.eup %5997 }
 0xadd   :  { %v1570_v27 = vmul.f32 %v5998_v34, %v5990_v60  ;;  %5463 = vmatmul.mubr.msk.bf16.vlgmr.msra.gmra.mrb[36].mxu1 %vm1042_vm11, %v1574_v24 }
 0xade   :  { %5473 = vmatpush3.bf16.xpose.msra.mxu1 %v1728_v29  ;;  %5474 = vmatprep.mubr.msk.bf16.mxu1 %vm6251_vm9, %v6250_v20 }
 0xadf   :  { %v1573_v31 = vpack.c.bf16 %v1570_v27, %v1569_v26  ;;  %5484 = vmatprep.subr.bf16.mxu1 %v6250_v20 }
 0xae1   :  { %5457 = vmatmul.mubr.msk.bf16.vlgmr.msra.gmra.mrb[24].mxu0 %vm1042_vm11, %v1573_v31 }
 0xae2   :  { %5467 = vmatpush3.bf16.xpose.msra.mxu0 %v1677_v32  ;;  %5468 = vmatprep.mubr.msk.bf16.mxu0 %vm6251_vm9, %v6250_v20 }
 0xae3   :  { %5478 = vmatprep.subr.bf16.mxu0 %v6250_v20 }
 0xae5   :  { %5475 = vmatmul.mubr.msk.bf16.vlgmr.msra.gmra.mrb[40].mxu1 %vm947_vm10, %v1721_v35 }
 0xae6   :  { %5486 = vmatprep.mubr.msk.bf16.mxu1 %vm6251_vm9, %v6250_v20 }
 0xae9   :  { %5469 = vmatmul.mubr.msk.bf16.vlgmr.msra.gmra.mrb[28].mxu0 %vm947_vm10, %v1670_v36 }
 0xaea   :  { %5480 = vmatprep.mubr.msk.bf16.mxu0 %vm6251_vm9, %v6250_v20 }
 0xbb0   :  { %v1662_v38 = vpop.f32.mrb[36].mxu1 }
 0xbb1   :  { %v5464_v40 = vpop.f32.mrb[37].mxu1 }
 0xbb2   :  { %v1665_v41 = vpop.f32.mrb[38].mxu1 }
 0xbb3   :  { %v5818_v42 = vpack.i.bf16 %v1665_v41, %v1662_v38  ;;  %v5465_v43 = vpop.f32.mrb[39].mxu1 }
 0xbb4   :  { %v1615_v45 = vpop.f32.mrb[24].mxu0 }
 0xbb5   :  { %v5458_v47 = vpop.f32.mrb[25].mxu0 }
 0xbb6   :  { %v1618_v50 = vpop.f32.mrb[26].mxu0 }
 0xbb7   :  { %v5813_v51 = vpack.i.bf16 %v1618_v50, %v1615_v45  ;;  %v5459_v52 = vpop.f32.mrb[27].mxu0 }
 0xbb8   :  { %v1764_v53 = vpop.f32.mrb[40].mxu1 }
 0xbb9   :  { %v5476_v55 = vpop.f32.mrb[41].mxu1  ;;  %v1777_v13 = vsel %vm1042_vm11, %v1764_v53, -inf }
 0xbba   :  { %v1767_v58 = vpop.f32.mrb[42].mxu1 }
 0xbbb   :  { %v5477_v60 = vpop.f32.mrb[43].mxu1  ;;  %v1780_v49 = vsel %vm1042_vm11, %v1767_v58, -inf }
 0xbbc   :  { %v1713_v6 = vpop.f32.mrb[28].mxu0 }
 0xbbd   :  { %v5470_v7 = vpop.f32.mrb[29].mxu0  ;;  %v1771_v8 = vsel %vm1042_vm11, %v1713_v6, -inf }
 0xbbe   :  { %1772 = vmax.xlane.f32.xlu0 %v1771_v8  ;;  %v1716_v9 = vpop.f32.mrb[30].mxu0  ;;  %v5876_v7 = vld [vmem:[%s7264_s25 + $0x8] sm:$0xff]  }
 0xbbf   :  { %v5471_v10 = vpop.f32.mrb[31].mxu0  ;;  %v1774_v11 = vsel %vm1042_vm11, %v1716_v9, -inf }
 0xbc0   :  { %1775 = vmax.xlane.f32.xlu1 %v1774_v11 }
 0xbc2   :  { %1778 = vmax.xlane.f32.xlu0 %v1777_v13 }
 0xbc6   :  { %1781 = vmax.xlane.f32.xlu0 %v1780_v49 }
 0xc4b   :  { %v1773_v15 = vpop.xlane.xlu0 %1772 }
 0xc4c   :  { %v1783_v16 = vsub.f32 %v1713_v6, %v1773_v15  ;;  %v5875_v6 = vld [vmem:[%s7264_s25] sm:$0xff]  }
 0xc4d   :  { %v1776_v33 = vpop.xlane.xlu1 %1775 }
 0xc4e   :  { %v1787_v34 = vmul.f32 1.442695, %v1783_v16  ;;  %v1784_v24 = vsub.f32 %v1716_v9, %v1776_v33 }
 0xc4f   :  { %v1779_v14 = vpop.xlane.xlu0 %1778 }
 0xc50   :  { %v1785_v22 = vsub.f32 %v1764_v53, %v1779_v14  ;;  %v1789_v31 = vmul.f32 1.442695, %v1784_v24 }
 0xc52   :  { %v1791_v26 = vmul.f32 1.442695, %v1785_v22 }
 0xc53   :  { %v1782_v27 = vpop.xlane.xlu0 %1781 }
 0xc54   :  { %5999 = vpow2.f32 %v1791_v26  ;;  %v1786_v29 = vsub.f32 %v1767_v58, %v1782_v27 }
 0xc55   :  { %6001 = vpow2.f32 %v1787_v34 }
 0xc56   :  { %v1793_v32 = vmul.f32 1.442695, %v1786_v29 }
 0xc58   :  { %6003 = vpow2.f32 %v1793_v32 }
 0xc59   :  { %6005 = vpow2.f32 %v1789_v31 }
 0xc5e   :  { %v6000_v35 = vpop.eup %5999 }
 0xc5f   :  { %v1801_v36 = vsel %vm1042_vm11, %v6000_v35, 0.0  ;;  %v6002_v38 = vpop.eup %6001 }
 0xc60   :  { %1802 = vadd.xlane.f32.xlu0 %v1801_v36  ;;  %v1795_v41 = vsel %vm1042_vm11, %v6002_v38, 0.0 }
 0xc62   :  { %v6004_v40 = vpop.eup %6003 }
 0xc63   :  { %v1804_v43 = vsel %vm1042_vm11, %v6004_v40, 0.0  ;;  %v6006_v45 = vpop.eup %6005 }
 0xc64   :  { %1796 = vadd.xlane.f32.xlu0 %v1795_v41  ;;  %1805 = vadd.xlane.f32.xlu1 %v1804_v43  ;;  %v1798_v47 = vsel %vm1042_vm11, %v6006_v45, 0.0 }
 0xc68   :  { %1799 = vadd.xlane.f32.xlu1 %v1798_v47 }
 0xc79   :  { %1864 = vrot.lane.b32.xlu1 %v6597_v63, %s6254_s13 }
 0xc7a   :  { %1817 = vrot.lane.b32.xlu0 %v6599_v1, %s6254_s13 }
 0xc7d   :  { %5804 = vrot.lane.b32.xlu1 %v5803_v3, %s6255_s17 }
 0xc7e   :  { %5814 = vrot.lane.b32.xlu0 %v5813_v51, %s6256_s21 }
 0xc81   :  { %5809 = vrot.lane.b32.xlu1 %v5808_v57, %s6255_s17 }
 0xc85   :  { %5819 = vrot.lane.b32.xlu1 %v5818_v42, %s6256_s21 }
 0xced   :  { %v1803_v63 = vpop.xlane.xlu0 %1802 }
 0xcee   :  { %6007 = vrcp.f32 %v1803_v63 }
 0xcf1   :  { %v1797_v50 = vpop.xlane.xlu0 %1796  ;;  %v1806_v1 = vpop.xlane.xlu1 %1805 }
 0xcf2   :  { %6009 = vrcp.f32 %v1806_v1 }
 0xcf3   :  { %6011 = vrcp.f32 %v1797_v50 }
 0xcf5   :  { %v1818_v52 = vpop.permute.xlu0 %1817  ;;  %v1800_v53 = vpop.xlane.xlu1 %1799 }
 0xcf6   :  { %6013 = vrcp.f32 %v1800_v53  ;;  %5479 = vmatpush3.bf16.msra.mxu0 %v1818_v52 }
 0xcf7   :  { %5490 = vmatprep.subr.bf16.mxu0 %v5875_v6 }
 0xcf8   :  { %v6008_v61 = vpop.eup %6007 }
 0xcf9   :  { %v1865_v59 = vpop.permute.xlu1 %1864  ;;  %v1813_v56 = vmul.f32 %v6008_v61, %v6000_v35  ;;  %v5815_v36 = vpop.permute.xlu0 %5814 }
 0xcfa   :  { %5485 = vmatpush3.bf16.msra.mxu1 %v1865_v59  ;;  %v5817_v52 = vunpack.i.h.bf16 %v5815_v36  ;;  %v5816_v53 = vunpack.i.l.bf16 %v5815_v36 }
 0xcfc   :  { %v6010_v3 = vpop.eup %6009 }
 0xcfd   :  { %v6012_v54 = vpop.eup %6011  ;;  %v1814_v57 = vmul.f32 %v6010_v3, %v6004_v40  ;;  %v5805_v22 = vpop.permute.xlu1 %5804 }
 0xcfe   :  { %v1811_v55 = vmul.f32 %v6012_v54, %v6002_v38  ;;  %v5807_v29 = vunpack.i.h.bf16 %v5805_v22  ;;  %v5806_v31 = vunpack.i.l.bf16 %v5805_v22 }
 0xcff   :  { %v1816_v51 = vpack.c.bf16 %v1814_v57, %v1813_v56 }
 0xd00   :  { %v6014_v42 = vpop.eup %6013  ;;  %v1960_v47 = vsel %vm947_vm10, %v6651_v25, %v5807_v29  ;;  %v1959_v63 = vsel %vm947_vm10, %v6649_v23, %v5806_v31 }
 0xd01   :  { %v1812_v58 = vmul.f32 %v6014_v42, %v6006_v45  ;;  %5487 = vmatmul.mubr.msk.bf16.vlgmr.msra.gmra.mrb[44].mxu1 %vm1042_vm11, %v1816_v51  ;;  %v5810_v34 = vpop.permute.xlu1 %5809  ;;  %v1963_v25 = vsel %vm1042_vm11, %v1959_v63, %v5816_v53  ;;  %v1964_v56 = vsel %vm1042_vm11, %v1960_v47, %v5817_v52 }
 0xd02   :  { %v5812_v26 = vunpack.i.h.bf16 %v5810_v34  ;;  %v5811_v27 = vunpack.i.l.bf16 %v5810_v34 }
 0xd03   :  { %v1815_v60 = vpack.c.bf16 %v1812_v58, %v1811_v55  ;;  %v4999_v55 = vld [vmem:[%s7265_s22] ss:$0 sm:$0xff] }
 0xd04   :  { %v1962_v40 = vsel %vm947_vm10, %v6647_v19, %v5812_v26  ;;  %v1961_v41 = vsel %vm947_vm10, %v6645_v17, %v5811_v27 }
 0xd05   :  { %5481 = vmatmul.mubr.msk.bf16.vlgmr.msra.gmra.mrb[32].mxu0 %vm1042_vm11, %v1815_v60  ;;  %v5820_v24 = vpop.permute.xlu1 %5819 }
 0xd06   :  { %5491 = vmatpush3.bf16.msra.mxu0 %v5875_v6  ;;  %v5822_v32 = vunpack.i.h.bf16 %v5820_v24  ;;  %v5821_v35 = vunpack.i.l.bf16 %v5820_v24 }
 0xd07   :  { %5492 = vmatprep.subr.bf16.mxu0 %v5876_v7 }
 0xd08   :  { %v1965_v50 = vsel %vm1042_vm11, %v1961_v41, %v5821_v35  ;;  %v1966_v1 = vsel %vm1042_vm11, %v1962_v40, %v5822_v32 }
 0xd0a   :  { %5493 = vmatpush3.bf16.msra.mxu0 %v5876_v7 }
 0xdd4   :  { %v1904_v8 = vpop.f32.mrb[44].mxu1 }
 0xdd5   :  { %v5488_v9 = vpop.f32.mrb[45].mxu1 }
 0xdd6   :  { %v1907_v10 = vpop.f32.mrb[46].mxu1 }
 0xdd7   :  { %v5828_v11 = vpack.i.bf16 %v1907_v10, %v1904_v8  ;;  %v5489_v13 = vpop.f32.mrb[47].mxu1 }
 0xdd8   :  { %v1857_v49 = vpop.f32.mrb[32].mxu0 }
 0xdd9   :  { %v5482_v15 = vpop.f32.mrb[33].mxu0  ;;  %5829 = vrot.lane.b32.xlu1 %v5828_v11, %s6257_s29 }
 0xdda   :  { %v1860_v16 = vpop.f32.mrb[34].mxu0 }
 0xddb   :  { %v5823_v33 = vpack.i.bf16 %v1860_v16, %v1857_v49  ;;  %v5483_v14 = vpop.f32.mrb[35].mxu0 }
 0xddd   :  { %5824 = vrot.lane.b32.xlu0 %v5823_v33, %s6257_s29 }
 0xe4b   :  { %v5830_v38 = vpop.permute.xlu1 %5829 }
 0xe4c   :  { %v5832_v43 = vunpack.i.h.bf16 %v5830_v38  ;;  %v5831_v45 = vunpack.i.l.bf16 %v5830_v38 }
 0xe4e   :  { %v1970_v19 = vsel %vm1967_vm12, %v1965_v50, %v5831_v45  ;;  %v1971_v59 = vsel %vm1967_vm12, %v1966_v1, %v5832_v43  ;;  %v5877_v50 = vld [vmem:[%s7266_s23] sm:$0xff]   ;;  %v5878_v1 = vld [vmem:[%s7266_s23 + $0x8] sm:$0xff]  }
 0xe4f   :  { %v5825_v17 = vpop.permute.xlu0 %5824  ;;  %v1977_v61 = vpack.c.bf16 %v1971_v59, %v1970_v19  ;;  %5498 = vmatprep.subr.bf16.mxu1 %v5877_v50 }
 0xe50   :  { %v5827_v3 = vunpack.i.h.bf16 %v5825_v17  ;;  %v5826_v54 = vunpack.i.l.bf16 %v5825_v17  ;;  %5499 = vmatpush3.bf16.msra.mxu1 %v5877_v50 }
 0xe51   :  { %5500 = vmatprep.subr.bf16.mxu1 %v5878_v1 }
 0xe52   :  { %v1969_v23 = vsel %vm1967_vm12, %v1964_v56, %v5827_v3  ;;  %v1968_v57 = vsel %vm1967_vm12, %v1963_v25, %v5826_v54 }
 0xe53   :  { %v1976_v42 = vpack.c.bf16 %v1969_v23, %v1968_v57 }
 0xe54   :  { %5501 = vmatpush3.bf16.msra.mxu1 %v5878_v1 }
 0xe55   :  { %5494 = vmatprep.mubr.msk.bf16.mxu0 %vm280_vm0, %v1976_v42 }
 0xe56   :  { %5495 = vmatmul.mubr.msk.bf16.vlgmr.msra.gmra.mrb[36].mxu0 %vm280_vm0, %v1977_v61 }
 0xf29   :  { %v5496_v51 = vpop.f32.mrb[36].mxu0 }
 0xf2a   :  { %v2030_v58 = vpop.f32.mrb[37].mxu0  ;;  %v2047_v60 = vadd.f32 %v5496_v51, %v6536_v62  ;;  %v5000_v51 = vld [vmem:[%s7267_s26] ss:$0 sm:$0xff] }
 0xf2b   :  { %v2045_v6 = vadd.f32 %v2030_v58, %v6538_v0  ;;  %v5497_v7 = vpop.f32.mrb[38].mxu0 }
 0xf2c   :  { %v2033_v8 = vpop.f32.mrb[39].mxu0  ;;  %v6793_v11 = vadd.f32 %v4999_v55, %v2047_v60  ;;  %v2048_v13 = vadd.f32 %v5497_v7, %v6540_v2 }
 0xf2d   :  { %v6790_v9 = vadd.f32 %v4999_v55, %v2045_v6  ;;  %v2046_v10 = vadd.f32 %v2033_v8, %v6544_v4  ;;  %v5001_v8 = vld [vmem:[%s7268_s28] ss:$0 sm:$0xff] }
 0xf2e   :  { %v6802_v0 = vadd.f32 %v4999_v55, %v2048_v13  ;;  %v2068_v16 = vsel %vm280_vm0, %v6793_v11, 0.0 }
 0xf2f   :  { %v6796_v49 = vadd.f32 %v4999_v55, %v2046_v10  ;;  %v2062_v15 = vsel %vm280_vm0, %v6790_v9, 0.0 }
 0xf30   :  { %2063 = vadd.xlane.f32.xlu0 %v2062_v15  ;;  %v2071_v4 = vsel %vm280_vm0, %v6802_v0, 0.0 }
 0xf31   :  { %v2065_v62 = vsel %vm280_vm0, %v6796_v49, 0.0 }
 0xf32   :  { %2066 = vadd.xlane.f32.xlu1 %v2065_v62 }
 0xf34   :  { %2069 = vadd.xlane.f32.xlu0 %v2068_v16 }
 0xf38   :  { %2072 = vadd.xlane.f32.xlu0 %v2071_v4 }
 0xfbd   :  { %v2064_v2 = vpop.xlane.xlu0 %2063 }
 0xfbe   :  { %v2074_v33 = vmul.f32 0.03125, %v2064_v2 }
 0xfbf   :  { %v2067_v14 = vpop.xlane.xlu1 %2066 }
 0xfc0   :  { %v2078_v22 = vsub.f32 %v6790_v9, %v2074_v33  ;;  %v2075_v34 = vmul.f32 0.03125, %v2067_v14 }
 0xfc1   :  { %v2070_v24 = vpop.xlane.xlu0 %2069 }
 0xfc2   :  { %v2079_v26 = vsub.f32 %v6796_v49, %v2075_v34  ;;  %v2076_v27 = vmul.f32 0.03125, %v2070_v24  ;;  %v2082_v29 = vmul.f32 %v2078_v22, %v2078_v22 }
 0xfc4   :  { %v2080_v31 = vsub.f32 %v6793_v11, %v2076_v27  ;;  %v2086_v32 = vsel %vm280_vm0, %v2082_v29, 0.0  ;;  %v2083_v35 = vmul.f32 %v2079_v26, %v2079_v26  ;;  %v5880_v27 = vld [vmem:[%s7269_s1 + $0x8] sm:$0xff]   ;;  %v5881_v29 = vld [vmem:[%s7269_s1 + $0x10] sm:$0xff]  }
 0xfc5   :  { %2087 = vadd.xlane.f32.xlu0 %v2086_v32  ;;  %v2073_v36 = vpop.xlane.xlu0 %2072  ;;  %v5002_v32 = vld [vmem:[%s7270_s2] ss:$0 sm:$0xff] }
 0xfc6   :  { %v2077_v38 = vmul.f32 0.03125, %v2073_v36  ;;  %v2089_v40 = vsel %vm280_vm0, %v2083_v35, 0.0  ;;  %v2084_v41 = vmul.f32 %v2080_v31, %v2080_v31 }
 0xfc7   :  { %2090 = vadd.xlane.f32.xlu1 %v2089_v40 }
 0xfc8   :  { %v2081_v43 = vsub.f32 %v6802_v0, %v2077_v38  ;;  %v2092_v45 = vsel %vm280_vm0, %v2084_v41, 0.0 }
 0xfc9   :  { %2093 = vadd.xlane.f32.xlu0 %v2092_v45 }
 0xfca   :  { %v2085_v47 = vmul.f32 %v2081_v43, %v2081_v43 }
 0xfcc   :  { %v2095_v63 = vsel %vm280_vm0, %v2085_v47, 0.0 }
 0xfcd   :  { %2096 = vadd.xlane.f32.xlu1 %v2095_v63 }
0x1052   :  { %v2088_v52 = vpop.xlane.xlu0 %2087 }
0x1053   :  { %v2098_v53 = vmul.f32 0.03125, %v2088_v52 }
0x1054   :  { %v2091_v19 = vpop.xlane.xlu1 %2090 }
0x1055   :  { %v2102_v59 = vadd.f32 1e-05, %v2098_v53  ;;  %v2099_v17 = vmul.f32 0.03125, %v2091_v19 }
0x1056   :  { %v2094_v61 = vpop.xlane.xlu0 %2093 }
0x1057   :  { %6015 = vrsqrt.f32 %v2102_v59  ;;  %v2103_v3 = vadd.f32 1e-05, %v2099_v17  ;;  %v2100_v54 = vmul.f32 0.03125, %v2094_v61 }
0x1059   :  { %6017 = vrsqrt.f32 %v2103_v3  ;;  %v2104_v25 = vadd.f32 1e-05, %v2100_v54 }
0x105a   :  { %v2097_v56 = vpop.xlane.xlu1 %2096 }
0x105b   :  { %6019 = vrsqrt.f32 %v2104_v25  ;;  %v2101_v23 = vmul.f32 0.03125, %v2097_v56 }
0x105d   :  { %v2105_v57 = vadd.f32 1e-05, %v2101_v23 }
0x105f   :  { %6021 = vrsqrt.f32 %v2105_v57 }
0x1061   :  { %v6016_v42 = vpop.eup %6015 }
0x1062   :  { %v2110_v55 = vmul.f32 %v6016_v42, %v2078_v22 }
0x1063   :  { %v6018_v58 = vpop.eup %6017 }
0x1064   :  { %v2111_v60 = vmul.f32 %v6018_v58, %v2079_v26  ;;  %v2120_v6 = vmul.f32 %v5000_v51, %v2110_v55  ;;  %v5879_v26 = vld [vmem:[%s7269_s1] sm:$0xff]  }
0x1065   :  { %v6020_v7 = vpop.eup %6019  ;;  %5506 = vmatprep.subr.bf16.mxu1 %v5879_v26 }
0x1066   :  { %v2112_v10 = vmul.f32 %v6020_v7, %v2080_v31  ;;  %v2121_v13 = vmul.f32 %v5000_v51, %v2111_v60  ;;  %v2130_v15 = vadd.f32 %v5001_v8, %v2120_v6  ;;  %v5882_v31 = vld [vmem:[%s7269_s1 + $0x18] sm:$0xff]  }
0x1068   :  { %v2131_v62 = vadd.f32 %v5001_v8, %v2121_v13  ;;  %v2122_v4 = vmul.f32 %v5000_v51, %v2112_v10  ;;  %v5017_v10 = vld [vmem:[%s7271_s7] ss:$0 sm:$0xff] }
0x1069   :  { %v6022_v16 = vpop.eup %6021 }
0x106a   :  { %v2113_v2 = vmul.f32 %v6022_v16, %v2081_v43  ;;  %v2138_v33 = vpack.c.bf16 %v2131_v62, %v2130_v15  ;;  %v2132_v22 = vadd.f32 %v5001_v8, %v2122_v4 }
0x106c   :  { %v2123_v14 = vmul.f32 %v5000_v51, %v2113_v2  ;;  %5502 = vmatprep.mubr.msk.bf16.mxu1 %vm280_vm0, %v2138_v33 }
0x106e   :  { %v2133_v34 = vadd.f32 %v5001_v8, %v2123_v14 }
0x1070   :  { %v2139_v24 = vpack.c.bf16 %v2133_v34, %v2132_v22 }
0x1072   :  { %5503 = vmatmul.mubr.msk.bf16.vlgmr.msra.gmra.mrb[48].mxu1 %vm280_vm0, %v2139_v24 }
0x1073   :  { %5507 = vmatpush3.bf16.msra.mxu1 %v5879_v26 }
0x1074   :  { %5508 = vmatprep.subr.bf16.mxu1 %v5880_v27 }
0x1077   :  { %5509 = vmatpush3.bf16.msra.mxu1 %v5880_v27 }
0x1078   :  { %5510 = vmatprep.subr.bf16.mxu1 %v5881_v29 }
0x107b   :  { %5511 = vmatpush3.bf16.msra.mxu1 %v5881_v29 }
0x107c   :  { %5512 = vmatprep.subr.bf16.mxu1 %v5882_v31 }
0x107f   :  { %5513 = vmatpush3.bf16.msra.mxu1 %v5882_v31 }
0x1145   :  { %v5504_v35 = vpop.f32.mrb[48].mxu1 }
0x1146   :  { %v2208_v36 = vadd.f32 %v5504_v35, %v5002_v32  ;;  %v2199_v38 = vpop.f32.mrb[49].mxu1 }
0x1147   :  { %v2200_v40 = vadd.f32 %v5002_v32, %v2199_v38  ;;  %v5505_v41 = vpop.f32.mrb[50].mxu1 }
0x1148   :  { %v5009_v43 = vmul.f32 -1.442695, %v2208_v36  ;;  %v2211_v45 = vadd.f32 %v5505_v41, %v5002_v32  ;;  %v2202_v47 = vpop.f32.mrb[51].mxu1 }
0x1149   :  { %v5007_v63 = vmul.f32 -1.442695, %v2200_v40  ;;  %v2203_v50 = vadd.f32 %v5002_v32, %v2202_v47 }
0x114a   :  { %6023 = vpow2.f32 %v5009_v43  ;;  %v5010_v1 = vmul.f32 -1.442695, %v2211_v45 }
0x114b   :  { %6025 = vpow2.f32 %v5007_v63  ;;  %v5008_v52 = vmul.f32 -1.442695, %v2203_v50 }
0x114c   :  { %6027 = vpow2.f32 %v5010_v1 }
0x114d   :  { %6029 = vpow2.f32 %v5008_v52 }
0x1154   :  { %v6024_v53 = vpop.eup %6023 }
0x1155   :  { %v6026_v19 = vpop.eup %6025  ;;  %v2228_v59 = vadd.f32 1.0, %v6024_v53 }
0x1156   :  { %v6028_v17 = vpop.eup %6027  ;;  %v2226_v61 = vadd.f32 1.0, %v6026_v19 }
0x1157   :  { %v6030_v3 = vpop.eup %6029  ;;  %6031 = vrcp.f32 %v2228_v59  ;;  %v2229_v54 = vadd.f32 1.0, %v6028_v17  ;;  %v5883_v17 = vld [vmem:[%s6313_s14 + $0x10] sm:$0xff]  }
0x1158   :  { %6033 = vrcp.f32 %v2226_v61  ;;  %v2227_v25 = vadd.f32 1.0, %v6030_v3  ;;  %v5884_v61 = vld [vmem:[%s6333_s6 + $0x10] sm:$0xff]   ;;  %5518 = vmatprep.subr.bf16.mxu1 %v5883_v17  ;;  %v5885_v3 = vld [vmem:[%s6313_s14 + $0x18] sm:$0xff]   ;;  %s7274_s14 = sld [smem:[#allocation14_spill]] }
0x1159   :  { %6035 = vrcp.f32 %v2229_v54  ;;  %5534 = vmatprep.subr.bf16.mxu0 %v5884_v61  ;;  %v5886_v54 = vld [vmem:[%s6333_s6 + $0x18] sm:$0xff]   ;;  %s7278_s6 = sld [smem:[#allocation18_spill]] }
0x115a   :  { %6037 = vrcp.f32 %v2227_v25  ;;  %5535 = vmatpush3.bf16.msra.mxu0 %v5884_v61  ;;  %v5887_v25 = vld [vmem:[%s6323_s24 + $0x10] sm:$0xff]  }
0x115b   :  { %5536 = vmatprep.subr.bf16.mxu0 %v5886_v54 }
0x115e   :  { %5537 = vmatpush3.bf16.msra.mxu0 %v5886_v54 }
0x115f   :  { %5548 = vmatprep.subr.bf16.mxu0 %v6250_v20 }
0x1161   :  { %v6032_v56 = vpop.eup %6031 }
0x1162   :  { %v6034_v23 = vpop.eup %6033  ;;  %v2240_v51 = vmul.f32 %v6032_v56, %v2208_v36 }
0x1163   :  { %v6036_v57 = vpop.eup %6035  ;;  %v2238_v58 = vmul.f32 %v6034_v23, %v2200_v40 }
0x1164   :  { %v6038_v42 = vpop.eup %6037  ;;  %v2241_v55 = vmul.f32 %v6036_v57, %v2211_v45 }
0x1165   :  { %v2239_v60 = vmul.f32 %v6038_v42, %v2203_v50 }
0x1166   :  { %v2251_v6 = vpack.c.bf16 %v2241_v55, %v2240_v51 }
0x1167   :  { %v2250_v7 = vpack.c.bf16 %v2239_v60, %v2238_v58 }
0x1169   :  { %5514 = vmatprep.mubr.msk.bf16.mxu1 %vm2276_vm13, %v2250_v7 }
0x116a   :  { %5515 = vmatmul.mubr.msk.bf16.vlgmr.msra.gmra.mrb[52].mxu1 %vm2276_vm13, %v2251_v6 }
0x116b   :  { %5519 = vmatpush3.bf16.msra.mxu1 %v5883_v17 }
0x116c   :  { %5520 = vmatprep.subr.bf16.mxu1 %v5885_v3 }
0x116f   :  { %5521 = vmatpush3.bf16.msra.mxu1 %v5885_v3 }
0x1170   :  { %5526 = vmatprep.subr.bf16.mxu1 %v5887_v25 }
0x123d   :  { %v5516_v8 = vpop.f32.mrb[52].mxu1 }
0x123e   :  { %v2317_v13 = vpop.f32.mrb[53].mxu1  ;;  %v2334_v15 = vadd.f32 %v5516_v8, %v6793_v11 }
0x123f   :  { %v2332_v62 = vadd.f32 %v2317_v13, %v6790_v9  ;;  %v5517_v16 = vpop.f32.mrb[54].mxu1 }
0x1240   :  { %v2320_v4 = vpop.f32.mrb[55].mxu1  ;;  %v2335_v33 = vadd.f32 %v5517_v16, %v6802_v0  ;;  %v6836_v22 = vadd.f32 %v5017_v10, %v2334_v15  ;;  %v5020_v15 = vld [vmem:[%s6303_s3 + $0x1] ss:$0 sm:$0xff]  ;;  %s7272_s3 = sld [smem:[#allocation16_spill]] }
0x1241   :  { %v6832_v2 = vadd.f32 %v5017_v10, %v2332_v62  ;;  %v2333_v14 = vadd.f32 %v2320_v4, %v6796_v49 }
0x1242   :  { %v6842_v26 = vadd.f32 %v5017_v10, %v2335_v33  ;;  %v2357_v11 = vsel %vm280_vm0, %v6836_v22, 0.0 }
0x1243   :  { %v6838_v34 = vadd.f32 %v5017_v10, %v2333_v14  ;;  %v2351_v24 = vsel %vm280_vm0, %v6832_v2, 0.0 }
0x1244   :  { %2352 = vadd.xlane.f32.xlu0 %v2351_v24  ;;  %v2360_v49 = vsel %vm280_vm0, %v6842_v26, 0.0  ;;  %v5021_v24 = vld [vmem:[%s6308_s8 + $0x1] ss:$0 sm:$0xff]  ;;  %s7273_s8 = sld [smem:[#allocation19_spill]] }
0x1245   :  { %v2354_v9 = vsel %vm280_vm0, %v6838_v34, 0.0 }
0x1246   :  { %2355 = vadd.xlane.f32.xlu1 %v2354_v9 }
0x1248   :  { %2358 = vadd.xlane.f32.xlu0 %v2357_v11 }
0x124a   :  { %2361 = vadd.xlane.f32.xlu1 %v2360_v49 }
0x12d1   :  { %v2353_v0 = vpop.xlane.xlu0 %2352 }
0x12d2   :  { %v2363_v27 = vmul.f32 0.03125, %v2353_v0 }
0x12d3   :  { %v2356_v29 = vpop.xlane.xlu1 %2355 }
0x12d4   :  { %v2367_v31 = vsub.f32 %v6832_v2, %v2363_v27  ;;  %v2364_v32 = vmul.f32 0.03125, %v2356_v29 }
0x12d5   :  { %v2359_v35 = vpop.xlane.xlu0 %2358 }
0x12d6   :  { %v2368_v36 = vsub.f32 %v6838_v34, %v2364_v32  ;;  %v2365_v38 = vmul.f32 0.03125, %v2359_v35  ;;  %v2371_v40 = vmul.f32 %v2367_v31, %v2367_v31 }
0x12d7   :  { %v2362_v41 = vpop.xlane.xlu1 %2361 }
0x12d8   :  { %v2369_v43 = vsub.f32 %v6836_v22, %v2365_v38  ;;  %v2366_v45 = vmul.f32 0.03125, %v2362_v41  ;;  %v2375_v47 = vsel %vm280_vm0, %v2371_v40, 0.0  ;;  %v2372_v63 = vmul.f32 %v2368_v36, %v2368_v36  ;;  %v5888_v41 = vld [vmem:[%s6323_s24 + $0x18] sm:$0xff]   ;;  %s7276_s24 = sld [smem:[#allocation20_spill]] }
0x12d9   :  { %2376 = vadd.xlane.f32.xlu0 %v2375_v47 }
0x12da   :  { %v2370_v50 = vsub.f32 %v6842_v26, %v2366_v45  ;;  %v2378_v1 = vsel %vm280_vm0, %v2372_v63, 0.0  ;;  %v2373_v52 = vmul.f32 %v2369_v43, %v2369_v43  ;;  %v5027_v45 = vld [vmem:[%s6318_s19 + $0x1] ss:$0 sm:$0xff]  ;;  %s7275_s19 = sld [smem:[#allocation15_spill]] }
0x12db   :  { %2379 = vadd.xlane.f32.xlu1 %v2378_v1  ;;  %v5047_v63 = vld [vmem:[%s7263_s0 + $0x1] ss:$0 sm:$0xff] }
0x12dc   :  { %v2381_v53 = vsel %vm280_vm0, %v2373_v52, 0.0  ;;  %v2374_v19 = vmul.f32 %v2370_v50, %v2370_v50 }
0x12dd   :  { %2382 = vadd.xlane.f32.xlu0 %v2381_v53 }
0x12de   :  { %v2384_v59 = vsel %vm280_vm0, %v2374_v19, 0.0  ;;  %v5909_v30 = vld [vmem:[%s7276_s24 + $0x20] sm:$0xff]   ;;  %v5910_v5 = vld [vmem:[%s7276_s24 + $0x28] sm:$0xff]  }
0x12df   :  { %2385 = vadd.xlane.f32.xlu1 %v2384_v59 }
0x1366   :  { %v2377_v56 = vpop.xlane.xlu0 %2376 }
0x1367   :  { %v2387_v23 = vmul.f32 0.03125, %v2377_v56 }
0x1368   :  { %v2380_v57 = vpop.xlane.xlu1 %2379 }
0x1369   :  { %v2391_v42 = vadd.f32 1e-05, %v2387_v23  ;;  %v2388_v51 = vmul.f32 0.03125, %v2380_v57 }
0x136a   :  { %v2383_v55 = vpop.xlane.xlu0 %2382 }
0x136b   :  { %6039 = vrsqrt.f32 %v2391_v42  ;;  %v2392_v58 = vadd.f32 1e-05, %v2388_v51  ;;  %v2389_v60 = vmul.f32 0.03125, %v2383_v55 }
0x136c   :  { %v2386_v6 = vpop.xlane.xlu1 %2385 }
0x136d   :  { %6041 = vrsqrt.f32 %v2392_v58  ;;  %v2393_v7 = vadd.f32 1e-05, %v2389_v60  ;;  %v2390_v8 = vmul.f32 0.03125, %v2386_v6  ;;  %v5037_v6 = vld [vmem:[%s6328_s30 + $0x1] ss:$0 sm:$0xff]  ;;  %s7277_s30 = sld [smem:[#allocation17_spill]] }
0x136f   :  { %6043 = vrsqrt.f32 %v2393_v7  ;;  %v2394_v10 = vadd.f32 1e-05, %v2390_v8 }
0x1371   :  { %6045 = vrsqrt.f32 %v2394_v10 }
0x1375   :  { %v6040_v13 = vpop.eup %6039 }
0x1376   :  { %v2399_v62 = vmul.f32 %v6040_v13, %v2367_v31 }
0x1377   :  { %v6042_v16 = vpop.eup %6041 }
0x1378   :  { %v2400_v4 = vmul.f32 %v6042_v16, %v2368_v36  ;;  %v2409_v33 = vmul.f32 %v5020_v15, %v2399_v62 }
0x1379   :  { %v6044_v14 = vpop.eup %6043 }
0x137a   :  { %v2401_v9 = vmul.f32 %v6044_v14, %v2369_v43  ;;  %v2410_v11 = vmul.f32 %v5020_v15, %v2400_v4  ;;  %v2419_v29 = vadd.f32 %v5021_v24, %v2409_v33 }
0x137b   :  { %v6046_v49 = vpop.eup %6045 }
0x137c   :  { %v2411_v0 = vmul.f32 %v5020_v15, %v2401_v9  ;;  %v2402_v27 = vmul.f32 %v6046_v49, %v2370_v50  ;;  %v2420_v32 = vadd.f32 %v5021_v24, %v2410_v11 }
0x137e   :  { %v2412_v35 = vmul.f32 %v5020_v15, %v2402_v27  ;;  %v2428_v38 = vpack.c.bf16 %v2420_v32, %v2419_v29  ;;  %v2421_v31 = vadd.f32 %v5021_v24, %v2411_v0 }
0x1380   :  { %5522 = vmatprep.mubr.msk.bf16.mxu1 %vm280_vm0, %v2428_v38  ;;  %5538 = vmatprep.mubr.msk.bf16.mxu0 %vm280_vm0, %v2428_v38  ;;  %v2422_v36 = vadd.f32 %v5021_v24, %v2412_v35 }
0x1382   :  { %v2429_v40 = vpack.c.bf16 %v2422_v36, %v2421_v31 }
0x1384   :  { %5523 = vmatmul.mubr.msk.bf16.vlgmr.msra.gmra.mrb[56].mxu1 %vm280_vm0, %v2429_v40  ;;  %5539 = vmatmul.mubr.msk.bf16.vlgmr.msra.gmra.mrb[40].mxu0 %vm280_vm0, %v2429_v40 }
0x1385   :  { %5527 = vmatpush3.bf16.msra.mxu1 %v5887_v25  ;;  %5530 = vmatprep.mubr.msk.bf16.mxu1 %vm280_vm0, %v2428_v38 }
0x1386   :  { %5528 = vmatprep.subr.bf16.mxu1 %v5888_v41  ;;  %5550 = vmatprep.mubr.msk.bf16.mxu0 %vm6251_vm9, %v6250_v20 }
0x1389   :  { %5529 = vmatpush3.bf16.msra.mxu1 %v5888_v41 }
0x138a   :  { %5542 = vmatprep.subr.bf16.mxu1 %v6250_v20 }
0x138c   :  { %5531 = vmatmul.mubr.msk.bf16.vlgmr.msra.gmra.mrb[60].mxu1 %vm280_vm0, %v2429_v40 }
0x138d   :  { %5544 = vmatprep.mubr.msk.bf16.mxu1 %vm6251_vm9, %v6250_v20 }
0x1457   :  { %v5524_v43 = vpop.f32.mrb[56].mxu1  ;;  %v5540_v47 = vpop.f32.mrb[40].mxu0 }
0x1458   :  { %v2490_v50 = vpop.f32.mrb[57].mxu1  ;;  %v2638_v1 = vpop.f32.mrb[41].mxu0  ;;  %v2499_v19 = vadd.f32 %v5524_v43, %v5027_v45  ;;  %v2647_v59 = vadd.f32 %v5540_v47, %v5047_v63 }
0x1459   :  { %v5525_v52 = vpop.f32.mrb[58].mxu1  ;;  %v5541_v53 = vpop.f32.mrb[42].mxu0  ;;  %v2491_v25 = vadd.f32 %v5027_v45, %v2490_v50  ;;  %v2639_v56 = vadd.f32 %v5047_v63, %v2638_v1 }
0x145a   :  { %v2502_v17 = vadd.f32 %v5525_v52, %v5027_v45  ;;  %v2650_v61 = vadd.f32 %v5541_v53, %v5047_v63  ;;  %v2493_v3 = vpop.f32.mrb[59].mxu1  ;;  %v2641_v54 = vpop.f32.mrb[43].mxu0 }
0x145b   :  { %v2494_v23 = vadd.f32 %v5027_v45, %v2493_v3  ;;  %v2642_v57 = vadd.f32 %v5047_v63, %v2641_v54 }
0x145c   :  { %v6880_v42 = vpack.c.bf16 %v2502_v17, %v2499_v19  ;;  %v6882_v51 = vpack.c.bf16 %v2650_v61, %v2647_v59 }
0x145d   :  { %v6884_v55 = vpack.c.bf16 %v2494_v23, %v2491_v25  ;;  %v6886_v58 = vpack.c.bf16 %v2642_v57, %v2639_v56 }
0x145f   :  { %v5532_v60 = vpop.f32.mrb[60].mxu1 }
0x1460   :  { %v2564_v7 = vpop.f32.mrb[61].mxu1  ;;  %v2573_v10 = vadd.f32 %v5532_v60, %v5037_v6 }
0x1461   :  { %v5533_v8 = vpop.f32.mrb[62].mxu1  ;;  %v2565_v62 = vadd.f32 %v5037_v6, %v2564_v7 }
0x1462   :  { %v2576_v13 = vadd.f32 %v5533_v8, %v5037_v6  ;;  %v2567_v15 = vpop.f32.mrb[63].mxu1 }
0x1463   :  { %v2568_v16 = vadd.f32 %v5037_v6, %v2567_v15 }
0x1464   :  { %v6889_v4 = vpack.c.bf16 %v2576_v13, %v2573_v10 }
0x1465   :  { %v6891_v33 = vpack.c.bf16 %v2568_v16, %v2565_v62 }
0x1466   :  { %v2708_v14 = vsel %vm947_vm10, %v6889_v4, 0 }
0x1467   :  { %5549 = vmatpush3.bf16.xpose.msra.mxu0 %v2708_v14  ;;  %v2661_v24 = vsel %vm947_vm10, %v6891_v33, 0 }
0x1468   :  { %5543 = vmatpush3.bf16.xpose.msra.mxu1 %v2661_v24  ;;  %5560 = vmatprep.subr.bf16.mxu0 %v6250_v20 }
0x1469   :  { %5554 = vmatprep.subr.bf16.mxu1 %v6250_v20 }
0x146e   :  { %5551 = vmatmul.mubr.msk.bf16.vlgmr.msra.gmra.mrb[44].mxu0 %vm947_vm10, %v6880_v42 }
0x146f   :  { %5545 = vmatmul.mubr.msk.bf16.vlgmr.msra.gmra.mrb[64].mxu1 %vm947_vm10, %v6884_v55  ;;  %5561 = vmatpush3.bf16.msra.mxu0 %v6882_v51 }
0x1470   :  { %5555 = vmatpush3.bf16.msra.mxu1 %v6886_v58  ;;  %5562 = vmatprep.mubr.msk.bf16.mxu0 %vm6251_vm9, %v6250_v20 }
0x1471   :  { %5572 = vmatprep.subr.bf16.mxu0 %v6250_v20  ;;  %5556 = vmatprep.mubr.msk.bf16.mxu1 %vm6251_vm9, %v6250_v20 }
0x1472   :  { %5566 = vmatprep.subr.bf16.mxu1 %v6250_v20 }
0x1541   :  { %v2744_v9 = vpop.f32.mrb[44].mxu0 }
0x1542   :  { %v2697_v11 = vpop.f32.mrb[64].mxu1  ;;  %v5552_v49 = vpop.f32.mrb[45].mxu0  ;;  %v2757_v36 = vsel %vm1042_vm11, %v2744_v9, -inf }
0x1543   :  { %v5546_v0 = vpop.f32.mrb[65].mxu1  ;;  %v2747_v27 = vpop.f32.mrb[46].mxu0  ;;  %v2751_v29 = vsel %vm1042_vm11, %v2697_v11, -inf }
0x1544   :  { %v5553_v32 = vpop.f32.mrb[47].mxu0  ;;  %2752 = vmax.xlane.f32.xlu0 %v2751_v29  ;;  %v2700_v35 = vpop.f32.mrb[66].mxu1  ;;  %v2760_v40 = vsel %vm1042_vm11, %v2747_v27, -inf }
0x1545   :  { %v5547_v38 = vpop.f32.mrb[67].mxu1  ;;  %v2754_v31 = vsel %vm1042_vm11, %v2700_v35, -inf }
0x1546   :  { %2755 = vmax.xlane.f32.xlu1 %v2754_v31 }
0x1548   :  { %2758 = vmax.xlane.f32.xlu0 %v2757_v36 }
0x154a   :  { %2761 = vmax.xlane.f32.xlu1 %v2760_v40 }
0x155b   :  { %2944 = vrot.lane.b32.xlu1 %v6889_v4, %s6252_s5 }
0x15d1   :  { %v2753_v41 = vpop.xlane.xlu0 %2752 }
0x15d2   :  { %v2763_v43 = vsub.f32 %v2697_v11, %v2753_v41 }
0x15d3   :  { %v2756_v45 = vpop.xlane.xlu1 %2755 }
0x15d4   :  { %v2764_v63 = vsub.f32 %v2700_v35, %v2756_v45  ;;  %v2767_v1 = vmul.f32 1.442695, %v2763_v43 }
0x15d5   :  { %v2759_v47 = vpop.xlane.xlu0 %2758 }
0x15d6   :  { %v2765_v50 = vsub.f32 %v2744_v9, %v2759_v47  ;;  %v2769_v59 = vmul.f32 1.442695, %v2764_v63 }
0x15d7   :  { %v2762_v52 = vpop.xlane.xlu1 %2761 }
0x15d8   :  { %v2771_v53 = vmul.f32 1.442695, %v2765_v50  ;;  %v2766_v19 = vsub.f32 %v2747_v27, %v2762_v52 }
0x15da   :  { %6047 = vpow2.f32 %v2771_v53  ;;  %v2773_v17 = vmul.f32 1.442695, %v2766_v19 }
0x15db   :  { %6049 = vpow2.f32 %v2767_v1  ;;  %v2945_v6 = vpop.permute.xlu1 %2944 }
0x15dc   :  { %6051 = vpow2.f32 %v2773_v17  ;;  %v2950_v49 = vsel %vm947_vm10, %v2945_v6, 0 }
0x15dd   :  { %6053 = vpow2.f32 %v2769_v59 }
0x15e4   :  { %v6048_v61 = vpop.eup %6047 }
0x15e5   :  { %v6050_v3 = vpop.eup %6049  ;;  %v2781_v54 = vsel %vm1042_vm11, %v6048_v61, 0.0 }
0x15e6   :  { %v6052_v25 = vpop.eup %6051  ;;  %2782 = vadd.xlane.f32.xlu0 %v2781_v54  ;;  %v2775_v57 = vsel %vm1042_vm11, %v6050_v3, 0.0 }
0x15e7   :  { %v2784_v56 = vsel %vm1042_vm11, %v6052_v25, 0.0  ;;  %v6054_v23 = vpop.eup %6053 }
0x15e8   :  { %2785 = vadd.xlane.f32.xlu1 %v2784_v56  ;;  %v2778_v60 = vsel %vm1042_vm11, %v6054_v23, 0.0 }
0x15ea   :  { %2776 = vadd.xlane.f32.xlu0 %v2775_v57 }
0x15ec   :  { %2779 = vadd.xlane.f32.xlu1 %v2778_v60 }
0x15fd   :  { %2888 = vrot.lane.b32.xlu1 %v6884_v55, %s6252_s5 }
0x1600   :  { %2891 = vrot.lane.b32.xlu0 %v6891_v33, %s6252_s5 }
0x1601   :  { %2941 = vrot.lane.b32.xlu1 %v6880_v42, %s6252_s5 }
0x1673   :  { %v2783_v7 = vpop.xlane.xlu0 %2782 }
0x1674   :  { %6055 = vrcp.f32 %v2783_v7 }
0x1675   :  { %v2786_v8 = vpop.xlane.xlu1 %2785 }
0x1676   :  { %6057 = vrcp.f32 %v2786_v8 }
0x1677   :  { %v2777_v10 = vpop.xlane.xlu0 %2776 }
0x1678   :  { %6059 = vrcp.f32 %v2777_v10 }
0x1679   :  { %v2780_v13 = vpop.xlane.xlu1 %2779 }
0x167a   :  { %6061 = vrcp.f32 %v2780_v13 }
0x167b   :  { %v2892_v29 = vpop.permute.xlu0 %2891 }
0x167c   :  { %v2897_v38 = vsel %vm947_vm10, %v2892_v29, 0 }
0x167d   :  { %v2889_v32 = vpop.permute.xlu1 %2888 }
0x167e   :  { %v6056_v15 = vpop.eup %6055 }
0x167f   :  { %v2793_v16 = vmul.f32 %v6056_v15, %v6048_v61 }
0x1680   :  { %v6058_v62 = vpop.eup %6057 }
0x1681   :  { %v2794_v14 = vmul.f32 %v6058_v62, %v6052_v25  ;;  %v2942_v31 = vpop.permute.xlu1 %2941 }
0x1682   :  { %v6060_v24 = vpop.eup %6059 }
0x1683   :  { %v2796_v9 = vpack.c.bf16 %v2794_v14, %v2793_v16  ;;  %v2791_v0 = vmul.f32 %v6060_v24, %v6050_v3 }
0x1684   :  { %v6062_v11 = vpop.eup %6061 }
0x1685   :  { %v2792_v27 = vmul.f32 %v6062_v11, %v6054_v23  ;;  %5563 = vmatmul.mubr.msk.bf16.vlgmr.msra.gmra.mrb[48].mxu0 %vm1042_vm11, %v2796_v9 }
0x1686   :  { %5573 = vmatpush3.bf16.xpose.msra.mxu0 %v2950_v49  ;;  %5574 = vmatprep.mubr.msk.bf16.mxu0 %vm6251_vm9, %v6250_v20 }
0x1687   :  { %v2795_v35 = vpack.c.bf16 %v2792_v27, %v2791_v0  ;;  %5584 = vmatprep.subr.bf16.mxu0 %v6250_v20 }
0x1689   :  { %5557 = vmatmul.mubr.msk.bf16.vlgmr.msra.gmra.mrb[68].mxu1 %vm1042_vm11, %v2795_v35 }
0x168a   :  { %5567 = vmatpush3.bf16.xpose.msra.mxu1 %v2897_v38  ;;  %5568 = vmatprep.mubr.msk.bf16.mxu1 %vm6251_vm9, %v6250_v20 }
0x168b   :  { %5578 = vmatprep.subr.bf16.mxu1 %v6250_v20 }
0x168d   :  { %5575 = vmatmul.mubr.msk.bf16.vlgmr.msra.gmra.mrb[52].mxu0 %vm947_vm10, %v2942_v31 }
0x168e   :  { %5586 = vmatprep.mubr.msk.bf16.mxu0 %vm6251_vm9, %v6250_v20 }
0x1691   :  { %5569 = vmatmul.mubr.msk.bf16.vlgmr.msra.gmra.mrb[72].mxu1 %vm947_vm10, %v2889_v32 }
0x1692   :  { %5580 = vmatprep.mubr.msk.bf16.mxu1 %vm6251_vm9, %v6250_v20 }
0x1758   :  { %v6943_v36 = vpop.f32.mrb[48].mxu0 }
0x1759   :  { %v5564_v40 = vpop.f32.mrb[49].mxu0 }
0x175a   :  { %v6945_v41 = vpop.f32.mrb[50].mxu0 }
0x175b   :  { %v5565_v43 = vpop.f32.mrb[51].mxu0 }
0x175c   :  { %v6947_v45 = vpop.f32.mrb[68].mxu1 }
0x175d   :  { %v5558_v47 = vpop.f32.mrb[69].mxu1 }
0x175e   :  { %v6949_v63 = vpop.f32.mrb[70].mxu1 }
0x175f   :  { %v5559_v50 = vpop.f32.mrb[71].mxu1 }
0x1760   :  { %v2986_v1 = vpop.f32.mrb[52].mxu0 }
0x1761   :  { %v5576_v52 = vpop.f32.mrb[53].mxu0  ;;  %v2999_v56 = vsel %vm1042_vm11, %v2986_v1, -inf }
0x1762   :  { %v2989_v53 = vpop.f32.mrb[54].mxu0 }
0x1763   :  { %v5577_v19 = vpop.f32.mrb[55].mxu0  ;;  %v3002_v23 = vsel %vm1042_vm11, %v2989_v53, -inf }
0x1764   :  { %v2933_v59 = vpop.f32.mrb[72].mxu1 }
0x1765   :  { %v5570_v17 = vpop.f32.mrb[73].mxu1  ;;  %v2993_v61 = vsel %vm1042_vm11, %v2933_v59, -inf }
0x1766   :  { %2994 = vmax.xlane.f32.xlu0 %v2993_v61  ;;  %v2936_v3 = vpop.f32.mrb[74].mxu1 }
0x1767   :  { %v5571_v54 = vpop.f32.mrb[75].mxu1  ;;  %v2996_v25 = vsel %vm1042_vm11, %v2936_v3, -inf }
0x1768   :  { %2997 = vmax.xlane.f32.xlu1 %v2996_v25 }
0x176a   :  { %3000 = vmax.xlane.f32.xlu0 %v2999_v56 }
0x176e   :  { %3003 = vmax.xlane.f32.xlu0 %v3002_v23 }
0x1779   :  { %3088 = vrot.lane.b32.xlu1 %v6882_v51, %s6252_s5 }
0x177d   :  { %3137 = vrot.lane.b32.xlu1 %v6891_v33, %s6253_s9 }
0x17f3   :  { %v2995_v57 = vpop.xlane.xlu0 %2994 }
0x17f4   :  { %v3005_v6 = vsub.f32 %v2933_v59, %v2995_v57 }
0x17f5   :  { %v2998_v60 = vpop.xlane.xlu1 %2997 }
0x17f6   :  { %v3009_v13 = vmul.f32 1.442695, %v3005_v6  ;;  %v3006_v15 = vsub.f32 %v2936_v3, %v2998_v60 }
0x17f7   :  { %v3001_v7 = vpop.xlane.xlu0 %3000 }
0x17f8   :  { %v3007_v8 = vsub.f32 %v2986_v1, %v3001_v7  ;;  %v3011_v24 = vmul.f32 1.442695, %v3006_v15 }
0x17f9   :  { %v3089_v10 = vpop.permute.xlu1 %3088 }
0x17fa   :  { %v3013_v62 = vmul.f32 1.442695, %v3007_v8  ;;  %5585 = vmatpush3.bf16.msra.mxu0 %v3089_v10 }
0x17fb   :  { %v3004_v16 = vpop.xlane.xlu0 %3003  ;;  %5596 = vmatprep.subr.bf16.mxu0 %v6250_v20 }
0x17fc   :  { %6063 = vpow2.f32 %v3013_v62  ;;  %v3008_v14 = vsub.f32 %v2989_v53, %v3004_v16 }
0x17fd   :  { %6065 = vpow2.f32 %v3009_v13  ;;  %v3138_v31 = vpop.permute.xlu1 %3137 }
0x17fe   :  { %v3015_v9 = vmul.f32 1.442695, %v3008_v14  ;;  %v3143_v60 = vsel %vm947_vm10, %v3138_v31, 0 }
0x1800   :  { %6067 = vpow2.f32 %v3015_v9 }
0x1801   :  { %6069 = vpow2.f32 %v3011_v24 }
0x1806   :  { %v6064_v11 = vpop.eup %6063 }
0x1807   :  { %v3023_v49 = vsel %vm1042_vm11, %v6064_v11, 0.0  ;;  %v6066_v0 = vpop.eup %6065 }
0x1808   :  { %3024 = vadd.xlane.f32.xlu0 %v3023_v49  ;;  %v3017_v29 = vsel %vm1042_vm11, %v6066_v0, 0.0 }
0x180a   :  { %v6068_v27 = vpop.eup %6067 }
0x180b   :  { %v3026_v32 = vsel %vm1042_vm11, %v6068_v27, 0.0  ;;  %v6070_v35 = vpop.eup %6069 }
0x180c   :  { %3018 = vadd.xlane.f32.xlu0 %v3017_v29  ;;  %3027 = vadd.xlane.f32.xlu1 %v3026_v32  ;;  %v3020_v38 = vsel %vm1042_vm11, %v6070_v35, 0.0 }
0x1810   :  { %3021 = vadd.xlane.f32.xlu1 %v3020_v38 }
0x1821   :  { %3188 = vrot.lane.b32.xlu1 %v6889_v4, %s6253_s9 }
0x1822   :  { %3040 = vrot.lane.b32.xlu0 %v6886_v58, %s6252_s5 }
0x1825   :  { %3186 = vrot.lane.b32.xlu1 %v6880_v42, %s6253_s9 }
0x1826   :  { %3135 = vrot.lane.b32.xlu0 %v6884_v55, %s6253_s9 }
0x1895   :  { %v3025_v40 = vpop.xlane.xlu0 %3024 }
0x1896   :  { %6071 = vrcp.f32 %v3025_v40 }
0x1899   :  { %v3019_v43 = vpop.xlane.xlu0 %3018  ;;  %v3028_v47 = vpop.xlane.xlu1 %3027 }
0x189a   :  { %6073 = vrcp.f32 %v3028_v47 }
0x189b   :  { %6075 = vrcp.f32 %v3019_v43 }
0x189d   :  { %v3041_v50 = vpop.permute.xlu0 %3040  ;;  %v3022_v1 = vpop.xlane.xlu1 %3021 }
0x189e   :  { %6077 = vrcp.f32 %v3022_v1  ;;  %5579 = vmatpush3.bf16.msra.mxu1 %v3041_v50 }
0x189f   :  { %5590 = vmatprep.subr.bf16.mxu1 %v6250_v20 }
0x18a0   :  { %v6072_v52 = vpop.eup %6071 }
0x18a1   :  { %v3035_v59 = vmul.f32 %v6072_v52, %v6064_v11  ;;  %v3189_v61 = vpop.permute.xlu1 %3188  ;;  %v3136_v7 = vpop.permute.xlu0 %3135 }
0x18a2   :  { %v3194_v23 = vsel %vm947_vm10, %v3189_v61, 0 }
0x18a4   :  { %v6074_v53 = vpop.eup %6073 }
0x18a5   :  { %v6076_v19 = vpop.eup %6075  ;;  %v3036_v17 = vmul.f32 %v6074_v53, %v6068_v27  ;;  %v3187_v6 = vpop.permute.xlu1 %3186 }
0x18a6   :  { %v3033_v25 = vmul.f32 %v6076_v19, %v6066_v0 }
0x18a7   :  { %v3038_v54 = vpack.c.bf16 %v3036_v17, %v3035_v59 }
0x18a8   :  { %v6078_v3 = vpop.eup %6077 }
0x18a9   :  { %v3034_v56 = vmul.f32 %v6078_v3, %v6070_v35  ;;  %5587 = vmatmul.mubr.msk.bf16.vlgmr.msra.gmra.mrb[56].mxu0 %vm1042_vm11, %v3038_v54 }
0x18aa   :  { %5597 = vmatpush3.bf16.xpose.msra.mxu0 %v3194_v23  ;;  %5598 = vmatprep.mubr.msk.bf16.mxu0 %vm6251_vm9, %v6250_v20 }
0x18ab   :  { %v3037_v57 = vpack.c.bf16 %v3034_v56, %v3033_v25  ;;  %5608 = vmatprep.subr.bf16.mxu0 %v6250_v20 }
0x18ad   :  { %5581 = vmatmul.mubr.msk.bf16.vlgmr.msra.gmra.mrb[76].mxu1 %vm1042_vm11, %v3037_v57 }
0x18ae   :  { %5591 = vmatpush3.bf16.xpose.msra.mxu1 %v3143_v60  ;;  %5592 = vmatprep.mubr.msk.bf16.mxu1 %vm6251_vm9, %v6250_v20 }
0x18af   :  { %5602 = vmatprep.subr.bf16.mxu1 %v6250_v20 }
0x18b1   :  { %5599 = vmatmul.mubr.msk.bf16.vlgmr.msra.gmra.mrb[60].mxu0 %vm947_vm10, %v3187_v6 }
0x18b2   :  { %5610 = vmatprep.mubr.msk.bf16.mxu0 %vm6251_vm9, %v6250_v20 }
0x18b5   :  { %5593 = vmatmul.mubr.msk.bf16.vlgmr.msra.gmra.mrb[80].mxu1 %vm947_vm10, %v3136_v7 }
0x18b6   :  { %5604 = vmatprep.mubr.msk.bf16.mxu1 %vm6251_vm9, %v6250_v20 }
0x197c   :  { %v6989_v8 = vpop.f32.mrb[56].mxu0 }
0x197d   :  { %v5588_v10 = vpop.f32.mrb[57].mxu0 }
0x197e   :  { %v6991_v13 = vpop.f32.mrb[58].mxu0 }
0x197f   :  { %v5838_v15 = vpack.i.bf16 %v6991_v13, %v6989_v8  ;;  %v5589_v62 = vpop.f32.mrb[59].mxu0 }
0x1980   :  { %v6995_v16 = vpop.f32.mrb[76].mxu1 }
0x1981   :  { %v5582_v14 = vpop.f32.mrb[77].mxu1 }
0x1982   :  { %v6997_v24 = vpop.f32.mrb[78].mxu1 }
0x1983   :  { %v5833_v9 = vpack.i.bf16 %v6997_v24, %v6995_v16  ;;  %v5583_v11 = vpop.f32.mrb[79].mxu1 }
0x1984   :  { %v3230_v49 = vpop.f32.mrb[60].mxu0 }
0x1985   :  { %v5600_v0 = vpop.f32.mrb[61].mxu0  ;;  %v3243_v47 = vsel %vm1042_vm11, %v3230_v49, -inf }
0x1986   :  { %v3233_v27 = vpop.f32.mrb[62].mxu0 }
0x1987   :  { %v5601_v29 = vpop.f32.mrb[63].mxu0  ;;  %v3246_v50 = vsel %vm1042_vm11, %v3233_v27, -inf }
0x1988   :  { %v3179_v32 = vpop.f32.mrb[80].mxu1 }
0x1989   :  { %v5594_v35 = vpop.f32.mrb[81].mxu1  ;;  %v3237_v38 = vsel %vm1042_vm11, %v3179_v32, -inf }
0x198a   :  { %3238 = vmax.xlane.f32.xlu0 %v3237_v38  ;;  %v3182_v31 = vpop.f32.mrb[82].mxu1 }
0x198b   :  { %v5595_v40 = vpop.f32.mrb[83].mxu1  ;;  %v3240_v43 = vsel %vm1042_vm11, %v3182_v31, -inf }
0x198c   :  { %3241 = vmax.xlane.f32.xlu1 %v3240_v43 }
0x198e   :  { %3244 = vmax.xlane.f32.xlu0 %v3243_v47 }
0x1992   :  { %3247 = vmax.xlane.f32.xlu0 %v3246_v50 }
0x199d   :  { %3330 = vrot.lane.b32.xlu1 %v6882_v51, %s6253_s9 }
0x19a1   :  { %3379 = vrot.lane.b32.xlu1 %v6891_v33, %s6254_s13 }
0x1a17   :  { %v3239_v1 = vpop.xlane.xlu0 %3238 }
0x1a18   :  { %v3249_v53 = vsub.f32 %v3179_v32, %v3239_v1 }
0x1a19   :  { %v3242_v52 = vpop.xlane.xlu1 %3241 }
0x1a1a   :  { %v3253_v61 = vmul.f32 1.442695, %v3249_v53  ;;  %v3250_v3 = vsub.f32 %v3182_v31, %v3242_v52 }
0x1a1b   :  { %v3245_v19 = vpop.xlane.xlu0 %3244 }
0x1a1c   :  { %v3251_v59 = vsub.f32 %v3230_v49, %v3245_v19  ;;  %v3255_v23 = vmul.f32 1.442695, %v3250_v3 }
0x1a1d   :  { %v3331_v17 = vpop.permute.xlu1 %3330 }
0x1a1e   :  { %v3257_v54 = vmul.f32 1.442695, %v3251_v59  ;;  %5609 = vmatpush3.bf16.msra.mxu0 %v3331_v17 }
0x1a1f   :  { %v3248_v25 = vpop.xlane.xlu0 %3247  ;;  %5620 = vmatprep.subr.bf16.mxu0 %v6250_v20 }
0x1a20   :  { %6079 = vpow2.f32 %v3257_v54  ;;  %v3252_v56 = vsub.f32 %v3233_v27, %v3248_v25 }
0x1a21   :  { %6081 = vpow2.f32 %v3253_v61  ;;  %v3380_v49 = vpop.permute.xlu1 %3379 }
0x1a22   :  { %v3259_v57 = vmul.f32 1.442695, %v3252_v56  ;;  %v3385_v19 = vsel %vm947_vm10, %v3380_v49, 0 }
0x1a24   :  { %6083 = vpow2.f32 %v3259_v57 }
0x1a25   :  { %6085 = vpow2.f32 %v3255_v23 }
0x1a2a   :  { %v6080_v33 = vpop.eup %6079 }
0x1a2b   :  { %v3267_v60 = vsel %vm1042_vm11, %v6080_v33, 0.0  ;;  %v6082_v6 = vpop.eup %6081 }
0x1a2c   :  { %3268 = vadd.xlane.f32.xlu0 %v3267_v60  ;;  %v3261_v10 = vsel %vm1042_vm11, %v6082_v6, 0.0 }
0x1a2e   :  { %v6084_v7 = vpop.eup %6083 }
0x1a2f   :  { %v3270_v62 = vsel %vm1042_vm11, %v6084_v7, 0.0  ;;  %v6086_v14 = vpop.eup %6085 }
0x1a30   :  { %3262 = vadd.xlane.f32.xlu0 %v3261_v10  ;;  %3271 = vadd.xlane.f32.xlu1 %v3270_v62  ;;  %v3264_v11 = vsel %vm1042_vm11, %v6086_v14, 0.0 }
0x1a34   :  { %3265 = vadd.xlane.f32.xlu1 %v3264_v11 }
0x1a45   :  { %3430 = vrot.lane.b32.xlu1 %v6889_v4, %s6254_s13 }
0x1a46   :  { %3283 = vrot.lane.b32.xlu0 %v6886_v58, %s6253_s9 }
0x1a49   :  { %3428 = vrot.lane.b32.xlu1 %v6880_v42, %s6254_s13 }
0x1a4a   :  { %3377 = vrot.lane.b32.xlu0 %v6884_v55, %s6254_s13 }
0x1ab9   :  { %v3269_v0 = vpop.xlane.xlu0 %3268 }
0x1aba   :  { %6087 = vrcp.f32 %v3269_v0 }
0x1abd   :  { %v3263_v27 = vpop.xlane.xlu0 %3262  ;;  %v3272_v29 = vpop.xlane.xlu1 %3271 }
0x1abe   :  { %6089 = vrcp.f32 %v3272_v29 }
0x1abf   :  { %6091 = vrcp.f32 %v3263_v27 }
0x1ac1   :  { %v3284_v32 = vpop.permute.xlu0 %3283  ;;  %v3266_v35 = vpop.xlane.xlu1 %3265 }
0x1ac2   :  { %6093 = vrcp.f32 %v3266_v35  ;;  %5603 = vmatpush3.bf16.msra.mxu1 %v3284_v32 }
0x1ac3   :  { %5614 = vmatprep.subr.bf16.mxu1 %v6250_v20 }
0x1ac4   :  { %v6088_v4 = vpop.eup %6087 }
0x1ac5   :  { %v3279_v42 = vmul.f32 %v6088_v4, %v6080_v33  ;;  %v3431_v43 = vpop.permute.xlu1 %3430  ;;  %v3378_v17 = vpop.permute.xlu0 %3377 }
0x1ac6   :  { %v3436_v52 = vsel %vm947_vm10, %v3431_v43, 0 }
0x1ac8   :  { %v6090_v38 = vpop.eup %6089 }
0x1ac9   :  { %v6092_v31 = vpop.eup %6091  ;;  %v3280_v40 = vmul.f32 %v6090_v38, %v6084_v7  ;;  %v3429_v59 = vpop.permute.xlu1 %3428 }
0x1aca   :  { %v3277_v50 = vmul.f32 %v6092_v31, %v6082_v6 }
0x1acb   :  { %v3282_v47 = vpack.c.bf16 %v3280_v40, %v3279_v42 }
0x1acc   :  { %v6094_v55 = vpop.eup %6093 }
0x1acd   :  { %v3278_v1 = vmul.f32 %v6094_v55, %v6086_v14  ;;  %5611 = vmatmul.mubr.msk.bf16.vlgmr.msra.gmra.mrb[64].mxu0 %vm1042_vm11, %v3282_v47 }
0x1ace   :  { %5621 = vmatpush3.bf16.xpose.msra.mxu0 %v3436_v52  ;;  %5622 = vmatprep.mubr.msk.bf16.mxu0 %vm6251_vm9, %v6250_v20 }
0x1acf   :  { %v3281_v53 = vpack.c.bf16 %v3278_v1, %v3277_v50  ;;  %5632 = vmatprep.subr.bf16.mxu0 %v6250_v20 }
0x1ad1   :  { %5605 = vmatmul.mubr.msk.bf16.vlgmr.msra.gmra.mrb[84].mxu1 %vm1042_vm11, %v3281_v53 }
0x1ad2   :  { %5615 = vmatpush3.bf16.xpose.msra.mxu1 %v3385_v19  ;;  %5616 = vmatprep.mubr.msk.bf16.mxu1 %vm6251_vm9, %v6250_v20 }
0x1ad3   :  { %5626 = vmatprep.subr.bf16.mxu1 %v6250_v20 }
0x1ad5   :  { %5623 = vmatmul.mubr.msk.bf16.vlgmr.msra.gmra.mrb[68].mxu0 %vm947_vm10, %v3429_v59 }
0x1ad6   :  { %5634 = vmatprep.mubr.msk.bf16.mxu0 %vm6251_vm9, %v6250_v20 }
0x1ad9   :  { %5617 = vmatmul.mubr.msk.bf16.vlgmr.msra.gmra.mrb[88].mxu1 %vm947_vm10, %v3378_v17 }
0x1ada   :  { %5628 = vmatprep.mubr.msk.bf16.mxu1 %vm6251_vm9, %v6250_v20 }
0x1ba0   :  { %v3370_v61 = vpop.f32.mrb[64].mxu0 }
0x1ba1   :  { %v5612_v3 = vpop.f32.mrb[65].mxu0 }
0x1ba2   :  { %v3373_v54 = vpop.f32.mrb[66].mxu0 }
0x1ba3   :  { %v5848_v25 = vpack.i.bf16 %v3373_v54, %v3370_v61  ;;  %v5613_v56 = vpop.f32.mrb[67].mxu0 }
0x1ba4   :  { %v3323_v23 = vpop.f32.mrb[84].mxu1 }
0x1ba5   :  { %v5606_v57 = vpop.f32.mrb[85].mxu1 }
0x1ba6   :  { %v3326_v33 = vpop.f32.mrb[86].mxu1 }
0x1ba7   :  { %v5843_v60 = vpack.i.bf16 %v3326_v33, %v3323_v23  ;;  %v5607_v6 = vpop.f32.mrb[87].mxu1 }
0x1ba8   :  { %v3472_v7 = vpop.f32.mrb[68].mxu0 }
0x1ba9   :  { %v5624_v10 = vpop.f32.mrb[69].mxu0  ;;  %v3485_v32 = vsel %vm1042_vm11, %v3472_v7, -inf }
0x1baa   :  { %v3475_v62 = vpop.f32.mrb[70].mxu0 }
0x1bab   :  { %v5625_v14 = vpop.f32.mrb[71].mxu0  ;;  %v3488_v35 = vsel %vm1042_vm11, %v3475_v62, -inf }
0x1bac   :  { %v3421_v11 = vpop.f32.mrb[88].mxu1  ;;  %v5889_v14 = vld [vmem:[%s7264_s25 + $0x10] sm:$0xff]  }
0x1bad   :  { %v5618_v49 = vpop.f32.mrb[89].mxu1  ;;  %v3479_v0 = vsel %vm1042_vm11, %v3421_v11, -inf }
0x1bae   :  { %3480 = vmax.xlane.f32.xlu0 %v3479_v0  ;;  %v3424_v20 = vpop.f32.mrb[90].mxu1 }
0x1baf   :  { %v5619_v27 = vpop.f32.mrb[91].mxu1  ;;  %v3482_v29 = vsel %vm1042_vm11, %v3424_v20, -inf }
0x1bb0   :  { %3483 = vmax.xlane.f32.xlu1 %v3482_v29 }
0x1bb2   :  { %3486 = vmax.xlane.f32.xlu0 %v3485_v32 }
0x1bb6   :  { %3489 = vmax.xlane.f32.xlu0 %v3488_v35 }
0x1c3b   :  { %v3481_v4 = vpop.xlane.xlu0 %3480 }
0x1c3c   :  { %v3491_v38 = vsub.f32 %v3421_v11, %v3481_v4  ;;  %v5890_v11 = vld [vmem:[%s7264_s25 + $0x18] sm:$0xff]  }
0x1c3d   :  { %v3484_v31 = vpop.xlane.xlu1 %3483 }
0x1c3e   :  { %v3495_v43 = vmul.f32 1.442695, %v3491_v38  ;;  %v3492_v55 = vsub.f32 %v3424_v20, %v3484_v31 }
0x1c3f   :  { %v3487_v42 = vpop.xlane.xlu0 %3486 }
0x1c40   :  { %v3493_v40 = vsub.f32 %v3472_v7, %v3487_v42  ;;  %v3497_v52 = vmul.f32 1.442695, %v3492_v55 }
0x1c42   :  { %v3499_v47 = vmul.f32 1.442695, %v3493_v40 }
0x1c43   :  { %v3490_v50 = vpop.xlane.xlu0 %3489 }
0x1c44   :  { %6095 = vpow2.f32 %v3499_v47  ;;  %v3494_v1 = vsub.f32 %v3475_v62, %v3490_v50 }
0x1c45   :  { %6097 = vpow2.f32 %v3495_v43 }
0x1c46   :  { %v3501_v53 = vmul.f32 1.442695, %v3494_v1 }
0x1c48   :  { %6099 = vpow2.f32 %v3501_v53 }
0x1c49   :  { %6101 = vpow2.f32 %v3497_v52 }
0x1c4e   :  { %v6096_v19 = vpop.eup %6095 }
0x1c4f   :  { %v3509_v59 = vsel %vm1042_vm11, %v6096_v19, 0.0  ;;  %v6098_v17 = vpop.eup %6097 }
0x1c50   :  { %3510 = vadd.xlane.f32.xlu0 %v3509_v59  ;;  %v3503_v3 = vsel %vm1042_vm11, %v6098_v17, 0.0 }
0x1c52   :  { %v6100_v61 = vpop.eup %6099 }
0x1c53   :  { %v3512_v54 = vsel %vm1042_vm11, %v6100_v61, 0.0  ;;  %v6102_v56 = vpop.eup %6101 }
0x1c54   :  { %3504 = vadd.xlane.f32.xlu0 %v3503_v3  ;;  %3513 = vadd.xlane.f32.xlu1 %v3512_v54  ;;  %v3506_v23 = vsel %vm1042_vm11, %v6102_v56, 0.0 }
0x1c58   :  { %3507 = vadd.xlane.f32.xlu1 %v3506_v23 }
0x1c69   :  { %3572 = vrot.lane.b32.xlu1 %v6882_v51, %s6254_s13 }
0x1c6a   :  { %3525 = vrot.lane.b32.xlu0 %v6886_v58, %s6254_s13 }
0x1c6d   :  { %5834 = vrot.lane.b32.xlu1 %v5833_v9, %s6255_s17 }
0x1c6e   :  { %5844 = vrot.lane.b32.xlu0 %v5843_v60, %s6256_s21 }
0x1c71   :  { %5839 = vrot.lane.b32.xlu1 %v5838_v15, %s6255_s17 }
0x1c75   :  { %5849 = vrot.lane.b32.xlu1 %v5848_v25, %s6256_s21 }
0x1cdd   :  { %v3511_v57 = vpop.xlane.xlu0 %3510 }
0x1cde   :  { %6103 = vrcp.f32 %v3511_v57 }
0x1ce1   :  { %v3505_v51 = vpop.xlane.xlu0 %3504  ;;  %v3514_v33 = vpop.xlane.xlu1 %3513 }
0x1ce2   :  { %6105 = vrcp.f32 %v3514_v33 }
0x1ce3   :  { %6107 = vrcp.f32 %v3505_v51 }
0x1ce5   :  { %v3526_v58 = vpop.permute.xlu0 %3525  ;;  %v3508_v6 = vpop.xlane.xlu1 %3507 }
0x1ce6   :  { %6109 = vrcp.f32 %v3508_v6  ;;  %5627 = vmatpush3.bf16.msra.mxu1 %v3526_v58 }
0x1ce7   :  { %5638 = vmatprep.subr.bf16.mxu1 %v5889_v14 }
0x1ce8   :  { %v6104_v24 = vpop.eup %6103 }
0x1ce9   :  { %v3573_v16 = vpop.permute.xlu1 %3572  ;;  %v3521_v13 = vmul.f32 %v6104_v24, %v6096_v19  ;;  %v5845_v19 = vpop.permute.xlu0 %5844 }
0x1cea   :  { %5633 = vmatpush3.bf16.msra.mxu0 %v3573_v16  ;;  %v5847_v33 = vunpack.i.h.bf16 %v5845_v19  ;;  %v5846_v58 = vunpack.i.l.bf16 %v5845_v19 }
0x1cec   :  { %v6106_v9 = vpop.eup %6105 }
0x1ced   :  { %v6108_v8 = vpop.eup %6107  ;;  %v3522_v15 = vmul.f32 %v6106_v9, %v6100_v61  ;;  %v5835_v42 = vpop.permute.xlu1 %5834 }
0x1cee   :  { %v3519_v7 = vmul.f32 %v6108_v8, %v6098_v17  ;;  %v5837_v50 = vunpack.i.h.bf16 %v5835_v42  ;;  %v5836_v1 = vunpack.i.l.bf16 %v5835_v42 }
0x1cef   :  { %v3524_v60 = vpack.c.bf16 %v3522_v15, %v3521_v13 }
0x1cf0   :  { %v6110_v25 = vpop.eup %6109  ;;  %v3667_v23 = vsel %vm947_vm10, %v6947_v45, %v5836_v1 }
0x1cf1   :  { %v3520_v10 = vmul.f32 %v6110_v25, %v6102_v56  ;;  %5635 = vmatmul.mubr.msk.bf16.vlgmr.msra.gmra.mrb[72].mxu0 %vm1042_vm11, %v3524_v60  ;;  %v5840_v40 = vpop.permute.xlu1 %5839  ;;  %v3668_v56 = vsel %vm947_vm10, %v6949_v63, %v5837_v50  ;;  %v3671_v63 = vsel %vm1042_vm11, %v3667_v23, %v5846_v58  ;;  %v5077_v60 = vld [vmem:[%s7265_s22 + $0x1] ss:$0 sm:$0xff]  ;;  %v5891_v23 = vld [vmem:[%s7266_s23 + $0x10] sm:$0xff]  }
0x1cf2   :  { %v5842_v55 = vunpack.i.h.bf16 %v5840_v40  ;;  %v5841_v47 = vunpack.i.l.bf16 %v5840_v40  ;;  %v3672_v8 = vsel %vm1042_vm11, %v3668_v56, %v5847_v33  ;;  %5646 = vmatprep.subr.bf16.mxu0 %v5891_v23 }
0x1cf3   :  { %v3523_v62 = vpack.c.bf16 %v3520_v10, %v3519_v7  ;;  %5647 = vmatpush3.bf16.msra.mxu0 %v5891_v23 }
0x1cf4   :  { %v3670_v17 = vsel %vm947_vm10, %v6945_v41, %v5842_v55  ;;  %v3669_v61 = vsel %vm947_vm10, %v6943_v36, %v5841_v47 }
0x1cf5   :  { %5629 = vmatmul.mubr.msk.bf16.vlgmr.msra.gmra.mrb[92].mxu1 %vm1042_vm11, %v3523_v62  ;;  %v5850_v43 = vpop.permute.xlu1 %5849 }
0x1cf6   :  { %5639 = vmatpush3.bf16.msra.mxu1 %v5889_v14  ;;  %v5852_v52 = vunpack.i.h.bf16 %v5850_v43  ;;  %v5851_v53 = vunpack.i.l.bf16 %v5850_v43 }
0x1cf7   :  { %5640 = vmatprep.subr.bf16.mxu1 %v5890_v11 }
0x1cf8   :  { %v3673_v57 = vsel %vm1042_vm11, %v3669_v61, %v5851_v53  ;;  %v3674_v51 = vsel %vm1042_vm11, %v3670_v17, %v5852_v52 }
0x1cfa   :  { %5641 = vmatpush3.bf16.msra.mxu1 %v5890_v11 }
0x1dc4   :  { %v3612_v49 = vpop.f32.mrb[72].mxu0 }
0x1dc5   :  { %v5636_v0 = vpop.f32.mrb[73].mxu0 }
0x1dc6   :  { %v3615_v20 = vpop.f32.mrb[74].mxu0 }
0x1dc7   :  { %v5858_v27 = vpack.i.bf16 %v3615_v20, %v3612_v49  ;;  %v5637_v29 = vpop.f32.mrb[75].mxu0 }
0x1dc8   :  { %v3565_v32 = vpop.f32.mrb[92].mxu1 }
0x1dc9   :  { %v5630_v35 = vpop.f32.mrb[93].mxu1  ;;  %5859 = vrot.lane.b32.xlu1 %v5858_v27, %s6257_s29 }
0x1dca   :  { %v3568_v4 = vpop.f32.mrb[94].mxu1 }
0x1dcb   :  { %v5853_v38 = vpack.i.bf16 %v3568_v4, %v3565_v32  ;;  %v5631_v31 = vpop.f32.mrb[95].mxu1 }
0x1dcd   :  { %5854 = vrot.lane.b32.xlu0 %v5853_v38, %s6257_s29 }
0x1e3b   :  { %v5860_v59 = vpop.permute.xlu1 %5859 }
0x1e3c   :  { %v5862_v3 = vunpack.i.h.bf16 %v5860_v59  ;;  %v5861_v54 = vunpack.i.l.bf16 %v5860_v59 }
0x1e3e   :  { %v3677_v41 = vsel %vm1967_vm12, %v3673_v57, %v5861_v54  ;;  %v3678_v6 = vsel %vm1967_vm12, %v3674_v51, %v5862_v3  ;;  %v5892_v57 = vld [vmem:[%s7266_s23 + $0x18] sm:$0xff]  }
0x1e3f   :  { %v5855_v36 = vpop.permute.xlu0 %5854  ;;  %v3685_v16 = vpack.c.bf16 %v3678_v6, %v3677_v41  ;;  %5648 = vmatprep.subr.bf16.mxu0 %v5892_v57 }
0x1e40   :  { %v5857_v24 = vunpack.i.h.bf16 %v5855_v36  ;;  %v5856_v9 = vunpack.i.l.bf16 %v5855_v36  ;;  %5649 = vmatpush3.bf16.msra.mxu0 %v5892_v57 }
0x1e42   :  { %v3676_v45 = vsel %vm1967_vm12, %v3672_v8, %v5857_v24  ;;  %v3675_v13 = vsel %vm1967_vm12, %v3671_v63, %v5856_v9 }
0x1e43   :  { %v3684_v15 = vpack.c.bf16 %v3676_v45, %v3675_v13 }
0x1e45   :  { %5642 = vmatprep.mubr.msk.bf16.mxu1 %vm280_vm0, %v3684_v15  ;;  %v5080_v15 = vld [vmem:[%s7267_s26 + $0x1] ss:$0 sm:$0xff] }
0x1e46   :  { %5643 = vmatmul.mubr.msk.bf16.vlgmr.msra.gmra.mrb[96].mxu1 %vm280_vm0, %v3685_v16 }
0x1f19   :  { %v5644_v25 = vpop.f32.mrb[96].mxu1 }
0x1f1a   :  { %v3738_v7 = vpop.f32.mrb[97].mxu1  ;;  %v3755_v10 = vadd.f32 %v5644_v25, %v6836_v22 }
0x1f1b   :  { %v3753_v62 = vadd.f32 %v3738_v7, %v6832_v2  ;;  %v5645_v14 = vpop.f32.mrb[98].mxu1 }
0x1f1c   :  { %v3741_v11 = vpop.f32.mrb[99].mxu1  ;;  %v7091_v20 = vadd.f32 %v5077_v60, %v3755_v10  ;;  %v3756_v27 = vadd.f32 %v5645_v14, %v6842_v26  ;;  %v5081_v14 = vld [vmem:[%s7268_s28 + $0x1] ss:$0 sm:$0xff] }
0x1f1d   :  { %v7088_v49 = vadd.f32 %v5077_v60, %v3753_v62  ;;  %v3754_v0 = vadd.f32 %v3741_v11, %v6838_v34 }
0x1f1e   :  { %v7100_v2 = vadd.f32 %v5077_v60, %v3756_v27  ;;  %v3779_v35 = vsel %vm280_vm0, %v7091_v20, 0.0 }
0x1f1f   :  { %v7094_v29 = vadd.f32 %v5077_v60, %v3754_v0  ;;  %v3773_v32 = vsel %vm280_vm0, %v7088_v49, 0.0 }
0x1f20   :  { %3774 = vadd.xlane.f32.xlu0 %v3773_v32  ;;  %v3782_v34 = vsel %vm280_vm0, %v7100_v2, 0.0 }
0x1f21   :  { %v3776_v22 = vsel %vm280_vm0, %v7094_v29, 0.0 }
0x1f22   :  { %3777 = vadd.xlane.f32.xlu1 %v3776_v22 }
0x1f24   :  { %3780 = vadd.xlane.f32.xlu0 %v3779_v35 }
0x1f28   :  { %3783 = vadd.xlane.f32.xlu0 %v3782_v34 }
0x1fad   :  { %v3775_v26 = vpop.xlane.xlu0 %3774 }
0x1fae   :  { %v3785_v4 = vmul.f32 0.03125, %v3775_v26 }
0x1faf   :  { %v3778_v38 = vpop.xlane.xlu1 %3777 }
0x1fb0   :  { %v3789_v31 = vsub.f32 %v7088_v49, %v3785_v4  ;;  %v3786_v42 = vmul.f32 0.03125, %v3778_v38 }
0x1fb1   :  { %v3781_v40 = vpop.xlane.xlu0 %3780 }
0x1fb2   :  { %v3790_v43 = vsub.f32 %v7094_v29, %v3786_v42  ;;  %v3787_v55 = vmul.f32 0.03125, %v3781_v40  ;;  %v3793_v47 = vmul.f32 %v3789_v31, %v3789_v31  ;;  %v5893_v40 = vld [vmem:[%s7269_s1 + $0x20] sm:$0xff]  }
0x1fb3   :  { %5654 = vmatprep.subr.bf16.mxu1 %v5893_v40 }
0x1fb4   :  { %v3791_v50 = vsub.f32 %v7091_v20, %v3787_v55  ;;  %v3797_v1 = vsel %vm280_vm0, %v3793_v47, 0.0  ;;  %v3794_v52 = vmul.f32 %v3790_v43, %v3790_v43  ;;  %5655 = vmatpush3.bf16.msra.mxu1 %v5893_v40  ;;  %v5895_v55 = vld [vmem:[%s7269_s1 + $0x30] sm:$0xff]   ;;  %v5896_v47 = vld [vmem:[%s7269_s1 + $0x38] sm:$0xff]  }
0x1fb5   :  { %3798 = vadd.xlane.f32.xlu0 %v3797_v1  ;;  %v3784_v53 = vpop.xlane.xlu0 %3783 }
0x1fb6   :  { %v3788_v19 = vmul.f32 0.03125, %v3784_v53  ;;  %v3800_v59 = vsel %vm280_vm0, %v3794_v52, 0.0  ;;  %v3795_v17 = vmul.f32 %v3791_v50, %v3791_v50 }
0x1fb7   :  { %3801 = vadd.xlane.f32.xlu1 %v3800_v59 }
0x1fb8   :  { %v3792_v61 = vsub.f32 %v7100_v2, %v3788_v19  ;;  %v3803_v3 = vsel %vm280_vm0, %v3795_v17, 0.0 }
0x1fb9   :  { %3804 = vadd.xlane.f32.xlu0 %v3803_v3 }
0x1fba   :  { %v3796_v54 = vmul.f32 %v3792_v61, %v3792_v61 }
0x1fbc   :  { %v3806_v56 = vsel %vm280_vm0, %v3796_v54, 0.0 }
0x1fbd   :  { %3807 = vadd.xlane.f32.xlu1 %v3806_v56 }
0x2042   :  { %v3799_v51 = vpop.xlane.xlu0 %3798 }
0x2043   :  { %v3809_v33 = vmul.f32 0.03125, %v3799_v51 }
0x2044   :  { %v3802_v58 = vpop.xlane.xlu1 %3801 }
0x2045   :  { %v3813_v41 = vadd.f32 1e-05, %v3809_v33  ;;  %v3810_v6 = vmul.f32 0.03125, %v3802_v58 }
0x2046   :  { %v3805_v36 = vpop.xlane.xlu0 %3804 }
0x2047   :  { %6111 = vrsqrt.f32 %v3813_v41  ;;  %v3814_v16 = vadd.f32 1e-05, %v3810_v6  ;;  %v3811_v24 = vmul.f32 0.03125, %v3805_v36 }
0x2049   :  { %6113 = vrsqrt.f32 %v3814_v16  ;;  %v3815_v9 = vadd.f32 1e-05, %v3811_v24 }
0x204a   :  { %v3808_v63 = vpop.xlane.xlu1 %3807 }
0x204b   :  { %6115 = vrsqrt.f32 %v3815_v9  ;;  %v3812_v8 = vmul.f32 0.03125, %v3808_v63 }
0x204d   :  { %v3816_v45 = vadd.f32 1e-05, %v3812_v8 }
0x204f   :  { %6117 = vrsqrt.f32 %v3816_v45 }
0x2051   :  { %v6112_v13 = vpop.eup %6111 }
0x2052   :  { %v3821_v25 = vmul.f32 %v6112_v13, %v3789_v31 }
0x2053   :  { %v6114_v60 = vpop.eup %6113 }
0x2054   :  { %v3822_v7 = vmul.f32 %v6114_v60, %v3790_v43  ;;  %v3831_v10 = vmul.f32 %v5080_v15, %v3821_v25  ;;  %v5894_v43 = vld [vmem:[%s7269_s1 + $0x28] sm:$0xff]  }
0x2055   :  { %v6116_v62 = vpop.eup %6115  ;;  %5656 = vmatprep.subr.bf16.mxu1 %v5894_v43 }
0x2056   :  { %v3823_v11 = vmul.f32 %v6116_v62, %v3791_v50  ;;  %v3832_v0 = vmul.f32 %v5080_v15, %v3822_v7  ;;  %v3841_v27 = vadd.f32 %v5081_v14, %v3831_v10  ;;  %5657 = vmatpush3.bf16.msra.mxu1 %v5894_v43  ;;  %v5087_v50 = vld [vmem:[%s7270_s2 + $0x1] ss:$0 sm:$0xff] }
0x2057   :  { %5658 = vmatprep.subr.bf16.mxu1 %v5895_v55 }
0x2058   :  { %v3842_v32 = vadd.f32 %v5081_v14, %v3832_v0  ;;  %v3833_v35 = vmul.f32 %v5080_v15, %v3823_v11 }
0x2059   :  { %v6118_v22 = vpop.eup %6117 }
0x205a   :  { %v3824_v34 = vmul.f32 %v6118_v22, %v3792_v61  ;;  %v3850_v26 = vpack.c.bf16 %v3842_v32, %v3841_v27  ;;  %v3843_v38 = vadd.f32 %v5081_v14, %v3833_v35  ;;  %5659 = vmatpush3.bf16.msra.mxu1 %v5895_v55 }
0x205b   :  { %5660 = vmatprep.subr.bf16.mxu1 %v5896_v47 }
0x205c   :  { %v3834_v4 = vmul.f32 %v5080_v15, %v3824_v34  ;;  %5650 = vmatprep.mubr.msk.bf16.mxu0 %vm280_vm0, %v3850_v26 }
0x205e   :  { %v3844_v31 = vadd.f32 %v5081_v14, %v3834_v4  ;;  %5661 = vmatpush3.bf16.msra.mxu1 %v5896_v47  ;;  %v5111_v14 = vld [vmem:[%s7271_s7 + $0x1] ss:$0 sm:$0xff] }
0x205f   :  { %5757 = vmatprep.subr.msk.bf16.mxu1 %vm541_vm7, %v4762_v37 }
0x2060   :  { %v3851_v42 = vpack.c.bf16 %v3844_v31, %v3843_v38 }
0x2062   :  { %5651 = vmatmul.mubr.msk.bf16.vlgmr.msra.gmra.mrb[76].mxu0 %vm280_vm0, %v3851_v42 }
0x2135   :  { %v5652_v1 = vpop.f32.mrb[76].mxu0 }
0x2136   :  { %v3921_v52 = vadd.f32 %v5652_v1, %v5087_v50  ;;  %v3912_v53 = vpop.f32.mrb[77].mxu0 }
0x2137   :  { %v3913_v19 = vadd.f32 %v5087_v50, %v3912_v53  ;;  %v5653_v59 = vpop.f32.mrb[78].mxu0 }
0x2138   :  { %v5094_v17 = vmul.f32 -1.442695, %v3921_v52  ;;  %v3924_v61 = vadd.f32 %v5653_v59, %v5087_v50  ;;  %v3915_v3 = vpop.f32.mrb[79].mxu0 }
0x2139   :  { %v5092_v54 = vmul.f32 -1.442695, %v3913_v19  ;;  %v3916_v56 = vadd.f32 %v5087_v50, %v3915_v3 }
0x213a   :  { %6119 = vpow2.f32 %v5094_v17  ;;  %v5095_v23 = vmul.f32 -1.442695, %v3924_v61 }
0x213b   :  { %6121 = vpow2.f32 %v5092_v54  ;;  %v5093_v57 = vmul.f32 -1.442695, %v3916_v56 }
0x213c   :  { %6123 = vpow2.f32 %v5095_v23 }
0x213d   :  { %6125 = vpow2.f32 %v5093_v57 }
0x2144   :  { %v6120_v51 = vpop.eup %6119 }
0x2145   :  { %v6122_v33 = vpop.eup %6121  ;;  %v3941_v58 = vadd.f32 1.0, %v6120_v51 }
0x2146   :  { %v6124_v41 = vpop.eup %6123  ;;  %v3939_v6 = vadd.f32 1.0, %v6122_v33 }
0x2147   :  { %v6126_v36 = vpop.eup %6125  ;;  %6127 = vrcp.f32 %v3941_v58  ;;  %v3942_v16 = vadd.f32 1.0, %v6124_v41  ;;  %v5897_v58 = vld [vmem:[%s7272_s3] sm:$0xff]   ;;  %v5898_v41 = vld [vmem:[%s7272_s3 + $0x8] sm:$0xff]  }
0x2148   :  { %6129 = vrcp.f32 %v3939_v6  ;;  %v3940_v24 = vadd.f32 1.0, %v6126_v36  ;;  %5666 = vmatprep.subr.bf16.mxu0 %v5897_v58  ;;  %v5899_v6 = vld [vmem:[%s7273_s8 + $0x10] sm:$0xff]  }
0x2149   :  { %6131 = vrcp.f32 %v3942_v16  ;;  %5667 = vmatpush3.bf16.msra.mxu0 %v5897_v58 }
0x214a   :  { %6133 = vrcp.f32 %v3940_v24  ;;  %5668 = vmatprep.subr.bf16.mxu0 %v5898_v41 }
0x214d   :  { %5669 = vmatpush3.bf16.msra.mxu0 %v5898_v41 }
0x214e   :  { %5674 = vmatprep.subr.bf16.mxu0 %v5899_v6 }
0x2151   :  { %v6128_v9 = vpop.eup %6127 }
0x2152   :  { %v6130_v63 = vpop.eup %6129  ;;  %v3953_v13 = vmul.f32 %v6128_v9, %v3921_v52 }
0x2153   :  { %v6132_v8 = vpop.eup %6131  ;;  %v3951_v25 = vmul.f32 %v6130_v63, %v3913_v19 }
0x2154   :  { %v6134_v45 = vpop.eup %6133  ;;  %v3954_v15 = vmul.f32 %v6132_v8, %v3924_v61 }
0x2155   :  { %v3952_v60 = vmul.f32 %v6134_v45, %v3916_v56 }
0x2156   :  { %v3965_v7 = vpack.c.bf16 %v3954_v15, %v3953_v13 }
0x2157   :  { %v3964_v10 = vpack.c.bf16 %v3952_v60, %v3951_v25 }
0x2159   :  { %5662 = vmatprep.mubr.msk.bf16.mxu1 %vm2276_vm13, %v3964_v10 }
0x215a   :  { %5663 = vmatmul.mubr.msk.bf16.vlgmr.msra.gmra.mrb[100].mxu1 %vm2276_vm13, %v3965_v7 }
0x215b   :  { %5723 = vmatpush3.bf16.msra.mxu1 %v4772_v39 }
0x222d   :  { %v5664_v62 = vpop.f32.mrb[100].mxu1 }
0x222e   :  { %v4030_v11 = vpop.f32.mrb[101].mxu1  ;;  %v4047_v0 = vadd.f32 %v5664_v62, %v7091_v20  ;;  %v5112_v62 = vld [vmem:[%s7274_s14] ss:$0 sm:$0xff] }
0x222f   :  { %v4045_v27 = vadd.f32 %v4030_v11, %v7088_v49  ;;  %v5665_v32 = vpop.f32.mrb[102].mxu1 }
0x2230   :  { %v4033_v22 = vpop.f32.mrb[103].mxu1  ;;  %v4048_v34 = vadd.f32 %v5665_v32, %v7100_v2  ;;  %v4059_v4 = vadd.f32 %v5111_v14, %v4047_v0 }
0x2231   :  { %v4057_v35 = vadd.f32 %v5111_v14, %v4045_v27  ;;  %v4046_v26 = vadd.f32 %v4033_v22, %v7094_v29  ;;  %v5113_v22 = vld [vmem:[%s7275_s19] ss:$0 sm:$0xff] }
0x2232   :  { %v4060_v42 = vadd.f32 %v5111_v14, %v4048_v34  ;;  %v4069_v20 = vsel %vm280_vm0, %v4059_v4, 0.0 }
0x2233   :  { %v4058_v38 = vadd.f32 %v5111_v14, %v4046_v26  ;;  %v4063_v31 = vsel %vm280_vm0, %v4057_v35, 0.0 }
0x2234   :  { %4064 = vadd.xlane.f32.xlu0 %v4063_v31  ;;  %v4072_v49 = vsel %vm280_vm0, %v4060_v42, 0.0 }
0x2235   :  { %v4066_v40 = vsel %vm280_vm0, %v4058_v38, 0.0 }
0x2236   :  { %4067 = vadd.xlane.f32.xlu1 %v4066_v40 }
0x2238   :  { %4070 = vadd.xlane.f32.xlu0 %v4069_v20 }
0x223a   :  { %4073 = vadd.xlane.f32.xlu1 %v4072_v49 }
0x22c1   :  { %v4065_v43 = vpop.xlane.xlu0 %4064 }
0x22c2   :  { %v4075_v55 = vmul.f32 0.03125, %v4065_v43 }
0x22c3   :  { %v4068_v2 = vpop.xlane.xlu1 %4067 }
0x22c4   :  { %v4079_v47 = vsub.f32 %v4057_v35, %v4075_v55  ;;  %v4076_v29 = vmul.f32 0.03125, %v4068_v2  ;;  %v5900_v2 = vld [vmem:[%s7273_s8 + $0x18] sm:$0xff]  }
0x22c5   :  { %v4071_v50 = vpop.xlane.xlu0 %4070 }
0x22c6   :  { %v4080_v1 = vsub.f32 %v4058_v38, %v4076_v29  ;;  %v4077_v52 = vmul.f32 0.03125, %v4071_v50  ;;  %v4083_v53 = vmul.f32 %v4079_v47, %v4079_v47  ;;  %v5902_v29 = vld [vmem:[%s7273_s8 + $0x8] sm:$0xff]   ;;  %v5906_v50 = vld [vmem:[%s7276_s24 + $0x18] sm:$0xff]  }
0x22c7   :  { %v4074_v19 = vpop.xlane.xlu1 %4073 }
0x22c8   :  { %v4081_v59 = vsub.f32 %v4059_v4, %v4077_v52  ;;  %v4078_v17 = vmul.f32 0.03125, %v4074_v19  ;;  %v4087_v61 = vsel %vm280_vm0, %v4083_v53, 0.0  ;;  %v4084_v3 = vmul.f32 %v4080_v1, %v4080_v1  ;;  %v5119_v52 = vld [vmem:[%s7278_s6] ss:$0 sm:$0xff] }
0x22c9   :  { %4088 = vadd.xlane.f32.xlu0 %v4087_v61 }
0x22ca   :  { %v4082_v54 = vsub.f32 %v4060_v42, %v4078_v17  ;;  %v4090_v56 = vsel %vm280_vm0, %v4084_v3, 0.0  ;;  %v4085_v23 = vmul.f32 %v4081_v59, %v4081_v59 }
0x22cb   :  { %4091 = vadd.xlane.f32.xlu1 %v4090_v56 }
0x22cc   :  { %v4093_v57 = vsel %vm280_vm0, %v4085_v23, 0.0  ;;  %v4086_v51 = vmul.f32 %v4082_v54, %v4082_v54 }
0x22cd   :  { %4094 = vadd.xlane.f32.xlu0 %v4093_v57 }
0x22ce   :  { %v4096_v33 = vsel %vm280_vm0, %v4086_v51, 0.0 }
0x22cf   :  { %4097 = vadd.xlane.f32.xlu1 %v4096_v33 }
0x2356   :  { %v4089_v36 = vpop.xlane.xlu0 %4088 }
0x2357   :  { %v4099_v16 = vmul.f32 0.03125, %v4089_v36 }
0x2358   :  { %v4092_v24 = vpop.xlane.xlu1 %4091 }
0x2359   :  { %v4103_v9 = vadd.f32 1e-06, %v4099_v16  ;;  %v4100_v63 = vmul.f32 0.03125, %v4092_v24 }
0x235a   :  { %v4095_v8 = vpop.xlane.xlu0 %4094 }
0x235b   :  { %6135 = vrsqrt.f32 %v4103_v9  ;;  %v4104_v45 = vadd.f32 1e-06, %v4100_v63  ;;  %v4101_v13 = vmul.f32 0.03125, %v4095_v8 }
0x235c   :  { %v4098_v15 = vpop.xlane.xlu1 %4097 }
0x235d   :  { %6137 = vrsqrt.f32 %v4104_v45  ;;  %v4105_v25 = vadd.f32 1e-06, %v4101_v13  ;;  %v4102_v60 = vmul.f32 0.03125, %v4098_v15 }
0x235f   :  { %6139 = vrsqrt.f32 %v4105_v25  ;;  %v4106_v7 = vadd.f32 1e-06, %v4102_v60 }
0x2361   :  { %6141 = vrsqrt.f32 %v4106_v7 }
0x2365   :  { %v6136_v10 = vpop.eup %6135 }
0x2366   :  { %v4111_v14 = vmul.f32 %v6136_v10, %v4079_v47  ;;  %v5901_v47 = vld [vmem:[%s7273_s8] sm:$0xff]  }
0x2367   :  { %v6138_v11 = vpop.eup %6137 }
0x2368   :  { %v4112_v0 = vmul.f32 %v6138_v11, %v4080_v1  ;;  %v4121_v27 = vmul.f32 %v5112_v62, %v4111_v14 }
0x2369   :  { %v6140_v32 = vpop.eup %6139 }
0x236a   :  { %v4113_v35 = vmul.f32 %v6140_v32, %v4081_v59  ;;  %v4122_v34 = vmul.f32 %v5112_v62, %v4112_v0  ;;  %v4131_v31 = vadd.f32 %v5113_v22, %v4121_v27 }
0x236b   :  { %v6142_v26 = vpop.eup %6141 }
0x236c   :  { %v4123_v4 = vmul.f32 %v5112_v62, %v4113_v35  ;;  %v4114_v38 = vmul.f32 %v6142_v26, %v4082_v54  ;;  %v4132_v42 = vadd.f32 %v5113_v22, %v4122_v34 }
0x236e   :  { %v4124_v40 = vmul.f32 %v5112_v62, %v4114_v38  ;;  %v4139_v20 = vpack.c.bf16 %v4132_v42, %v4131_v31  ;;  %v4133_v49 = vadd.f32 %v5113_v22, %v4123_v4 }
0x2370   :  { %5670 = vmatprep.mubr.msk.bf16.mxu0 %vm280_vm0, %v4139_v20  ;;  %v4134_v43 = vadd.f32 %v5113_v22, %v4124_v40  ;;  %v5908_v40 = vld [vmem:[%s7276_s24 + $0x8] sm:$0xff]  }
0x2372   :  { %v4140_v55 = vpack.c.bf16 %v4134_v43, %v4133_v49 }
0x2374   :  { %5671 = vmatmul.mubr.msk.bf16.vlgmr.msra.gmra.mrb[80].mxu0 %vm280_vm0, %v4140_v55 }
0x2375   :  { %5675 = vmatpush3.bf16.msra.mxu0 %v5899_v6  ;;  %5678 = vmatprep.mubr.msk.bf16.mxu0 %vm280_vm0, %v6453_v12  ;;  %v5903_v12 = vld [vmem:[%s7273_s8 + $0x20] sm:$0xff]  }
0x2376   :  { %5676 = vmatprep.subr.bf16.mxu0 %v5900_v2 }
0x2379   :  { %5677 = vmatpush3.bf16.msra.mxu0 %v5900_v2 }
0x237a   :  { %5682 = vmatprep.subr.bf16.mxu0 %v5901_v47 }
0x237c   :  { %5679 = vmatmul.mubr.msk.bf16.vlgmr.msra.gmra.mrb[84].mxu0 %vm280_vm0, %v6459_v18  ;;  %v5904_v18 = vld [vmem:[%s7273_s8 + $0x28] sm:$0xff]  }
0x237d   :  { %5686 = vmatprep.mubr.msk.bf16.mxu0 %vm280_vm0, %v6475_v28  ;;  %5683 = vmatpush3.bf16.msra.mxu0 %v5901_v47  ;;  %v5905_v28 = vld [vmem:[%s7276_s24 + $0x10] sm:$0xff]  }
0x237e   :  { %5684 = vmatprep.subr.bf16.mxu0 %v5902_v29 }
0x2381   :  { %5685 = vmatpush3.bf16.msra.mxu0 %v5902_v29 }
0x2382   :  { %5690 = vmatprep.subr.bf16.mxu0 %v5903_v12 }
0x2388   :  { %5687 = vmatmul.mubr.msk.bf16.vlgmr.msra.gmra.mrb[84].mxu0 %vm280_vm0, %v6512_v44  ;;  %v7167_v44 = vld [vmem:[%s7276_s24] sm:$0xff]  }
0x2389   :  { %5694 = vmatprep.mubr.msk.bf16.mxu0 %vm280_vm0, %v6515_v46  ;;  %5691 = vmatpush3.bf16.msra.mxu0 %v5903_v12  ;;  %v5118_v46 = vld [vmem:[%s7277_s30] ss:$0 sm:$0xff] }
0x238a   :  { %5692 = vmatprep.subr.bf16.mxu0 %v5904_v18 }
0x238d   :  { %5693 = vmatpush3.bf16.msra.mxu0 %v5904_v18 }
0x238e   :  { %5698 = vmatprep.subr.bf16.mxu0 %v5905_v28 }
0x2394   :  { %5695 = vmatmul.mubr.msk.bf16.vlgmr.msra.gmra.mrb[84].mxu0 %vm280_vm0, %v6523_v48 }
0x2395   :  { %5699 = vmatpush3.bf16.msra.mxu0 %v5905_v28 }
0x2396   :  { %5700 = vmatprep.subr.bf16.mxu0 %v5906_v50 }
0x2399   :  { %5701 = vmatpush3.bf16.msra.mxu0 %v5906_v50 }
0x239a   :  { %5706 = vmatprep.subr.bf16.mxu0 %v7167_v44 }
0x2447   :  { %v5672_v1 = vpop.f32.mrb[80].mxu0 }
0x2448   :  { %v4217_v53 = vmul.f32 %v5672_v1, %v5118_v46  ;;  %v4193_v19 = vpop.f32.mrb[81].mxu0 }
0x2449   :  { %v4215_v59 = vmul.f32 %v5118_v46, %v4193_v19  ;;  %v5673_v17 = vpop.f32.mrb[82].mxu0 }
0x244a   :  { %v4228_v61 = vadd.f32 %v5119_v52, %v4217_v53  ;;  %v4218_v3 = vmul.f32 %v5673_v17, %v5118_v46  ;;  %v4196_v48 = vpop.f32.mrb[83].mxu0  ;;  %v5165_v53 = vld [vmem:[%s7280_s11] ss:$0 sm:$0xff] }
0x244b   :  { %v4226_v54 = vadd.f32 %v5119_v52, %v4215_v59  ;;  %v4216_v56 = vmul.f32 %v5118_v46, %v4196_v48 }
0x244c   :  { %v5122_v23 = vmul.f32 -1.442695, %v4228_v61  ;;  %v4229_v57 = vadd.f32 %v5119_v52, %v4218_v3 }
0x244d   :  { %v5120_v51 = vmul.f32 -1.442695, %v4226_v54  ;;  %v4227_v33 = vadd.f32 %v5119_v52, %v4216_v56 }
0x244e   :  { %6143 = vpow2.f32 %v5122_v23  ;;  %v5123_v58 = vmul.f32 -1.442695, %v4229_v57 }
0x244f   :  { %6145 = vpow2.f32 %v5120_v51  ;;  %v5121_v41 = vmul.f32 -1.442695, %v4227_v33 }
0x2450   :  { %6147 = vpow2.f32 %v5123_v58 }
0x2451   :  { %6149 = vpow2.f32 %v5121_v41 }
0x2458   :  { %v6144_v6 = vpop.eup %6143 }
0x2459   :  { %v6146_v36 = vpop.eup %6145  ;;  %v4244_v16 = vadd.f32 1.0, %v6144_v6 }
0x245a   :  { %v6148_v24 = vpop.eup %6147  ;;  %v4242_v9 = vadd.f32 1.0, %v6146_v36 }
0x245b   :  { %v6150_v63 = vpop.eup %6149  ;;  %6151 = vrcp.f32 %v4244_v16  ;;  %v4245_v8 = vadd.f32 1.0, %v6148_v24 }
0x245c   :  { %6153 = vrcp.f32 %v4242_v9  ;;  %v4243_v45 = vadd.f32 1.0, %v6150_v63 }
0x245d   :  { %6155 = vrcp.f32 %v4245_v8 }
0x245e   :  { %6157 = vrcp.f32 %v4243_v45 }
0x2465   :  { %v6152_v13 = vpop.eup %6151 }
0x2466   :  { %v6154_v15 = vpop.eup %6153  ;;  %v4256_v25 = vmul.f32 %v6152_v13, %v4228_v61 }
0x2467   :  { %v6156_v60 = vpop.eup %6155  ;;  %v4254_v7 = vmul.f32 %v6154_v15, %v4226_v54 }
0x2468   :  { %v6158_v10 = vpop.eup %6157  ;;  %v4257_v62 = vmul.f32 %v6156_v60, %v4229_v57  ;;  %v4461_v14 = vrot.slane %v4256_v25, 7  ;;  %v4473_v32 = vrot.slane %v4256_v25, 1 }
0x2469   :  { %v4459_v11 = vrot.slane %v4254_v7, 7  ;;  %v4471_v0 = vrot.slane %v4254_v7, 1  ;;  %v4255_v27 = vmul.f32 %v6158_v10, %v4227_v33 }
0x246a   :  { %v4462_v22 = vrot.slane %v4257_v62, 7  ;;  %v4474_v35 = vrot.slane %v4257_v62, 1  ;;  %v4490_v34 = vpack.c.bf16 %v4257_v62, %v4256_v25 }
0x246b   :  { %v4460_v26 = vrot.slane %v4255_v27, 7  ;;  %v4472_v4 = vrot.slane %v4255_v27, 1  ;;  %v4489_v38 = vpack.c.bf16 %v4255_v27, %v4254_v7 }
0x246c   :  { %v4478_v31 = vsel %vm238_vm3, %v4474_v35, %v4471_v0  ;;  %v4466_v42 = vsel %vm213_vm1, %v4462_v22, %v4459_v11  ;;  %v4463_v20 = vsel %vm213_vm1, %v4461_v14, %v4462_v22  ;;  %v4475_v49 = vsel %vm238_vm3, %v4473_v32, %v4474_v35  ;;  %v5173_v35 = vld [vmem:[%s6438_s12] ss:$0 sm:$0xff]  ;;  %s6258_s12 = smov [#allocation2]  }
0x246d   :  { %v4464_v43 = vsel %vm213_vm1, %v4460_v26, %v4461_v14  ;;  %5702 = vmatprep.mubr.msk.bf16.mxu0 %vm280_vm0, %v4489_v38  ;;  %v4465_v55 = vsel %vm213_vm1, %v4459_v11, %v4460_v26  ;;  %v4467_v2 = vsel %vm6463_vm2, 0.0, %v4466_v42  ;;  %v4476_v47 = vsel %vm238_vm3, %v4472_v4, %v4473_v32  ;;  %v5172_v32 = vld [vmem:[%s6433_s4] ss:$0 sm:$0xff]  ;;  %s4882_s27 = sshll.u32 %s6258_s12, 4  ;;  %s4883_s27 = int_to_ptr.vmem [resolvable:$true] %s4882_s27 }
0x246e   :  { %5703 = vmatmul.mubr.msk.bf16.vlgmr.msra.gmra.mrb[84].mxu0 %vm280_vm0, %v4490_v34  ;;  %v4483_v29 = vpack.c.bf16 %v4465_v55, %v4467_v2  ;;  %v4469_v12 = vsel %vm6481_vm4, 0.0, %v4464_v43  ;;  %v4477_v18 = vsel %vm238_vm3, %v4471_v0, %v4472_v4  ;;  %v4480_v28 = vsel %vm6494_vm5, 0.0, %v4476_v47  ;;  %s6191_s4 = scalar_lea.vmem %s4883_s27, 512  ;;  %p6196_p1 = scmp.lt.s32.totalorder %s4883_s27, %s4883_s27 }
0x246f   :  { %5707 = vmatpush3.bf16.msra.mxu0 %v7167_v44  ;;  %v4484_v21 = vpack.c.bf16 %v4463_v20, %v4469_v12  ;;  %v4630_v50 = vpack.c.bf16 %v4480_v28, %v4477_v18  ;;  %v4482_v46 = vsel %vm6500_vm6, 0.0, %v4478_v31  ;;  %v5164_v44 = vld [vmem:[%s7279_s10] ss:$0 sm:$0xff]  ;;  %p6192_p0 = scmp.ne.s32.totalorder %s4883_s27, %s6191_s4  ;;  %p6197_p2 = scmp.lt.s32.totalorder %s6191_s4, %s6191_s4 }
0x2470   :  { %5710 = vmatprep.mubr.msk.bf16.mxu0 %vm280_vm0, %v4483_v29  ;;  %5708 = vmatprep.subr.bf16.mxu0 %v5908_v40  ;;  %v4631_v1 = vpack.c.bf16 %v4482_v46, %v4475_v49 }
0x2471   :  { %p6198_p3 = por %p6197_p2, %p6196_p1 }
0x2473   :  { %5709 = vmatpush3.bf16.msra.mxu0 %v5908_v40  ;;  %p6199_p4 = pnand %p6198_p3, %p6192_p0 }
0x2474   :  { %5714 = vmatprep.subr.bf16.mxu0 %v5909_v30 }
0x247a   :  { %5711 = vmatmul.mubr.msk.bf16.vlgmr.msra.gmra.mrb[84].mxu0 %vm280_vm0, %v4484_v21 }
0x247b   :  { %5715 = vmatpush3.bf16.msra.mxu0 %v5909_v30  ;;  %5718 = vmatprep.mubr.msk.bf16.mxu0 %vm280_vm0, %v4630_v50 }
0x247c   :  { %5716 = vmatprep.subr.bf16.mxu0 %v5910_v5 }
0x247f   :  { %5717 = vmatpush3.bf16.msra.mxu0 %v5910_v5 }
0x2486   :  { %5719 = vmatmul.mubr.msk.bf16.vlgmr.msra.gmra.mrb[84].mxu0 %vm280_vm0, %v4631_v1 }
0x2559   :  { %v5720_v52 = vpop.f32.mrb[84].mxu0 }
0x255a   :  { %v4721_v19 = vmul.f32 %v5720_v52, %v5164_v44  ;;  %v4689_v59 = vpop.f32.mrb[85].mxu0 }
0x255b   :  { %v4719_v17 = vmul.f32 %v5164_v44, %v4689_v59  ;;  %v5721_v61 = vpop.f32.mrb[86].mxu0 }
0x255c   :  { %v4732_v3 = vadd.f32 %v5165_v53, %v4721_v19  ;;  %v4722_v48 = vmul.f32 %v5721_v61, %v5164_v44  ;;  %v4692_v54 = vpop.f32.mrb[87].mxu0 }
0x255d   :  { %v4730_v56 = vadd.f32 %v5165_v53, %v4719_v17  ;;  %v4720_v23 = vmul.f32 %v5164_v44, %v4692_v54 }
0x255e   :  { %v5168_v57 = vmul.f32 -1.442695, %v4732_v3  ;;  %v4733_v51 = vadd.f32 %v5165_v53, %v4722_v48 }
0x255f   :  { %v5166_v33 = vmul.f32 -1.442695, %v4730_v56  ;;  %v4731_v58 = vadd.f32 %v5165_v53, %v4720_v23 }
0x2560   :  { %6159 = vpow2.f32 %v5168_v57  ;;  %v5169_v41 = vmul.f32 -1.442695, %v4733_v51 }
0x2561   :  { %6161 = vpow2.f32 %v5166_v33  ;;  %v5167_v6 = vmul.f32 -1.442695, %v4731_v58 }
0x2562   :  { %6163 = vpow2.f32 %v5169_v41 }
0x2563   :  { %6165 = vpow2.f32 %v5167_v6 }
0x256a   :  { %v6160_v36 = vpop.eup %6159 }
0x256b   :  { %v6162_v16 = vpop.eup %6161  ;;  %v4748_v24 = vadd.f32 1.0, %v6160_v36 }
0x256c   :  { %v6164_v9 = vpop.eup %6163  ;;  %v4746_v63 = vadd.f32 1.0, %v6162_v16 }
0x256d   :  { %v6166_v8 = vpop.eup %6165  ;;  %6167 = vrcp.f32 %v4748_v24  ;;  %v4749_v45 = vadd.f32 1.0, %v6164_v9 }
0x256e   :  { %6169 = vrcp.f32 %v4746_v63  ;;  %v4747_v13 = vadd.f32 1.0, %v6166_v8 }
0x256f   :  { %6171 = vrcp.f32 %v4749_v45 }
0x2570   :  { %6173 = vrcp.f32 %v4747_v13 }
0x2577   :  { %v6168_v15 = vpop.eup %6167 }
0x2578   :  { %v6170_v25 = vpop.eup %6169  ;;  %v4760_v10 = vmul.f32 %v6168_v15, %v4732_v3 }
0x2579   :  { %v6172_v60 = vpop.eup %6171  ;;  %v4758_v14 = vmul.f32 %v6170_v25, %v4730_v56 }
0x257a   :  { %v6174_v7 = vpop.eup %6173  ;;  %v4761_v62 = vmul.f32 %v6172_v60, %v4733_v51 }
0x257b   :  { %v4759_v11 = vmul.f32 %v6174_v7, %v4731_v58 }
0x257c   :  { %v4764_v0 = vpack.c.bf16 %v4761_v62, %v4760_v10 }
0x257d   :  { %v4763_v27 = vpack.c.bf16 %v4759_v11, %v4758_v14 }
0x257f   :  { %5724 = vmatprep.mubr.msk.bf16.mxu1 %vm534_vm8, %v4763_v27 }
0x2580   :  { %5725 = vmatmul.mubr.msk.bf16.vlgmr.msra.gmra.mrb[104].mxu1 %vm534_vm8, %v4764_v0 }
0x2653   :  { %v5726_v22 = vpop.f32.mrb[104].mxu1 }
0x2654   :  { %v4832_v34 = vmul.f32 %v5726_v22, %v5172_v32  ;;  %v4808_v26 = vpop.f32.mrb[105].mxu1 }
0x2655   :  { %v4830_v4 = vmul.f32 %v5172_v32, %v4808_v26  ;;  %v5727_v38 = vpop.f32.mrb[106].mxu1 }
0x2656   :  { %v4843_v31 = vadd.f32 %v5173_v35, %v4832_v34  ;;  %v4833_v42 = vmul.f32 %v5727_v38, %v5172_v32  ;;  %v4811_v40 = vpop.f32.mrb[107].mxu1 }
0x2657   :  { %v4841_v20 = vadd.f32 %v5173_v35, %v4830_v4  ;;  %v4831_v49 = vmul.f32 %v5172_v32, %v4811_v40 }
0x2658   :  { %v5176_v43 = vmul.f32 -1.442695, %v4843_v31  ;;  %v4844_v55 = vadd.f32 %v5173_v35, %v4833_v42 }
0x2659   :  { %v5174_v2 = vmul.f32 -1.442695, %v4841_v20  ;;  %v4842_v47 = vadd.f32 %v5173_v35, %v4831_v49 }
0x265a   :  { %6175 = vpow2.f32 %v5176_v43  ;;  %v5177_v29 = vmul.f32 -1.442695, %v4844_v55 }
0x265b   :  { %6177 = vpow2.f32 %v5174_v2  ;;  %v5175_v12 = vmul.f32 -1.442695, %v4842_v47 }
0x265c   :  { %6179 = vpow2.f32 %v5177_v29 }
0x265d   :  { %6181 = vpow2.f32 %v5175_v12 }
0x2664   :  { %v6176_v18 = vpop.eup %6175 }
0x2665   :  { %v6178_v28 = vpop.eup %6177  ;;  %v4859_v21 = vadd.f32 1.0, %v6176_v18 }
0x2666   :  { %v6180_v50 = vpop.eup %6179  ;;  %v4857_v46 = vadd.f32 1.0, %v6178_v28 }
0x2667   :  { %v6182_v30 = vpop.eup %6181  ;;  %6183 = vrcp.f32 %v4859_v21  ;;  %v4860_v1 = vadd.f32 1.0, %v6180_v50 }
0x2668   :  { %6185 = vrcp.f32 %v4857_v46  ;;  %v4858_v5 = vadd.f32 1.0, %v6182_v30 }
0x2669   :  { %6187 = vrcp.f32 %v4860_v1 }
0x266a   :  { %6189 = vrcp.f32 %v4858_v5 }
0x2671   :  { %v6184_v37 = vpop.eup %6183 }
0x2672   :  { %v6186_v39 = vpop.eup %6185  ;;  %v4871_v44 = vmul.f32 %v6184_v37, %v4843_v31 }
0x2673   :  { %v6188_v52 = vpop.eup %6187  ;;  %v4869_v53 = vmul.f32 %v6186_v39, %v4841_v20 }
0x2674   :  { %v6190_v19 = vpop.eup %6189  ;;  %4875 = vst.msk [vmem:[#allocation2 + $0x10] sm:$0xff] %vm280_vm0, %v4871_v44  ;;  %v4872_v59 = vmul.f32 %v6188_v52, %v4844_v55 }
0x2675   :  { %4873 = vst.msk [vmem:[#allocation2] sm:$0xff] %vm280_vm0, %v4869_v53  ;;  %v4870_v17 = vmul.f32 %v6190_v19, %v4842_v47 }
0x2676   :  { %4876 = vst.msk [vmem:[#allocation2 + $0x18] sm:$0xff] %vm280_vm0, %v4872_v59 }
0x2677   :  { %4874 = vst.msk [vmem:[#allocation2 + $0x8] sm:$0xff] %vm280_vm0, %v4870_v17 }
0x2678   :  { %6202 = shalt.err (!%p6199_p4)
}
0x2679   :  { %s6203_s15 = scalar_lea.hbm %s6443_s20, 512 }
0x267a   :  { %p6204_p5 = scmp.ne.s32.totalorder %s6443_s20, %s6203_s15  ;;  %p6207_p6 = scmp.lt.u32.totalorder %s6203_s15, %s6443_s20 }
0x267c   :  { %p6209_p7 = pnand %p6207_p6, %p6204_p5 }
0x267e   :  { %6212 = shalt.err (!%p6209_p7)
}
0x267f   :  { %s6259_s16 = smov 128  }
0x2680   :  { %4888 = dma.vmem_to_hbm [thread:$0]  %s4883_s27, 512, %s6443_s20, [#allocation3], %s6259_s16, %s6259_s16, %s6255_s17  }
0x2681   :  { %6213 = dma.done.wait [#allocation3], 512  }
0x2682   :  { %6214 = vsyncadd [#allocation3], 4294966784 }
0x2683   :  { %4892 = vsyncpa [#allocation3], 1 }

</bundles_post_ra>
